<compile_context>
chip_gen: v7x
topology: tpu7x:2x2x1
jax: 0.10.0
libtpu: 0.0.40
codegen_flags: <defaults>
</compile_context>

<pallas_src>
import functools
import math

import jax
import jax.numpy as jnp
from jax.experimental import pallas as pl
from jax.experimental.pallas import tpu as pltpu


# Order of the weight tensors fed to the kernel (after the 3 data inputs).
_WEIGHTS = (
    "cw1", "cb1", "cw2", "cb2",
    "dcb", "dsb", "icb", "isb", "gwr", "gwi",
    "pool", "w1a", "w1b", "w1c", "w1d", "indp", "ind6", "lin1_b",
    "ln_w", "ln_b",
    "wqkvT", "bqkv", "woT", "bo",
    "ln1w", "ln1b", "ff1wT", "ff1b", "ff2wT", "ff2b",
    "ln2w", "ln2b", "hw", "hb",
)


def _dtml_kernel(xh_ref, xw_ref, kpm_ref,
                 cw1_ref, cb1_ref, cw2_ref, cb2_ref,
                 dcb_ref, dsb_ref, icb_ref, isb_ref, gwr_ref, gwi_ref,
                 pool_ref, w1a_ref, w1b_ref, w1c_ref, w1d_ref,
                 indp_ref, ind6_ref, l1b_ref,
                 lnw_ref, lnb_ref,
                 wqkv_ref, bqkv_ref, wo_ref, bo_ref,
                 ln1w_ref, ln1b_ref, ff1w_ref, ff1b_ref, ff2w_ref, ff2b_ref,
                 ln2w_ref, ln2b_ref, hw_ref, hb_ref,
                 o_ref, *, beta, nhead):
    f32 = jnp.float32

    # ---- zoom-block inputs: tanh'd, per-sample zero-padded, flattened rows ----
    xh = jnp.tanh(xh_ref[0])              # (RP, F)  history windows, all S1 samples
    xw = jnp.tanh(xw_ref[0])              # (RP, F)  week windows
    F = xh.shape[1]
    RQ = indp_ref.shape[1]                # S1 * (L + 2P) rows of conv / filter outputs
    K = cw1_ref.shape[0] // F
    pv = pool_ref[...]                    # (1, F)  AvgPool((11,1)) + sum as channel weights

    # ---- CNN_Block: one im2col matmul (BN folded), ReLU, channel pooling ----
    def conv_pool(xp, w_ref, b_ref):
        cols = jnp.concatenate([xp[k:k + RQ, :] for k in range(K)], axis=1)   # (RQ, K*F)
        y = jnp.dot(cols, w_ref[...], preferred_element_type=f32) + b_ref[...]
        y = jnp.maximum(y, 0.0)
        return jnp.sum(y * pv, axis=-1, keepdims=True)                        # (RQ, 1)

    ra = conv_pool(xh, cw1_ref, cb1_ref)          # cnn(X_history), pooled
    rd = conv_pool(xw, cw2_ref, cb2_ref)          # cnn_week(X_week), pooled

    # ---- DFT(|rfft|) + GlobalFilter via block-diagonal real-DFT matmuls ----
    dcb = dcb_ref[...]                            # (S1*NF, RP)
    dsb = dsb_ref[...]
    reh = jnp.dot(dcb, xh, preferred_element_type=f32)
    imh = jnp.dot(dsb, xh, preferred_element_type=f32)
    rb = jnp.sum(jnp.sqrt(reh * reh + imh * imh) * pv, axis=-1, keepdims=True)  # (S1*NF,1)

    rew = jnp.dot(dcb, xw, preferred_element_type=f32)
    imw = jnp.dot(dsb, xw, preferred_element_type=f32)
    pr = rew * gwr_ref[...] - imw * gwi_ref[...]
    pi = rew * gwi_ref[...] + imw * gwr_ref[...]
    cf = (jnp.dot(icb_ref[...], pr, preferred_element_type=f32)
          + jnp.dot(isb_ref[...], pi, preferred_element_type=f32))            # (RQ, F)
    rc = jnp.sum(cf * pv, axis=-1, keepdims=True)                             # (RQ, 1)

    # ---- pooled zoom features -> linear1, folded into two matmuls ----
    h = (jnp.dot(indp_ref[...],
                 ra * w1a_ref[...] + rc * w1c_ref[...] + rd * w1d_ref[...],
                 preferred_element_type=f32)
         + jnp.dot(ind6_ref[...], rb * w1b_ref[...], preferred_element_type=f32)
         + l1b_ref[...])                                                      # (S1, H)

    # ---- LayerNorm over the whole (S1, H) slab, then stocks + beta * index ----
    mu = jnp.mean(h)
    var = jnp.mean((h - mu) ** 2)
    hn = (h - mu) * jax.lax.rsqrt(var + 1e-5) * lnw_ref[...] + lnb_ref[...]
    S1 = hn.shape[0]
    S = S1 - 1
    hs = hn[0:S, :] + beta * hn[S:S1, :]                                      # (S, H)
    H = hs.shape[1]
    hd = H // nhead
    scale = 1.0 / math.sqrt(hd)

    # ---- TransformerEncoderLayer (post-norm), heads batched in one einsum ----
    qkv = jnp.dot(hs, wqkv_ref[...], preferred_element_type=f32) + bqkv_ref[...]
    qh = jnp.stack([qkv[:, n * hd:(n + 1) * hd] for n in range(nhead)], axis=0)
    kh = jnp.stack([qkv[:, H + n * hd:H + (n + 1) * hd] for n in range(nhead)], axis=0)
    vh = jnp.stack([qkv[:, 2 * H + n * hd:2 * H + (n + 1) * hd] for n in range(nhead)], axis=0)

    sc = jnp.einsum('nqd,nkd->nqk', qh, kh, preferred_element_type=f32) * scale
    pad = (kpm_ref[0] > 0.5)[None]                      # (1, 1, S)  True = padded key
    sc = jnp.where(pad, -1e9, sc)                       # finite mask value (no NaNs)
    m = jnp.max(sc, axis=-1, keepdims=True)
    e = jnp.exp(sc - m)
    p = e * pl.reciprocal(jnp.sum(e, axis=-1, keepdims=True), approx=True)
    ctx = jnp.einsum('nqk,nkd->nqd', p, vh, preferred_element_type=f32)       # (nh, S, hd)
    attn = jnp.concatenate([ctx[n] for n in range(nhead)], axis=-1)           # (S, H)
    attn = jnp.dot(attn, wo_ref[...], preferred_element_type=f32) + bo_ref[...]

    def ln_rows(t, w, b):
        mu_r = jnp.mean(t, axis=-1, keepdims=True)
        var_r = jnp.mean((t - mu_r) ** 2, axis=-1, keepdims=True)
        return (t - mu_r) * jax.lax.rsqrt(var_r + 1e-5) * w + b

    src = ln_rows(hs + attn, ln1w_ref[...], ln1b_ref[...])
    ff = jnp.maximum(jnp.dot(src, ff1w_ref[...], preferred_element_type=f32)
                     + ff1b_ref[...], 0.0)
    ff = jnp.dot(ff, ff2w_ref[...], preferred_element_type=f32) + ff2b_ref[...]
    src = ln_rows(src + ff, ln2w_ref[...], ln2b_ref[...])

    # ---- DTML tail: tanh + linear2, written lane-dense as one (1, S) row ----
    y = jnp.tanh(src)
    row = jax.lax.dot_general(hw_ref[...], y, (((1,), (1,)), ((), ())),
                              preferred_element_type=f32) + hb_ref[...]       # (1, S)
    o_ref[0] = row


def dtml_forward(x, mask, params, *, beta=1.0, nhead=4, window=50):
    B, S1, T, F = x.shape
    assert T == window
    L = window // 5
    P, K = 2, 5
    LP = L + 2 * P

    # X_history = last L steps, X_week = every 5th step.  tanh is applied inside
    # the kernel (it commutes with the slicing, and tanh(0)=0 keeps the conv
    # zero padding valid).  Only these tiny slices hit HBM — no transposed copy.
    xh = x[:, :, T - L:, :]
    xw = x[:, :, ::5, :]

    def flat_pad(a):
        a = jnp.pad(a, ((0, 0), (0, 0), (P, P), (0, 0)))       # per-sample conv pad
        a = a.reshape(B, S1 * LP, F)
        return jnp.pad(a, ((0, 0), (0, K - 1), (0, 0)))        # im2col tail pad

    xh_f = flat_pad(xh)                                         # (B, RP, F)
    xw_f = flat_pad(xw)
    RP = xh_f.shape[1]
    S = S1 - 1
    kpm = (~mask).astype(jnp.float32)[:, None, :]               # (B, 1, S), 1.0 = pad

    def wspec(a):
        return pl.BlockSpec(a.shape, lambda b, _n=a.ndim: (0,) * _n)

    in_specs = [
        pl.BlockSpec((1, RP, F), lambda b: (b, 0, 0)),
        pl.BlockSpec((1, RP, F), lambda b: (b, 0, 0)),
        pl.BlockSpec((1, 1, S), lambda b: (b, 0, 0)),
    ] + [wspec(params[k]) for k in _WEIGHTS]

    out = pl.pallas_call(
        functools.partial(_dtml_kernel, beta=float(beta), nhead=nhead),
        grid=(B,),
        in_specs=in_specs,
        out_specs=pl.BlockSpec((1, 1, S), lambda b: (b, 0, 0)),
        out_shape=jax.ShapeDtypeStruct((B, 1, S), jnp.float32),
        compiler_params=pltpu.CompilerParams(
            dimension_semantics=("parallel",)),   # batch rows split across TCs on v7x
    )(xh_f, xw_f, kpm, *[params[k] for k in _WEIGHTS])
    return out[:, 0, :]                                         # (B, num_stocks)


# -----------------------------------------------------------------------------
# Deterministic parameter init (+ host-side inference-time weight preparation).
# -----------------------------------------------------------------------------
def init_params(key, F, S1, H, MLP, window=50, eps=1e-5):
    ks = list(jax.random.split(key, 32))

    def nrm(shape, scale=0.05):
        return (jax.random.normal(ks.pop(), shape) * scale).astype(jnp.float32)

    K, P = 5, 2
    L = window // 5                      # 10
    NF = L // 2 + 1                      # 6 rfft bins
    LP = L + 2 * P
    POOL = 11
    assert F >= POOL, "AvgPool2d((11, 1)) needs at least 11 channels"

    def fold_bn(w, b, gamma, bnb, mean, var):
        s = gamma / jnp.sqrt(var + eps)
        return w * s[:, None, None], (b - mean) * s + bnb

    def cnn_block():                     # Conv1d + eval-mode BatchNorm folded, im2col layout
        w, b = nrm((F, F, K)), nrm((F,))
        gamma, bnb, mean = 1.0 + nrm((F,)), nrm((F,)), nrm((F,))
        var = 1.0 + 0.5 * jnp.abs(nrm((F,)))
        wf, bf = fold_bn(w, b, gamma, bnb, mean, var)
        return jnp.transpose(wf, (2, 1, 0)).reshape(K * F, F), bf.reshape(1, F)

    cw1, cb1 = cnn_block()
    cw2, cb2 = cnn_block()

    # GlobalFilter complex weight, tiled over the S1 samples of one batch row.
    gw = nrm((F, NF, 2), 0.02)
    gwr = jnp.tile(gw[..., 0].T, (S1, 1))              # (S1*NF, F)
    gwi = jnp.tile(gw[..., 1].T, (S1, 1))

    # Real-DFT matrices (rfft / irfft, length L), block-diagonal over samples,
    # laid out for the per-sample zero-padded row layout used by the kernel.
    t = jnp.arange(L, dtype=jnp.float32)[:, None]
    k = jnp.arange(NF, dtype=jnp.float32)[None, :]
    ang = 2.0 * jnp.pi * t * k / L                     # (L, NF)
    coef = jnp.array([1.0] + [2.0] * (NF - 2) + [1.0], jnp.float32)[None, :]
    dcos = jnp.pad(jnp.cos(ang).T, ((0, 0), (P, P)))   # (NF, LP)
    dsin = jnp.pad(-jnp.sin(ang).T, ((0, 0), (P, P)))
    icos = jnp.pad(coef * jnp.cos(ang) / L, ((0, LP - L), (0, 0)))   # (LP, NF)
    isin = jnp.pad(-coef * jnp.sin(ang) / L, ((0, LP - L), (0, 0)))
    eye = jnp.eye(S1, dtype=jnp.float32)
    dcb = jnp.pad(jnp.kron(eye, dcos), ((0, 0), (0, K - 1)))         # (S1*NF, RP)
    dsb = jnp.pad(jnp.kron(eye, dsin), ((0, 0), (0, K - 1)))
    icb = jnp.kron(eye, icos)                                        # (S1*LP, S1*NF)
    isb = jnp.kron(eye, isin)

    # AvgPool2d((11,1), stride=1) + sum over the window axis == one fixed
    # per-channel weighting vector.
    cidx = jnp.arange(F)
    cnt = jnp.minimum(cidx, F - POOL) - jnp.maximum(0, cidx - (POOL - 1)) + 1
    pool = (cnt.astype(jnp.float32) / POOL).reshape(1, F)

    # linear1 (36 -> H): split per zoom component and tiled to the padded row
    # layout, so pooling + linear1 collapse into two matmuls inside the kernel.
    lin1_w, lin1_b = nrm((H, 3 * L + NF)), nrm((H,))
    lin1_wT = lin1_w.T                                               # (36, H)

    def tile_rows(block):                                            # (L,H)->(S1*LP,H)
        return jnp.tile(jnp.pad(block, ((0, LP - L), (0, 0))), (S1, 1))

    w1a = tile_rows(lin1_wT[0:L])                       # CNN(history) columns
    w1b = jnp.tile(lin1_wT[L:L + NF], (S1, 1))          # DFT columns
    w1c = tile_rows(lin1_wT[L + NF:2 * L + NF])         # GlobalFilter columns
    w1d = tile_rows(lin1_wT[2 * L + NF:3 * L + NF])     # CNN(week) columns
    valid = jnp.pad(jnp.ones((1, L), jnp.float32), ((0, 0), (0, LP - L)))
    indp = jnp.kron(eye, valid)                         # (S1, S1*LP)
    ind6 = jnp.kron(eye, jnp.ones((1, NF), jnp.float32))

    wqkv, bqkv = nrm((3 * H, H)), nrm((3 * H,))
    wo, bo = nrm((H, H)), nrm((H,))
    ff1w, ff1b = nrm((MLP, H)), nrm((MLP,))
    ff2w, ff2b = nrm((H, MLP)), nrm((H,))
    hw, hb = nrm((1, H)), nrm((1,))                     # DTML.linear2 (H -> 1)

    return dict(
        cw1=cw1, cb1=cb1, cw2=cw2, cb2=cb2,
        dcb=dcb, dsb=dsb, icb=icb, isb=isb, gwr=gwr, gwi=gwi,
        pool=pool, w1a=w1a, w1b=w1b, w1c=w1c, w1d=w1d,
        indp=indp, ind6=ind6, lin1_b=lin1_b.reshape(1, H),
        ln_w=jnp.ones((S1, H), jnp.float32), ln_b=jnp.zeros((S1, H), jnp.float32),
        wqkvT=wqkv.T, bqkv=bqkv.reshape(1, 3 * H),
        woT=wo.T, bo=bo.reshape(1, H),
        ln1w=jnp.ones((1, H), jnp.float32), ln1b=jnp.zeros((1, H), jnp.float32),
        ff1wT=ff1w.T, ff1b=ff1b.reshape(1, MLP),
        ff2wT=ff2w.T, ff2b=ff2b.reshape(1, H),
        ln2w=jnp.ones((1, H), jnp.float32), ln2b=jnp.zeros((1, H), jnp.float32),
        hw=hw, hb=hb.reshape(1, 1),
    )
    # TODO(synk): AttnLSTM / linear3 are defined in DTML.__init__ but never used
    # in forward(), so they are intentionally omitted.


if __name__ == "__main__":
    B, NUM_STOCKS, WINDOW, F = 2, 4, 50, 12   # F >= 11 required by AvgPool2d((11, 1))
    H, NHEAD, MLP_FACTOR = 32, 4, 4
    S1 = NUM_STOCKS + 1

    key = jax.random.PRNGKey(0)
    kx, kp = jax.random.split(key)
    x = jax.random.normal(kx, (B, S1, WINDOW, F), jnp.float32)
    mask = jnp.ones((B, NUM_STOCKS), dtype=bool)          # True = valid stock

    params = init_params(kp, F, S1, H, H * MLP_FACTOR, window=WINDOW)
    out = dtml_forward(x, mask, params, beta=1.0, nhead=NHEAD, window=WINDOW)
    out = jax.block_until_ready(out)
    assert out.shape == (B, NUM_STOCKS) and out.dtype == jnp.float32
    assert bool(jnp.all(jnp.isfinite(out)))
    print("KERNEL_OK")
</pallas_src>

<mosaic_0001>
module attributes {stable_mosaic.version = 11 : i64} {
  func.func @_dtml_kernel(%arg0: i32, %arg1: memref<1x74x12xf32, #tpu.memory_space<vmem>>, %arg2: memref<1x74x12xf32, #tpu.memory_space<vmem>>, %arg3: memref<1x1x4xf32, #tpu.memory_space<vmem>>, %arg4: memref<60x12xf32, #tpu.memory_space<vmem>>, %arg5: memref<1x12xf32, #tpu.memory_space<vmem>>, %arg6: memref<60x12xf32, #tpu.memory_space<vmem>>, %arg7: memref<1x12xf32, #tpu.memory_space<vmem>>, %arg8: memref<30x74xf32, #tpu.memory_space<vmem>>, %arg9: memref<30x74xf32, #tpu.memory_space<vmem>>, %arg10: memref<70x30xf32, #tpu.memory_space<vmem>>, %arg11: memref<70x30xf32, #tpu.memory_space<vmem>>, %arg12: memref<30x12xf32, #tpu.memory_space<vmem>>, %arg13: memref<30x12xf32, #tpu.memory_space<vmem>>, %arg14: memref<1x12xf32, #tpu.memory_space<vmem>>, %arg15: memref<70x32xf32, #tpu.memory_space<vmem>>, %arg16: memref<30x32xf32, #tpu.memory_space<vmem>>, %arg17: memref<70x32xf32, #tpu.memory_space<vmem>>, %arg18: memref<70x32xf32, #tpu.memory_space<vmem>>, %arg19: memref<5x70xf32, #tpu.memory_space<vmem>>, %arg20: memref<5x30xf32, #tpu.memory_space<vmem>>, %arg21: memref<1x32xf32, #tpu.memory_space<vmem>>, %arg22: memref<5x32xf32, #tpu.memory_space<vmem>>, %arg23: memref<5x32xf32, #tpu.memory_space<vmem>>, %arg24: memref<32x96xf32, #tpu.memory_space<vmem>>, %arg25: memref<1x96xf32, #tpu.memory_space<vmem>>, %arg26: memref<32x32xf32, #tpu.memory_space<vmem>>, %arg27: memref<1x32xf32, #tpu.memory_space<vmem>>, %arg28: memref<1x32xf32, #tpu.memory_space<vmem>>, %arg29: memref<1x32xf32, #tpu.memory_space<vmem>>, %arg30: memref<32x128xf32, #tpu.memory_space<vmem>>, %arg31: memref<1x128xf32, #tpu.memory_space<vmem>>, %arg32: memref<128x32xf32, #tpu.memory_space<vmem>>, %arg33: memref<1x32xf32, #tpu.memory_space<vmem>>, %arg34: memref<1x32xf32, #tpu.memory_space<vmem>>, %arg35: memref<1x32xf32, #tpu.memory_space<vmem>>, %arg36: memref<1x32xf32, #tpu.memory_space<vmem>>, %arg37: memref<1x1xf32, #tpu.memory_space<vmem>>, %arg38: memref<1x1x4xf32, #tpu.memory_space<vmem>>) attributes {dimension_semantics = [#tpu.dimension_semantics<parallel>], iteration_bounds = array<i64: 2>, scalar_prefetch = 0 : i64, scratch_operands = 0 : i64, tpu.core_type = #tpu.core_type<tc>, window_params = [{transform_indices = @transform_0, window_bounds = array<i64: 1, 74, 12>}, {transform_indices = @transform_1, window_bounds = array<i64: 1, 74, 12>}, {transform_indices = @transform_2, window_bounds = array<i64: 1, 1, 4>}, {pipeline_mode = #tpu.pipeline_mode<synchronous>, transform_indices = @transform_3, window_bounds = array<i64: 60, 12>}, {pipeline_mode = #tpu.pipeline_mode<synchronous>, transform_indices = @transform_4, window_bounds = array<i64: 1, 12>}, {pipeline_mode = #tpu.pipeline_mode<synchronous>, transform_indices = @transform_5, window_bounds = array<i64: 60, 12>}, {pipeline_mode = #tpu.pipeline_mode<synchronous>, transform_indices = @transform_6, window_bounds = array<i64: 1, 12>}, {pipeline_mode = #tpu.pipeline_mode<synchronous>, transform_indices = @transform_7, window_bounds = array<i64: 30, 74>}, {pipeline_mode = #tpu.pipeline_mode<synchronous>, transform_indices = @transform_8, window_bounds = array<i64: 30, 74>}, {pipeline_mode = #tpu.pipeline_mode<synchronous>, transform_indices = @transform_9, window_bounds = array<i64: 70, 30>}, {pipeline_mode = #tpu.pipeline_mode<synchronous>, transform_indices = @transform_10, window_bounds = array<i64: 70, 30>}, {pipeline_mode = #tpu.pipeline_mode<synchronous>, transform_indices = @transform_11, window_bounds = array<i64: 30, 12>}, {pipeline_mode = #tpu.pipeline_mode<synchronous>, transform_indices = @transform_12, window_bounds = array<i64: 30, 12>}, {pipeline_mode = #tpu.pipeline_mode<synchronous>, transform_indices = @transform_13, window_bounds = array<i64: 1, 12>}, {pipeline_mode = #tpu.pipeline_mode<synchronous>, transform_indices = @transform_14, window_bounds = array<i64: 70, 32>}, {pipeline_mode = #tpu.pipeline_mode<synchronous>, transform_indices = @transform_15, window_bounds = array<i64: 30, 32>}, {pipeline_mode = #tpu.pipeline_mode<synchronous>, transform_indices = @transform_16, window_bounds = array<i64: 70, 32>}, {pipeline_mode = #tpu.pipeline_mode<synchronous>, transform_indices = @transform_17, window_bounds = array<i64: 70, 32>}, {pipeline_mode = #tpu.pipeline_mode<synchronous>, transform_indices = @transform_18, window_bounds = array<i64: 5, 70>}, {pipeline_mode = #tpu.pipeline_mode<synchronous>, transform_indices = @transform_19, window_bounds = array<i64: 5, 30>}, {pipeline_mode = #tpu.pipeline_mode<synchronous>, transform_indices = @transform_20, window_bounds = array<i64: 1, 32>}, {pipeline_mode = #tpu.pipeline_mode<synchronous>, transform_indices = @transform_21, window_bounds = array<i64: 5, 32>}, {pipeline_mode = #tpu.pipeline_mode<synchronous>, transform_indices = @transform_22, window_bounds = array<i64: 5, 32>}, {pipeline_mode = #tpu.pipeline_mode<synchronous>, transform_indices = @transform_23, window_bounds = array<i64: 32, 96>}, {pipeline_mode = #tpu.pipeline_mode<synchronous>, transform_indices = @transform_24, window_bounds = array<i64: 1, 96>}, {pipeline_mode = #tpu.pipeline_mode<synchronous>, transform_indices = @transform_25, window_bounds = array<i64: 32, 32>}, {pipeline_mode = #tpu.pipeline_mode<synchronous>, transform_indices = @transform_26, window_bounds = array<i64: 1, 32>}, {pipeline_mode = #tpu.pipeline_mode<synchronous>, transform_indices = @transform_27, window_bounds = array<i64: 1, 32>}, {pipeline_mode = #tpu.pipeline_mode<synchronous>, transform_indices = @transform_28, window_bounds = array<i64: 1, 32>}, {pipeline_mode = #tpu.pipeline_mode<synchronous>, transform_indices = @transform_29, window_bounds = array<i64: 32, 128>}, {pipeline_mode = #tpu.pipeline_mode<synchronous>, transform_indices = @transform_30, window_bounds = array<i64: 1, 128>}, {pipeline_mode = #tpu.pipeline_mode<synchronous>, transform_indices = @transform_31, window_bounds = array<i64: 128, 32>}, {pipeline_mode = #tpu.pipeline_mode<synchronous>, transform_indices = @transform_32, window_bounds = array<i64: 1, 32>}, {pipeline_mode = #tpu.pipeline_mode<synchronous>, transform_indices = @transform_33, window_bounds = array<i64: 1, 32>}, {pipeline_mode = #tpu.pipeline_mode<synchronous>, transform_indices = @transform_34, window_bounds = array<i64: 1, 32>}, {pipeline_mode = #tpu.pipeline_mode<synchronous>, transform_indices = @transform_35, window_bounds = array<i64: 1, 32>}, {pipeline_mode = #tpu.pipeline_mode<synchronous>, transform_indices = @transform_36, window_bounds = array<i64: 1, 1>}, {transform_indices = @transform_37, window_bounds = array<i64: 1, 1, 4>}]} {
    %c0 = arith.constant 0 : index
    %c0_0 = arith.constant 0 : index
    %c0_1 = arith.constant 0 : index
    %0 = vector.load %arg1[%c0, %c0_0, %c0_1] : memref<1x74x12xf32, #tpu.memory_space<vmem>>, vector<1x74x12xf32>
    %1 = vector.shape_cast %0 : vector<1x74x12xf32> to vector<74x12xf32>
    %2 = math.tanh %1 : vector<74x12xf32>
    %c0_2 = arith.constant 0 : index
    %c0_3 = arith.constant 0 : index
    %c0_4 = arith.constant 0 : index
    %3 = vector.load %arg2[%c0_2, %c0_3, %c0_4] : memref<1x74x12xf32, #tpu.memory_space<vmem>>, vector<1x74x12xf32>
    %4 = vector.shape_cast %3 : vector<1x74x12xf32> to vector<74x12xf32>
    %5 = math.tanh %4 : vector<74x12xf32>
    %c0_5 = arith.constant 0 : index
    %c0_6 = arith.constant 0 : index
    %6 = vector.load %arg14[%c0_5, %c0_6] : memref<1x12xf32, #tpu.memory_space<vmem>>, vector<1x12xf32>
    %7 = vector.extract_strided_slice %2 {offsets = [0, 0], sizes = [70, 12], strides = [1, 1]} : vector<74x12xf32> to vector<70x12xf32>
    %8 = vector.extract_strided_slice %2 {offsets = [1, 0], sizes = [70, 12], strides = [1, 1]} : vector<74x12xf32> to vector<70x12xf32>
    %9 = vector.extract_strided_slice %2 {offsets = [2, 0], sizes = [70, 12], strides = [1, 1]} : vector<74x12xf32> to vector<70x12xf32>
    %10 = vector.extract_strided_slice %2 {offsets = [3, 0], sizes = [70, 12], strides = [1, 1]} : vector<74x12xf32> to vector<70x12xf32>
    %11 = vector.extract_strided_slice %2 {offsets = [4, 0], sizes = [70, 12], strides = [1, 1]} : vector<74x12xf32> to vector<70x12xf32>
    %12 = tpu.concatenate %7, %8, %9, %10, %11 in 1 : vector<70x12xf32>, vector<70x12xf32>, vector<70x12xf32>, vector<70x12xf32>, vector<70x12xf32> -> vector<70x60xf32>
    %c0_7 = arith.constant 0 : index
    %c0_8 = arith.constant 0 : index
    %13 = vector.load %arg4[%c0_7, %c0_8] : memref<60x12xf32, #tpu.memory_space<vmem>>, vector<60x12xf32>
    %cst = arith.constant dense<0.000000e+00> : vector<70x12xf32>
    %14 = tpu.matmul %12, %13, %cst {dimension_numbers = #tpu.dot_dimension_numbers<[1], [0], [0], [1], [0, 0, 1, 1], [], []>} : vector<70x60xf32>, vector<60x12xf32>, vector<70x12xf32> -> vector<70x12xf32>
    %c0_9 = arith.constant 0 : index
    %c0_10 = arith.constant 0 : index
    %15 = vector.load %arg5[%c0_9, %c0_10] : memref<1x12xf32, #tpu.memory_space<vmem>>, vector<1x12xf32>
    %16 = vector.broadcast %15 : vector<1x12xf32> to vector<70x12xf32>
    %17 = arith.addf %14, %16 : vector<70x12xf32>
    %cst_11 = arith.constant 0.000000e+00 : f32
    %18 = vector.broadcast %cst_11 : f32 to vector<70x12xf32>
    %19 = arith.maximumf %17, %18 : vector<70x12xf32>
    %20 = vector.broadcast %6 : vector<1x12xf32> to vector<70x12xf32>
    %21 = arith.mulf %19, %20 : vector<70x12xf32>
    %cst_12 = arith.constant dense<0.000000e+00> : vector<70xf32>
    %22 = vector.multi_reduction <add>, %21, %cst_12 [1] : vector<70x12xf32> to vector<70xf32>
    %23 = vector.shape_cast %22 : vector<70xf32> to vector<70x1xf32>
    %24 = vector.extract_strided_slice %5 {offsets = [0, 0], sizes = [70, 12], strides = [1, 1]} : vector<74x12xf32> to vector<70x12xf32>
    %25 = vector.extract_strided_slice %5 {offsets = [1, 0], sizes = [70, 12], strides = [1, 1]} : vector<74x12xf32> to vector<70x12xf32>
    %26 = vector.extract_strided_slice %5 {offsets = [2, 0], sizes = [70, 12], strides = [1, 1]} : vector<74x12xf32> to vector<70x12xf32>
    %27 = vector.extract_strided_slice %5 {offsets = [3, 0], sizes = [70, 12], strides = [1, 1]} : vector<74x12xf32> to vector<70x12xf32>
    %28 = vector.extract_strided_slice %5 {offsets = [4, 0], sizes = [70, 12], strides = [1, 1]} : vector<74x12xf32> to vector<70x12xf32>
    %29 = tpu.concatenate %24, %25, %26, %27, %28 in 1 : vector<70x12xf32>, vector<70x12xf32>, vector<70x12xf32>, vector<70x12xf32>, vector<70x12xf32> -> vector<70x60xf32>
    %c0_13 = arith.constant 0 : index
    %c0_14 = arith.constant 0 : index
    %30 = vector.load %arg6[%c0_13, %c0_14] : memref<60x12xf32, #tpu.memory_space<vmem>>, vector<60x12xf32>
    %cst_15 = arith.constant dense<0.000000e+00> : vector<70x12xf32>
    %31 = tpu.matmul %29, %30, %cst_15 {dimension_numbers = #tpu.dot_dimension_numbers<[1], [0], [0], [1], [0, 0, 1, 1], [], []>} : vector<70x60xf32>, vector<60x12xf32>, vector<70x12xf32> -> vector<70x12xf32>
    %c0_16 = arith.constant 0 : index
    %c0_17 = arith.constant 0 : index
    %32 = vector.load %arg7[%c0_16, %c0_17] : memref<1x12xf32, #tpu.memory_space<vmem>>, vector<1x12xf32>
    %33 = vector.broadcast %32 : vector<1x12xf32> to vector<70x12xf32>
    %34 = arith.addf %31, %33 : vector<70x12xf32>
    %cst_18 = arith.constant 0.000000e+00 : f32
    %35 = vector.broadcast %cst_18 : f32 to vector<70x12xf32>
    %36 = arith.maximumf %34, %35 : vector<70x12xf32>
    %37 = vector.broadcast %6 : vector<1x12xf32> to vector<70x12xf32>
    %38 = arith.mulf %36, %37 : vector<70x12xf32>
    %cst_19 = arith.constant dense<0.000000e+00> : vector<70xf32>
    %39 = vector.multi_reduction <add>, %38, %cst_19 [1] : vector<70x12xf32> to vector<70xf32>
    %40 = vector.shape_cast %39 : vector<70xf32> to vector<70x1xf32>
    %c0_20 = arith.constant 0 : index
    %c0_21 = arith.constant 0 : index
    %41 = vector.load %arg8[%c0_20, %c0_21] : memref<30x74xf32, #tpu.memory_space<vmem>>, vector<30x74xf32>
    %c0_22 = arith.constant 0 : index
    %c0_23 = arith.constant 0 : index
    %42 = vector.load %arg9[%c0_22, %c0_23] : memref<30x74xf32, #tpu.memory_space<vmem>>, vector<30x74xf32>
    %cst_24 = arith.constant dense<0.000000e+00> : vector<30x12xf32>
    %43 = tpu.matmul %41, %2, %cst_24 {dimension_numbers = #tpu.dot_dimension_numbers<[1], [0], [0], [1], [0, 0, 1, 1], [], []>} : vector<30x74xf32>, vector<74x12xf32>, vector<30x12xf32> -> vector<30x12xf32>
    %cst_25 = arith.constant dense<0.000000e+00> : vector<30x12xf32>
    %44 = tpu.matmul %42, %2, %cst_25 {dimension_numbers = #tpu.dot_dimension_numbers<[1], [0], [0], [1], [0, 0, 1, 1], [], []>} : vector<30x74xf32>, vector<74x12xf32>, vector<30x12xf32> -> vector<30x12xf32>
    %45 = arith.mulf %43, %43 : vector<30x12xf32>
    %46 = arith.mulf %44, %44 : vector<30x12xf32>
    %47 = arith.addf %45, %46 : vector<30x12xf32>
    %48 = math.sqrt %47 : vector<30x12xf32>
    %49 = vector.broadcast %6 : vector<1x12xf32> to vector<30x12xf32>
    %50 = arith.mulf %48, %49 : vector<30x12xf32>
    %cst_26 = arith.constant dense<0.000000e+00> : vector<30xf32>
    %51 = vector.multi_reduction <add>, %50, %cst_26 [1] : vector<30x12xf32> to vector<30xf32>
    %52 = vector.shape_cast %51 : vector<30xf32> to vector<30x1xf32>
    %cst_27 = arith.constant dense<0.000000e+00> : vector<30x12xf32>
    %53 = tpu.matmul %41, %5, %cst_27 {dimension_numbers = #tpu.dot_dimension_numbers<[1], [0], [0], [1], [0, 0, 1, 1], [], []>} : vector<30x74xf32>, vector<74x12xf32>, vector<30x12xf32> -> vector<30x12xf32>
    %cst_28 = arith.constant dense<0.000000e+00> : vector<30x12xf32>
    %54 = tpu.matmul %42, %5, %cst_28 {dimension_numbers = #tpu.dot_dimension_numbers<[1], [0], [0], [1], [0, 0, 1, 1], [], []>} : vector<30x74xf32>, vector<74x12xf32>, vector<30x12xf32> -> vector<30x12xf32>
    %c0_29 = arith.constant 0 : index
    %c0_30 = arith.constant 0 : index
    %55 = vector.load %arg12[%c0_29, %c0_30] : memref<30x12xf32, #tpu.memory_space<vmem>>, vector<30x12xf32>
    %56 = arith.mulf %53, %55 : vector<30x12xf32>
    %c0_31 = arith.constant 0 : index
    %c0_32 = arith.constant 0 : index
    %57 = vector.load %arg13[%c0_31, %c0_32] : memref<30x12xf32, #tpu.memory_space<vmem>>, vector<30x12xf32>
    %58 = arith.mulf %54, %57 : vector<30x12xf32>
    %59 = arith.subf %56, %58 : vector<30x12xf32>
    %c0_33 = arith.constant 0 : index
    %c0_34 = arith.constant 0 : index
    %60 = vector.load %arg13[%c0_33, %c0_34] : memref<30x12xf32, #tpu.memory_space<vmem>>, vector<30x12xf32>
    %61 = arith.mulf %53, %60 : vector<30x12xf32>
    %c0_35 = arith.constant 0 : index
    %c0_36 = arith.constant 0 : index
    %62 = vector.load %arg12[%c0_35, %c0_36] : memref<30x12xf32, #tpu.memory_space<vmem>>, vector<30x12xf32>
    %63 = arith.mulf %54, %62 : vector<30x12xf32>
    %64 = arith.addf %61, %63 : vector<30x12xf32>
    %c0_37 = arith.constant 0 : index
    %c0_38 = arith.constant 0 : index
    %65 = vector.load %arg10[%c0_37, %c0_38] : memref<70x30xf32, #tpu.memory_space<vmem>>, vector<70x30xf32>
    %cst_39 = arith.constant dense<0.000000e+00> : vector<70x12xf32>
    %66 = tpu.matmul %65, %59, %cst_39 {dimension_numbers = #tpu.dot_dimension_numbers<[1], [0], [0], [1], [0, 0, 1, 1], [], []>} : vector<70x30xf32>, vector<30x12xf32>, vector<70x12xf32> -> vector<70x12xf32>
    %c0_40 = arith.constant 0 : index
    %c0_41 = arith.constant 0 : index
    %67 = vector.load %arg11[%c0_40, %c0_41] : memref<70x30xf32, #tpu.memory_space<vmem>>, vector<70x30xf32>
    %cst_42 = arith.constant dense<0.000000e+00> : vector<70x12xf32>
    %68 = tpu.matmul %67, %64, %cst_42 {dimension_numbers = #tpu.dot_dimension_numbers<[1], [0], [0], [1], [0, 0, 1, 1], [], []>} : vector<70x30xf32>, vector<30x12xf32>, vector<70x12xf32> -> vector<70x12xf32>
    %69 = arith.addf %66, %68 : vector<70x12xf32>
    %70 = vector.broadcast %6 : vector<1x12xf32> to vector<70x12xf32>
    %71 = arith.mulf %69, %70 : vector<70x12xf32>
    %cst_43 = arith.constant dense<0.000000e+00> : vector<70xf32>
    %72 = vector.multi_reduction <add>, %71, %cst_43 [1] : vector<70x12xf32> to vector<70xf32>
    %73 = vector.shape_cast %72 : vector<70xf32> to vector<70x1xf32>
    %c0_44 = arith.constant 0 : index
    %c0_45 = arith.constant 0 : index
    %74 = vector.load %arg19[%c0_44, %c0_45] : memref<5x70xf32, #tpu.memory_space<vmem>>, vector<5x70xf32>
    %c0_46 = arith.constant 0 : index
    %c0_47 = arith.constant 0 : index
    %75 = vector.load %arg15[%c0_46, %c0_47] : memref<70x32xf32, #tpu.memory_space<vmem>>, vector<70x32xf32>
    %76 = vector.broadcast %23 : vector<70x1xf32> to vector<70x32xf32>
    %77 = arith.mulf %76, %75 : vector<70x32xf32>
    %c0_48 = arith.constant 0 : index
    %c0_49 = arith.constant 0 : index
    %78 = vector.load %arg17[%c0_48, %c0_49] : memref<70x32xf32, #tpu.memory_space<vmem>>, vector<70x32xf32>
    %79 = vector.broadcast %73 : vector<70x1xf32> to vector<70x32xf32>
    %80 = arith.mulf %79, %78 : vector<70x32xf32>
    %81 = arith.addf %77, %80 : vector<70x32xf32>
    %c0_50 = arith.constant 0 : index
    %c0_51 = arith.constant 0 : index
    %82 = vector.load %arg18[%c0_50, %c0_51] : memref<70x32xf32, #tpu.memory_space<vmem>>, vector<70x32xf32>
    %83 = vector.broadcast %40 : vector<70x1xf32> to vector<70x32xf32>
    %84 = arith.mulf %83, %82 : vector<70x32xf32>
    %85 = arith.addf %81, %84 : vector<70x32xf32>
    %cst_52 = arith.constant dense<0.000000e+00> : vector<5x32xf32>
    %86 = tpu.matmul %74, %85, %cst_52 {dimension_numbers = #tpu.dot_dimension_numbers<[1], [0], [0], [1], [0, 0, 1, 1], [], []>} : vector<5x70xf32>, vector<70x32xf32>, vector<5x32xf32> -> vector<5x32xf32>
    %c0_53 = arith.constant 0 : index
    %c0_54 = arith.constant 0 : index
    %87 = vector.load %arg20[%c0_53, %c0_54] : memref<5x30xf32, #tpu.memory_space<vmem>>, vector<5x30xf32>
    %c0_55 = arith.constant 0 : index
    %c0_56 = arith.constant 0 : index
    %88 = vector.load %arg16[%c0_55, %c0_56] : memref<30x32xf32, #tpu.memory_space<vmem>>, vector<30x32xf32>
    %89 = vector.broadcast %52 : vector<30x1xf32> to vector<30x32xf32>
    %90 = arith.mulf %89, %88 : vector<30x32xf32>
    %cst_57 = arith.constant dense<0.000000e+00> : vector<5x32xf32>
    %91 = tpu.matmul %87, %90, %cst_57 {dimension_numbers = #tpu.dot_dimension_numbers<[1], [0], [0], [1], [0, 0, 1, 1], [], []>} : vector<5x30xf32>, vector<30x32xf32>, vector<5x32xf32> -> vector<5x32xf32>
    %92 = arith.addf %86, %91 : vector<5x32xf32>
    %c0_58 = arith.constant 0 : index
    %c0_59 = arith.constant 0 : index
    %93 = vector.load %arg21[%c0_58, %c0_59] : memref<1x32xf32, #tpu.memory_space<vmem>>, vector<1x32xf32>
    %94 = vector.broadcast %93 : vector<1x32xf32> to vector<5x32xf32>
    %95 = arith.addf %92, %94 : vector<5x32xf32>
    %96 = vector.shape_cast %95 : vector<5x32xf32> to vector<1x5x32xf32>
    %cst_60 = arith.constant dense<0.000000e+00> : vector<1xf32>
    %97 = vector.multi_reduction <add>, %96, %cst_60 [1, 2] : vector<1x5x32xf32> to vector<1xf32>
    %98 = vector.shape_cast %97 : vector<1xf32> to vector<1x1x1xf32>
    %99 = vector.extract %98[0, 0, 0] : f32 from vector<1x1x1xf32>
    %cst_61 = arith.constant 1.600000e+02 : f32
    %100 = arith.divf %99, %cst_61 : f32
    %101 = vector.broadcast %100 : f32 to vector<5x32xf32>
    %102 = arith.subf %95, %101 : vector<5x32xf32>
    %103 = arith.mulf %102, %102 : vector<5x32xf32>
    %104 = vector.shape_cast %103 : vector<5x32xf32> to vector<1x5x32xf32>
    %cst_62 = arith.constant dense<0.000000e+00> : vector<1xf32>
    %105 = vector.multi_reduction <add>, %104, %cst_62 [1, 2] : vector<1x5x32xf32> to vector<1xf32>
    %106 = vector.shape_cast %105 : vector<1xf32> to vector<1x1x1xf32>
    %107 = vector.extract %106[0, 0, 0] : f32 from vector<1x1x1xf32>
    %cst_63 = arith.constant 1.600000e+02 : f32
    %108 = arith.divf %107, %cst_63 : f32
    %109 = vector.broadcast %100 : f32 to vector<5x32xf32>
    %110 = arith.subf %95, %109 : vector<5x32xf32>
    %cst_64 = arith.constant 9.99999974E-6 : f32
    %111 = arith.addf %108, %cst_64 : f32
    %112 = math.rsqrt %111 : f32
    %113 = vector.broadcast %112 : f32 to vector<5x32xf32>
    %114 = arith.mulf %110, %113 : vector<5x32xf32>
    %c0_65 = arith.constant 0 : index
    %c0_66 = arith.constant 0 : index
    %115 = vector.load %arg22[%c0_65, %c0_66] : memref<5x32xf32, #tpu.memory_space<vmem>>, vector<5x32xf32>
    %116 = arith.mulf %114, %115 : vector<5x32xf32>
    %c0_67 = arith.constant 0 : index
    %c0_68 = arith.constant 0 : index
    %117 = vector.load %arg23[%c0_67, %c0_68] : memref<5x32xf32, #tpu.memory_space<vmem>>, vector<5x32xf32>
    %118 = arith.addf %116, %117 : vector<5x32xf32>
    %119 = vector.extract_strided_slice %118 {offsets = [0, 0], sizes = [4, 32], strides = [1, 1]} : vector<5x32xf32> to vector<4x32xf32>
    %120 = vector.extract_strided_slice %118 {offsets = [4, 0], sizes = [1, 32], strides = [1, 1]} : vector<5x32xf32> to vector<1x32xf32>
    %cst_69 = arith.constant 1.000000e+00 : f32
    %121 = vector.broadcast %cst_69 : f32 to vector<1x32xf32>
    %122 = arith.mulf %121, %120 : vector<1x32xf32>
    %123 = vector.broadcast %122 : vector<1x32xf32> to vector<4x32xf32>
    %124 = arith.addf %119, %123 : vector<4x32xf32>
    %c0_70 = arith.constant 0 : index
    %c0_71 = arith.constant 0 : index
    %125 = vector.load %arg24[%c0_70, %c0_71] : memref<32x96xf32, #tpu.memory_space<vmem>>, vector<32x96xf32>
    %cst_72 = arith.constant dense<0.000000e+00> : vector<4x96xf32>
    %126 = tpu.matmul %124, %125, %cst_72 {dimension_numbers = #tpu.dot_dimension_numbers<[1], [0], [0], [1], [0, 0, 1, 1], [], []>} : vector<4x32xf32>, vector<32x96xf32>, vector<4x96xf32> -> vector<4x96xf32>
    %c0_73 = arith.constant 0 : index
    %c0_74 = arith.constant 0 : index
    %127 = vector.load %arg25[%c0_73, %c0_74] : memref<1x96xf32, #tpu.memory_space<vmem>>, vector<1x96xf32>
    %128 = vector.broadcast %127 : vector<1x96xf32> to vector<4x96xf32>
    %129 = arith.addf %126, %128 : vector<4x96xf32>
    %130 = vector.extract_strided_slice %129 {offsets = [0, 0], sizes = [4, 8], strides = [1, 1]} : vector<4x96xf32> to vector<4x8xf32>
    %131 = vector.extract_strided_slice %129 {offsets = [0, 8], sizes = [4, 8], strides = [1, 1]} : vector<4x96xf32> to vector<4x8xf32>
    %132 = vector.extract_strided_slice %129 {offsets = [0, 16], sizes = [4, 8], strides = [1, 1]} : vector<4x96xf32> to vector<4x8xf32>
    %133 = vector.extract_strided_slice %129 {offsets = [0, 24], sizes = [4, 8], strides = [1, 1]} : vector<4x96xf32> to vector<4x8xf32>
    %134 = vector.shape_cast %130 : vector<4x8xf32> to vector<1x4x8xf32>
    %135 = vector.shape_cast %131 : vector<4x8xf32> to vector<1x4x8xf32>
    %136 = vector.shape_cast %132 : vector<4x8xf32> to vector<1x4x8xf32>
    %137 = vector.shape_cast %133 : vector<4x8xf32> to vector<1x4x8xf32>
    %138 = tpu.concatenate %134, %135, %136, %137 in 0 : vector<1x4x8xf32>, vector<1x4x8xf32>, vector<1x4x8xf32>, vector<1x4x8xf32> -> vector<4x4x8xf32>
    %139 = vector.extract_strided_slice %129 {offsets = [0, 32], sizes = [4, 8], strides = [1, 1]} : vector<4x96xf32> to vector<4x8xf32>
    %140 = vector.extract_strided_slice %129 {offsets = [0, 40], sizes = [4, 8], strides = [1, 1]} : vector<4x96xf32> to vector<4x8xf32>
    %141 = vector.extract_strided_slice %129 {offsets = [0, 48], sizes = [4, 8], strides = [1, 1]} : vector<4x96xf32> to vector<4x8xf32>
    %142 = vector.extract_strided_slice %129 {offsets = [0, 56], sizes = [4, 8], strides = [1, 1]} : vector<4x96xf32> to vector<4x8xf32>
    %143 = vector.shape_cast %139 : vector<4x8xf32> to vector<1x4x8xf32>
    %144 = vector.shape_cast %140 : vector<4x8xf32> to vector<1x4x8xf32>
    %145 = vector.shape_cast %141 : vector<4x8xf32> to vector<1x4x8xf32>
    %146 = vector.shape_cast %142 : vector<4x8xf32> to vector<1x4x8xf32>
    %147 = tpu.concatenate %143, %144, %145, %146 in 0 : vector<1x4x8xf32>, vector<1x4x8xf32>, vector<1x4x8xf32>, vector<1x4x8xf32> -> vector<4x4x8xf32>
    %148 = vector.extract_strided_slice %129 {offsets = [0, 64], sizes = [4, 8], strides = [1, 1]} : vector<4x96xf32> to vector<4x8xf32>
    %149 = vector.extract_strided_slice %129 {offsets = [0, 72], sizes = [4, 8], strides = [1, 1]} : vector<4x96xf32> to vector<4x8xf32>
    %150 = vector.extract_strided_slice %129 {offsets = [0, 80], sizes = [4, 8], strides = [1, 1]} : vector<4x96xf32> to vector<4x8xf32>
    %151 = vector.extract_strided_slice %129 {offsets = [0, 88], sizes = [4, 8], strides = [1, 1]} : vector<4x96xf32> to vector<4x8xf32>
    %152 = vector.shape_cast %148 : vector<4x8xf32> to vector<1x4x8xf32>
    %153 = vector.shape_cast %149 : vector<4x8xf32> to vector<1x4x8xf32>
    %154 = vector.shape_cast %150 : vector<4x8xf32> to vector<1x4x8xf32>
    %155 = vector.shape_cast %151 : vector<4x8xf32> to vector<1x4x8xf32>
    %156 = tpu.concatenate %152, %153, %154, %155 in 0 : vector<1x4x8xf32>, vector<1x4x8xf32>, vector<1x4x8xf32>, vector<1x4x8xf32> -> vector<4x4x8xf32>
    "tpu.trace_start"() <{level = 10 : i32, message = "nqd,nkd->nqk"}> : () -> ()
    %cst_75 = arith.constant dense<0.000000e+00> : vector<4x4x4xf32>
    %157 = tpu.matmul %138, %147, %cst_75 {dimension_numbers = #tpu.dot_dimension_numbers<[2], [2], [1], [1], [0, 0, 0, 1, 1, 1], [0], [0]>} : vector<4x4x8xf32>, vector<4x4x8xf32>, vector<4x4x4xf32> -> vector<4x4x4xf32>
    "tpu.trace_stop"() : () -> ()
    %cst_76 = arith.constant 0.353553385 : f32
    %158 = vector.broadcast %cst_76 : f32 to vector<4x4x4xf32>
    %159 = arith.mulf %157, %158 : vector<4x4x4xf32>
    %c0_77 = arith.constant 0 : index
    %c0_78 = arith.constant 0 : index
    %c0_79 = arith.constant 0 : index
    %160 = vector.load %arg3[%c0_77, %c0_78, %c0_79] : memref<1x1x4xf32, #tpu.memory_space<vmem>>, vector<1x1x4xf32>
    %161 = vector.shape_cast %160 : vector<1x1x4xf32> to vector<1x4xf32>
    %cst_80 = arith.constant 5.000000e-01 : f32
    %162 = vector.broadcast %cst_80 : f32 to vector<1x4xf32>
    %163 = arith.cmpf ogt, %161, %162 : vector<1x4xf32>
    %164 = vector.shape_cast %163 : vector<1x4xi1> to vector<1x1x4xi1>
    %cst_81 = arith.constant -1.000000e+09 : f32
    %165 = vector.shape_cast %164 : vector<1x1x4xi1> to vector<1x1x4xi1>
    %166 = vector.broadcast %165 : vector<1x1x4xi1> to vector<4x4x4xi1>
    %167 = vector.broadcast %cst_81 : f32 to vector<4x4x4xf32>
    %168 = arith.select %166, %167, %159 : vector<4x4x4xi1>, vector<4x4x4xf32>
    %cst_82 = arith.constant dense<0xFF800000> : vector<4x4xf32>
    %169 = vector.multi_reduction <maximumf>, %168, %cst_82 [2] : vector<4x4x4xf32> to vector<4x4xf32>
    %170 = vector.shape_cast %169 : vector<4x4xf32> to vector<4x4x1xf32>
    %171 = vector.broadcast %170 : vector<4x4x1xf32> to vector<4x4x4xf32>
    %172 = arith.subf %168, %171 : vector<4x4x4xf32>
    %173 = math.exp %172 : vector<4x4x4xf32>
    %cst_83 = arith.constant dense<0.000000e+00> : vector<4x4xf32>
    %174 = vector.multi_reduction <add>, %173, %cst_83 [2] : vector<4x4x4xf32> to vector<4x4xf32>
    %175 = vector.shape_cast %174 : vector<4x4xf32> to vector<4x4x1xf32>
    %176 = tpu.reciprocal %175 {approx = true} : vector<4x4x1xf32> -> vector<4x4x1xf32>
    %177 = vector.broadcast %176 : vector<4x4x1xf32> to vector<4x4x4xf32>
    %178 = arith.mulf %173, %177 : vector<4x4x4xf32>
    "tpu.trace_start"() <{level = 10 : i32, message = "nqk,nkd->nqd"}> : () -> ()
    %cst_84 = arith.constant dense<0.000000e+00> : vector<4x4x8xf32>
    %179 = tpu.matmul %178, %156, %cst_84 {dimension_numbers = #tpu.dot_dimension_numbers<[2], [1], [1], [2], [0, 0, 0, 1, 1, 2], [0], [0]>} : vector<4x4x4xf32>, vector<4x4x8xf32>, vector<4x4x8xf32> -> vector<4x4x8xf32>
    "tpu.trace_stop"() : () -> ()
    %180 = vector.extract_strided_slice %179 {offsets = [0, 0, 0], sizes = [1, 4, 8], strides = [1, 1, 1]} : vector<4x4x8xf32> to vector<1x4x8xf32>
    %181 = vector.shape_cast %180 : vector<1x4x8xf32> to vector<4x8xf32>
    %182 = vector.extract_strided_slice %179 {offsets = [1, 0, 0], sizes = [1, 4, 8], strides = [1, 1, 1]} : vector<4x4x8xf32> to vector<1x4x8xf32>
    %183 = vector.shape_cast %182 : vector<1x4x8xf32> to vector<4x8xf32>
    %184 = vector.extract_strided_slice %179 {offsets = [2, 0, 0], sizes = [1, 4, 8], strides = [1, 1, 1]} : vector<4x4x8xf32> to vector<1x4x8xf32>
    %185 = vector.shape_cast %184 : vector<1x4x8xf32> to vector<4x8xf32>
    %186 = vector.extract_strided_slice %179 {offsets = [3, 0, 0], sizes = [1, 4, 8], strides = [1, 1, 1]} : vector<4x4x8xf32> to vector<1x4x8xf32>
    %187 = vector.shape_cast %186 : vector<1x4x8xf32> to vector<4x8xf32>
    %188 = tpu.concatenate %181, %183, %185, %187 in 1 : vector<4x8xf32>, vector<4x8xf32>, vector<4x8xf32>, vector<4x8xf32> -> vector<4x32xf32>
    %c0_85 = arith.constant 0 : index
    %c0_86 = arith.constant 0 : index
    %189 = vector.load %arg26[%c0_85, %c0_86] : memref<32x32xf32, #tpu.memory_space<vmem>>, vector<32x32xf32>
    %cst_87 = arith.constant dense<0.000000e+00> : vector<4x32xf32>
    %190 = tpu.matmul %188, %189, %cst_87 {dimension_numbers = #tpu.dot_dimension_numbers<[1], [0], [0], [1], [0, 0, 1, 1], [], []>} : vector<4x32xf32>, vector<32x32xf32>, vector<4x32xf32> -> vector<4x32xf32>
    %c0_88 = arith.constant 0 : index
    %c0_89 = arith.constant 0 : index
    %191 = vector.load %arg27[%c0_88, %c0_89] : memref<1x32xf32, #tpu.memory_space<vmem>>, vector<1x32xf32>
    %192 = vector.broadcast %191 : vector<1x32xf32> to vector<4x32xf32>
    %193 = arith.addf %190, %192 : vector<4x32xf32>
    %194 = arith.addf %124, %193 : vector<4x32xf32>
    %c0_90 = arith.constant 0 : index
    %c0_91 = arith.constant 0 : index
    %195 = vector.load %arg28[%c0_90, %c0_91] : memref<1x32xf32, #tpu.memory_space<vmem>>, vector<1x32xf32>
    %c0_92 = arith.constant 0 : index
    %c0_93 = arith.constant 0 : index
    %196 = vector.load %arg29[%c0_92, %c0_93] : memref<1x32xf32, #tpu.memory_space<vmem>>, vector<1x32xf32>
    %cst_94 = arith.constant dense<0.000000e+00> : vector<4xf32>
    %197 = vector.multi_reduction <add>, %194, %cst_94 [1] : vector<4x32xf32> to vector<4xf32>
    %198 = vector.shape_cast %197 : vector<4xf32> to vector<4x1xf32>
    %cst_95 = arith.constant 3.200000e+01 : f32
    %199 = vector.broadcast %cst_95 : f32 to vector<4x1xf32>
    %200 = arith.divf %198, %199 : vector<4x1xf32>
    %201 = vector.broadcast %200 : vector<4x1xf32> to vector<4x32xf32>
    %202 = arith.subf %194, %201 : vector<4x32xf32>
    %203 = arith.mulf %202, %202 : vector<4x32xf32>
    %cst_96 = arith.constant dense<0.000000e+00> : vector<4xf32>
    %204 = vector.multi_reduction <add>, %203, %cst_96 [1] : vector<4x32xf32> to vector<4xf32>
    %205 = vector.shape_cast %204 : vector<4xf32> to vector<4x1xf32>
    %cst_97 = arith.constant 3.200000e+01 : f32
    %206 = vector.broadcast %cst_97 : f32 to vector<4x1xf32>
    %207 = arith.divf %205, %206 : vector<4x1xf32>
    %208 = vector.broadcast %200 : vector<4x1xf32> to vector<4x32xf32>
    %209 = arith.subf %194, %208 : vector<4x32xf32>
    %cst_98 = arith.constant 9.99999974E-6 : f32
    %210 = vector.broadcast %cst_98 : f32 to vector<4x1xf32>
    %211 = arith.addf %207, %210 : vector<4x1xf32>
    %212 = math.rsqrt %211 : vector<4x1xf32>
    %213 = vector.broadcast %212 : vector<4x1xf32> to vector<4x32xf32>
    %214 = arith.mulf %209, %213 : vector<4x32xf32>
    %215 = vector.broadcast %195 : vector<1x32xf32> to vector<4x32xf32>
    %216 = arith.mulf %214, %215 : vector<4x32xf32>
    %217 = vector.broadcast %196 : vector<1x32xf32> to vector<4x32xf32>
    %218 = arith.addf %216, %217 : vector<4x32xf32>
    %c0_99 = arith.constant 0 : index
    %c0_100 = arith.constant 0 : index
    %219 = vector.load %arg30[%c0_99, %c0_100] : memref<32x128xf32, #tpu.memory_space<vmem>>, vector<32x128xf32>
    %cst_101 = arith.constant dense<0.000000e+00> : vector<4x128xf32>
    %220 = tpu.matmul %218, %219, %cst_101 {dimension_numbers = #tpu.dot_dimension_numbers<[1], [0], [0], [1], [0, 0, 1, 1], [], []>} : vector<4x32xf32>, vector<32x128xf32>, vector<4x128xf32> -> vector<4x128xf32>
    %c0_102 = arith.constant 0 : index
    %c0_103 = arith.constant 0 : index
    %221 = vector.load %arg31[%c0_102, %c0_103] : memref<1x128xf32, #tpu.memory_space<vmem>>, vector<1x128xf32>
    %222 = vector.broadcast %221 : vector<1x128xf32> to vector<4x128xf32>
    %223 = arith.addf %220, %222 : vector<4x128xf32>
    %cst_104 = arith.constant 0.000000e+00 : f32
    %224 = vector.broadcast %cst_104 : f32 to vector<4x128xf32>
    %225 = arith.maximumf %223, %224 : vector<4x128xf32>
    %c0_105 = arith.constant 0 : index
    %c0_106 = arith.constant 0 : index
    %226 = vector.load %arg32[%c0_105, %c0_106] : memref<128x32xf32, #tpu.memory_space<vmem>>, vector<128x32xf32>
    %cst_107 = arith.constant dense<0.000000e+00> : vector<4x32xf32>
    %227 = tpu.matmul %225, %226, %cst_107 {dimension_numbers = #tpu.dot_dimension_numbers<[1], [0], [0], [1], [0, 0, 1, 1], [], []>} : vector<4x128xf32>, vector<128x32xf32>, vector<4x32xf32> -> vector<4x32xf32>
    %c0_108 = arith.constant 0 : index
    %c0_109 = arith.constant 0 : index
    %228 = vector.load %arg33[%c0_108, %c0_109] : memref<1x32xf32, #tpu.memory_space<vmem>>, vector<1x32xf32>
    %229 = vector.broadcast %228 : vector<1x32xf32> to vector<4x32xf32>
    %230 = arith.addf %227, %229 : vector<4x32xf32>
    %231 = arith.addf %218, %230 : vector<4x32xf32>
    %c0_110 = arith.constant 0 : index
    %c0_111 = arith.constant 0 : index
    %232 = vector.load %arg34[%c0_110, %c0_111] : memref<1x32xf32, #tpu.memory_space<vmem>>, vector<1x32xf32>
    %c0_112 = arith.constant 0 : index
    %c0_113 = arith.constant 0 : index
    %233 = vector.load %arg35[%c0_112, %c0_113] : memref<1x32xf32, #tpu.memory_space<vmem>>, vector<1x32xf32>
    %cst_114 = arith.constant dense<0.000000e+00> : vector<4xf32>
    %234 = vector.multi_reduction <add>, %231, %cst_114 [1] : vector<4x32xf32> to vector<4xf32>
    %235 = vector.shape_cast %234 : vector<4xf32> to vector<4x1xf32>
    %cst_115 = arith.constant 3.200000e+01 : f32
    %236 = vector.broadcast %cst_115 : f32 to vector<4x1xf32>
    %237 = arith.divf %235, %236 : vector<4x1xf32>
    %238 = vector.broadcast %237 : vector<4x1xf32> to vector<4x32xf32>
    %239 = arith.subf %231, %238 : vector<4x32xf32>
    %240 = arith.mulf %239, %239 : vector<4x32xf32>
    %cst_116 = arith.constant dense<0.000000e+00> : vector<4xf32>
    %241 = vector.multi_reduction <add>, %240, %cst_116 [1] : vector<4x32xf32> to vector<4xf32>
    %242 = vector.shape_cast %241 : vector<4xf32> to vector<4x1xf32>
    %cst_117 = arith.constant 3.200000e+01 : f32
    %243 = vector.broadcast %cst_117 : f32 to vector<4x1xf32>
    %244 = arith.divf %242, %243 : vector<4x1xf32>
    %245 = vector.broadcast %237 : vector<4x1xf32> to vector<4x32xf32>
    %246 = arith.subf %231, %245 : vector<4x32xf32>
    %cst_118 = arith.constant 9.99999974E-6 : f32
    %247 = vector.broadcast %cst_118 : f32 to vector<4x1xf32>
    %248 = arith.addf %244, %247 : vector<4x1xf32>
    %249 = math.rsqrt %248 : vector<4x1xf32>
    %250 = vector.broadcast %249 : vector<4x1xf32> to vector<4x32xf32>
    %251 = arith.mulf %246, %250 : vector<4x32xf32>
    %252 = vector.broadcast %232 : vector<1x32xf32> to vector<4x32xf32>
    %253 = arith.mulf %251, %252 : vector<4x32xf32>
    %254 = vector.broadcast %233 : vector<1x32xf32> to vector<4x32xf32>
    %255 = arith.addf %253, %254 : vector<4x32xf32>
    %256 = math.tanh %255 : vector<4x32xf32>
    %c0_119 = arith.constant 0 : index
    %c0_120 = arith.constant 0 : index
    %257 = vector.load %arg36[%c0_119, %c0_120] : memref<1x32xf32, #tpu.memory_space<vmem>>, vector<1x32xf32>
    %cst_121 = arith.constant dense<0.000000e+00> : vector<1x4xf32>
    %258 = tpu.matmul %257, %256, %cst_121 {dimension_numbers = #tpu.dot_dimension_numbers<[1], [1], [0], [0], [0, 0, 1, 0], [], []>} : vector<1x32xf32>, vector<4x32xf32>, vector<1x4xf32> -> vector<1x4xf32>
    %c0_122 = arith.constant 0 : index
    %c0_123 = arith.constant 0 : index
    %259 = vector.load %arg37[%c0_122, %c0_123] : memref<1x1xf32, #tpu.memory_space<vmem>>, vector<1x1xf32>
    %260 = vector.broadcast %259 : vector<1x1xf32> to vector<1x4xf32>
    %261 = arith.addf %258, %260 : vector<1x4xf32>
    %c0_124 = arith.constant 0 : index
    %c0_125 = arith.constant 0 : index
    %c0_126 = arith.constant 0 : index
    %262 = vector.load %arg38[%c0_124, %c0_125, %c0_126] : memref<1x1x4xf32, #tpu.memory_space<vmem>>, vector<1x1x4xf32>
    %263 = vector.shape_cast %262 : vector<1x1x4xf32> to vector<1x4xf32>
    %264 = vector.shape_cast %261 : vector<1x4xf32> to vector<1x1x4xf32>
    tpu.vector_store %arg38[%c0_124, %c0_125, %c0_126], %264 {strides = array<i32>} : memref<1x1x4xf32, #tpu.memory_space<vmem>>, vector<1x1x4xf32>,
    return
  }
  func.func @transform_0(%arg0: i32) -> (i32, i32, i32) {
    %c0_i32 = arith.constant 0 : i32
    %c0_i32_0 = arith.constant 0 : i32
    %c0_i32_1 = arith.constant 0 : i32
    return %arg0, %c0_i32, %c0_i32_0 : i32, i32, i32
  }
  func.func @transform_1(%arg0: i32) -> (i32, i32, i32) {
    %c0_i32 = arith.constant 0 : i32
    %c0_i32_0 = arith.constant 0 : i32
    %c0_i32_1 = arith.constant 0 : i32
    return %arg0, %c0_i32, %c0_i32_0 : i32, i32, i32
  }
  func.func @transform_2(%arg0: i32) -> (i32, i32, i32) {
    %c0_i32 = arith.constant 0 : i32
    %c0_i32_0 = arith.constant 0 : i32
    %c0_i32_1 = arith.constant 0 : i32
    return %arg0, %c0_i32, %c0_i32_0 : i32, i32, i32
  }
  func.func @transform_3(%arg0: i32) -> (i32, i32) {
    %c0_i32 = arith.constant 0 : i32
    %c0_i32_0 = arith.constant 0 : i32
    %c0_i32_1 = arith.constant 0 : i32
    return %c0_i32, %c0_i32_0 : i32, i32
  }
  func.func @transform_4(%arg0: i32) -> (i32, i32) {
    %c0_i32 = arith.constant 0 : i32
    %c0_i32_0 = arith.constant 0 : i32
    %c0_i32_1 = arith.constant 0 : i32
    return %c0_i32, %c0_i32_0 : i32, i32
  }
  func.func @transform_5(%arg0: i32) -> (i32, i32) {
    %c0_i32 = arith.constant 0 : i32
    %c0_i32_0 = arith.constant 0 : i32
    %c0_i32_1 = arith.constant 0 : i32
    return %c0_i32, %c0_i32_0 : i32, i32
  }
  func.func @transform_6(%arg0: i32) -> (i32, i32) {
    %c0_i32 = arith.constant 0 : i32
    %c0_i32_0 = arith.constant 0 : i32
    %c0_i32_1 = arith.constant 0 : i32
    return %c0_i32, %c0_i32_0 : i32, i32
  }
  func.func @transform_7(%arg0: i32) -> (i32, i32) {
    %c0_i32 = arith.constant 0 : i32
    %c0_i32_0 = arith.constant 0 : i32
    %c0_i32_1 = arith.constant 0 : i32
    return %c0_i32, %c0_i32_0 : i32, i32
  }
  func.func @transform_8(%arg0: i32) -> (i32, i32) {
    %c0_i32 = arith.constant 0 : i32
    %c0_i32_0 = arith.constant 0 : i32
    %c0_i32_1 = arith.constant 0 : i32
    return %c0_i32, %c0_i32_0 : i32, i32
  }
  func.func @transform_9(%arg0: i32) -> (i32, i32) {
    %c0_i32 = arith.constant 0 : i32
    %c0_i32_0 = arith.constant 0 : i32
    %c0_i32_1 = arith.constant 0 : i32
    return %c0_i32, %c0_i32_0 : i32, i32
  }
  func.func @transform_10(%arg0: i32) -> (i32, i32) {
    %c0_i32 = arith.constant 0 : i32
    %c0_i32_0 = arith.constant 0 : i32
    %c0_i32_1 = arith.constant 0 : i32
    return %c0_i32, %c0_i32_0 : i32, i32
  }
  func.func @transform_11(%arg0: i32) -> (i32, i32) {
    %c0_i32 = arith.constant 0 : i32
    %c0_i32_0 = arith.constant 0 : i32
    %c0_i32_1 = arith.constant 0 : i32
    return %c0_i32, %c0_i32_0 : i32, i32
  }
  func.func @transform_12(%arg0: i32) -> (i32, i32) {
    %c0_i32 = arith.constant 0 : i32
    %c0_i32_0 = arith.constant 0 : i32
    %c0_i32_1 = arith.constant 0 : i32
    return %c0_i32, %c0_i32_0 : i32, i32
  }
  func.func @transform_13(%arg0: i32) -> (i32, i32) {
    %c0_i32 = arith.constant 0 : i32
    %c0_i32_0 = arith.constant 0 : i32
    %c0_i32_1 = arith.constant 0 : i32
    return %c0_i32, %c0_i32_0 : i32, i32
  }
  func.func @transform_14(%arg0: i32) -> (i32, i32) {
    %c0_i32 = arith.constant 0 : i32
    %c0_i32_0 = arith.constant 0 : i32
    %c0_i32_1 = arith.constant 0 : i32
    return %c0_i32, %c0_i32_0 : i32, i32
  }
  func.func @transform_15(%arg0: i32) -> (i32, i32) {
    %c0_i32 = arith.constant 0 : i32
    %c0_i32_0 = arith.constant 0 : i32
    %c0_i32_1 = arith.constant 0 : i32
    return %c0_i32, %c0_i32_0 : i32, i32
  }
  func.func @transform_16(%arg0: i32) -> (i32, i32) {
    %c0_i32 = arith.constant 0 : i32
    %c0_i32_0 = arith.constant 0 : i32
    %c0_i32_1 = arith.constant 0 : i32
    return %c0_i32, %c0_i32_0 : i32, i32
  }
  func.func @transform_17(%arg0: i32) -> (i32, i32) {
    %c0_i32 = arith.constant 0 : i32
    %c0_i32_0 = arith.constant 0 : i32
    %c0_i32_1 = arith.constant 0 : i32
    return %c0_i32, %c0_i32_0 : i32, i32
  }
  func.func @transform_18(%arg0: i32) -> (i32, i32) {
    %c0_i32 = arith.constant 0 : i32
    %c0_i32_0 = arith.constant 0 : i32
    %c0_i32_1 = arith.constant 0 : i32
    return %c0_i32, %c0_i32_0 : i32, i32
  }
  func.func @transform_19(%arg0: i32) -> (i32, i32) {
    %c0_i32 = arith.constant 0 : i32
    %c0_i32_0 = arith.constant 0 : i32
    %c0_i32_1 = arith.constant 0 : i32
    return %c0_i32, %c0_i32_0 : i32, i32
  }
  func.func @transform_20(%arg0: i32) -> (i32, i32) {
    %c0_i32 = arith.constant 0 : i32
    %c0_i32_0 = arith.constant 0 : i32
    %c0_i32_1 = arith.constant 0 : i32
    return %c0_i32, %c0_i32_0 : i32, i32
  }
  func.func @transform_21(%arg0: i32) -> (i32, i32) {
    %c0_i32 = arith.constant 0 : i32
    %c0_i32_0 = arith.constant 0 : i32
    %c0_i32_1 = arith.constant 0 : i32
    return %c0_i32, %c0_i32_0 : i32, i32
  }
  func.func @transform_22(%arg0: i32) -> (i32, i32) {
    %c0_i32 = arith.constant 0 : i32
    %c0_i32_0 = arith.constant 0 : i32
    %c0_i32_1 = arith.constant 0 : i32
    return %c0_i32, %c0_i32_0 : i32, i32
  }
  func.func @transform_23(%arg0: i32) -> (i32, i32) {
    %c0_i32 = arith.constant 0 : i32
    %c0_i32_0 = arith.constant 0 : i32
    %c0_i32_1 = arith.constant 0 : i32
    return %c0_i32, %c0_i32_0 : i32, i32
  }
  func.func @transform_24(%arg0: i32) -> (i32, i32) {
    %c0_i32 = arith.constant 0 : i32
    %c0_i32_0 = arith.constant 0 : i32
    %c0_i32_1 = arith.constant 0 : i32
    return %c0_i32, %c0_i32_0 : i32, i32
  }
  func.func @transform_25(%arg0: i32) -> (i32, i32) {
    %c0_i32 = arith.constant 0 : i32
    %c0_i32_0 = arith.constant 0 : i32
    %c0_i32_1 = arith.constant 0 : i32
    return %c0_i32, %c0_i32_0 : i32, i32
  }
  func.func @transform_26(%arg0: i32) -> (i32, i32) {
    %c0_i32 = arith.constant 0 : i32
    %c0_i32_0 = arith.constant 0 : i32
    %c0_i32_1 = arith.constant 0 : i32
    return %c0_i32, %c0_i32_0 : i32, i32
  }
  func.func @transform_27(%arg0: i32) -> (i32, i32) {
    %c0_i32 = arith.constant 0 : i32
    %c0_i32_0 = arith.constant 0 : i32
    %c0_i32_1 = arith.constant 0 : i32
    return %c0_i32, %c0_i32_0 : i32, i32
  }
  func.func @transform_28(%arg0: i32) -> (i32, i32) {
    %c0_i32 = arith.constant 0 : i32
    %c0_i32_0 = arith.constant 0 : i32
    %c0_i32_1 = arith.constant 0 : i32
    return %c0_i32, %c0_i32_0 : i32, i32
  }
  func.func @transform_29(%arg0: i32) -> (i32, i32) {
    %c0_i32 = arith.constant 0 : i32
    %c0_i32_0 = arith.constant 0 : i32
    %c0_i32_1 = arith.constant 0 : i32
    return %c0_i32, %c0_i32_0 : i32, i32
  }
  func.func @transform_30(%arg0: i32) -> (i32, i32) {
    %c0_i32 = arith.constant 0 : i32
    %c0_i32_0 = arith.constant 0 : i32
    %c0_i32_1 = arith.constant 0 : i32
    return %c0_i32, %c0_i32_0 : i32, i32
  }
  func.func @transform_31(%arg0: i32) -> (i32, i32) {
    %c0_i32 = arith.constant 0 : i32
    %c0_i32_0 = arith.constant 0 : i32
    %c0_i32_1 = arith.constant 0 : i32
    return %c0_i32, %c0_i32_0 : i32, i32
  }
  func.func @transform_32(%arg0: i32) -> (i32, i32) {
    %c0_i32 = arith.constant 0 : i32
    %c0_i32_0 = arith.constant 0 : i32
    %c0_i32_1 = arith.constant 0 : i32
    return %c0_i32, %c0_i32_0 : i32, i32
  }
  func.func @transform_33(%arg0: i32) -> (i32, i32) {
    %c0_i32 = arith.constant 0 : i32
    %c0_i32_0 = arith.constant 0 : i32
    %c0_i32_1 = arith.constant 0 : i32
    return %c0_i32, %c0_i32_0 : i32, i32
  }
  func.func @transform_34(%arg0: i32) -> (i32, i32) {
    %c0_i32 = arith.constant 0 : i32
    %c0_i32_0 = arith.constant 0 : i32
    %c0_i32_1 = arith.constant 0 : i32
    return %c0_i32, %c0_i32_0 : i32, i32
  }
  func.func @transform_35(%arg0: i32) -> (i32, i32) {
    %c0_i32 = arith.constant 0 : i32
    %c0_i32_0 = arith.constant 0 : i32
    %c0_i32_1 = arith.constant 0 : i32
    return %c0_i32, %c0_i32_0 : i32, i32
  }
  func.func @transform_36(%arg0: i32) -> (i32, i32) {
    %c0_i32 = arith.constant 0 : i32
    %c0_i32_0 = arith.constant 0 : i32
    %c0_i32_1 = arith.constant 0 : i32
    return %c0_i32, %c0_i32_0 : i32, i32
  }
  func.func @transform_37(%arg0: i32) -> (i32, i32, i32) {
    %c0_i32 = arith.constant 0 : i32
    %c0_i32_0 = arith.constant 0 : i32
    %c0_i32_1 = arith.constant 0 : i32
    return %arg0, %c0_i32, %c0_i32_0 : i32, i32, i32
  }
}

</mosaic_0001>

<bundles_post_ra>
// kernel: tpu_custom_call.1
= control target key start
LH: loop header
LB: loop body
LE: loop exit
PB: predicated region body
PF: predicated region fallthrough
CT: control target
= control target key end

     0   :  { %s5616_s6 = smov 1   ;;  %s5617_s10 = smov 2   ;;  %s6978_s0 = inlined_call_operand.smem [shape: u32[38], index: -1, kind: input, shape index: {}] }
   0x1   :  { %s5678_s5 = sld [smem:[%s6978_s0]]   ;;  %s5618_s14 = smov 3  }
   0x2   :  { %s5683_s9 = sld [smem:[%s6978_s0 + %s5616_s6]]   ;;  %s5619_s18 = smov 4  }
   0x3   :  { %s5688_s13 = sld [smem:[%s6978_s0 + %s5617_s10]]   ;;  %s5620_s22 = smov 5  }
   0x4   :  { %s5693_s17 = sld [smem:[%s6978_s0 + %s5618_s14]]   ;;  %s5621_s26 = smov 6  }
   0x5   :  { %s5698_s21 = sld [smem:[%s6978_s0 + %s5619_s18]]   ;;  %s5622_s30 = smov 7  }
   0x6   :  { %s5703_s25 = sld [smem:[%s6978_s0 + %s5620_s22]]   ;;  %s5623_s4 = smov 8  }
   0x7   :  { %7001 = sst [smem:[#allocation6_spill]] %s5678_s5  ;;  %s5624_s10 = smov 9  }
   0x8   :  { %7002 = sst [smem:[#allocation7_spill]] %s5683_s9  ;;  %s5625_s15 = smov 10  }
   0x9   :  { %7003 = sst [smem:[#allocation8_spill]] %s5688_s13  ;;  %s5626_s20 = smov 11  }
   0xa   :  { %s5708_s29 = sld [smem:[%s6978_s0 + %s5621_s26]]   ;;  %s5627_s26 = smov 12  }
   0xb   :  { %s5713_s3 = sld [smem:[%s6978_s0 + %s5622_s30]]   ;;  %s5628_s1 = smov 13  }
   0xc   :  { %s5718_s8 = sld [smem:[%s6978_s0 + %s5623_s4]]   ;;  %s5629_s7 = smov 14  }
   0xd   :  { %s5723_s14 = sld [smem:[%s6978_s0 + %s5624_s10]]   ;;  %s5631_s22 = smov 16  }
   0xe   :  { %s5728_s19 = sld [smem:[%s6978_s0 + %s5625_s15]]   ;;  %s5630_s15 = smov 15  }
   0xf   :  { %s5733_s24 = sld [smem:[%s6978_s0 + %s5626_s20]]   ;;  %s5632_s28 = smov 17  }
  0x10   :  { %s5738_s30 = sld [smem:[%s6978_s0 + %s5627_s26]]  }
  0x11   :  { %7004 = sst [smem:[#allocation9_spill]] %s5713_s3 }
  0x12   :  { %7005 = sst [smem:[#allocation10_spill]] %s5718_s8 }
  0x13   :  { %7006 = sst [smem:[#allocation11_spill]] %s5723_s14 }
  0x14   :  { %s5743_s6 = sld [smem:[%s6978_s0 + %s5628_s1]]   ;;  %s5652_s1 = smov 37  }
  0x15   :  { %s5748_s12 = sld [smem:[%s6978_s0 + %s5629_s7]]   ;;  %s5633_s7 = smov 18  }
  0x16   :  { %s5753_s20 = sld [smem:[%s6978_s0 + %s5630_s15]]   ;;  %s5634_s15 = smov 19  }
  0x17   :  { %s5758_s27 = sld [smem:[%s6978_s0 + %s5631_s22]]   ;;  %s5635_s22 = smov 20  }
  0x18   :  { %s5763_s4 = sld [smem:[%s6978_s0 + %s5632_s28]]   ;;  %s5636_s28 = smov 21  }
  0x19   :  { %s5768_s13 = sld [smem:[%s6978_s0 + %s5633_s7]]   ;;  %s5637_s7 = smov 22  }
  0x1a   :  { %7007 = sst [smem:[#allocation12_spill]] %s5743_s6 }
  0x1b   :  { %7008 = sst [smem:[#allocation13_spill]] %s5748_s12 }
  0x1c   :  { %s5773_s12 = sld [smem:[%s6978_s0 + %s5634_s15]]   ;;  %s5638_s15 = smov 23  }
  0x1d   :  { %7009 = sst [smem:[#allocation14_spill]] %s5758_s27 }
  0x1e   :  { %7010 = sst [smem:[#allocation15_spill]] %s5763_s4 }
  0x1f   :  { %7011 = sst [smem:[#allocation16_spill]] %s5768_s13 }
  0x20   :  { %s5778_s27 = sld [smem:[%s6978_s0 + %s5635_s22]]   ;;  %s5639_s22 = smov 24  }
  0x21   :  { %s5783_s4 = sld [smem:[%s6978_s0 + %s5636_s28]]   ;;  %s5640_s28 = smov 25  }
  0x22   :  { %7012 = sst [smem:[#allocation17_spill]] %s5773_s12 }
  0x23   :  { %s5788_s13 = sld [smem:[%s6978_s0 + %s5637_s7]]   ;;  %s5641_s7 = smov 26  }
  0x24   :  { %s5793_s12 = sld [smem:[%s6978_s0 + %s5638_s15]]   ;;  %s5642_s15 = smov 27  }
  0x26   :  { %7013 = sst [smem:[#allocation18_spill]] %s5778_s27 }
  0x27   :  { %7014 = sst [smem:[#allocation19_spill]] %s5783_s4 }
  0x28   :  { %s5798_s27 = sld [smem:[%s6978_s0 + %s5639_s22]]   ;;  %s5643_s22 = smov 28  }
  0x29   :  { %7015 = sst [smem:[#allocation20_spill]] %s5788_s13 }
  0x2a   :  { %7016 = sst [smem:[#allocation21_spill]] %s5793_s12 }
  0x2b   :  { %s5803_s4 = sld [smem:[%s6978_s0 + %s5640_s28]]   ;;  %s5644_s28 = smov 29  }
  0x2c   :  { %s5808_s13 = sld [smem:[%s6978_s0 + %s5641_s7]]   ;;  %s5645_s7 = smov 30  }
  0x2d   :  { %s5813_s12 = sld [smem:[%s6978_s0 + %s5642_s15]]   ;;  %s5646_s15 = smov 31  }
  0x2e   :  { %7017 = sst [smem:[#allocation22_spill]] %s5798_s27 }
  0x2f   :  { %s5818_s27 = sld [smem:[%s6978_s0 + %s5643_s22]]   ;;  %s5647_s22 = smov 32  }
  0x31   :  { %7018 = sst [smem:[#allocation23_spill]] %s5803_s4 }
  0x32   :  { %7019 = sst [smem:[#allocation24_spill]] %s5808_s13 }
  0x33   :  { %7020 = sst [smem:[#allocation25_spill]] %s5813_s12 }
  0x34   :  { %s5823_s4 = sld [smem:[%s6978_s0 + %s5644_s28]]   ;;  %s5648_s28 = smov 33  }
  0x35   :  { %7021 = sst [smem:[#allocation26_spill]] %s5818_s27 }
  0x36   :  { %s5828_s13 = sld [smem:[%s6978_s0 + %s5645_s7]]   ;;  %s5649_s7 = smov 34  }
  0x37   :  { %s5833_s12 = sld [smem:[%s6978_s0 + %s5646_s15]]   ;;  %s5650_s15 = smov 35  }
  0x38   :  { %s5838_s27 = sld [smem:[%s6978_s0 + %s5647_s22]]   ;;  %s5651_s22 = smov 36  }
  0x3a   :  { %7022 = sst [smem:[#allocation27_spill]] %s5823_s4 }
  0x3b   :  { %s5843_s4 = sld [smem:[%s6978_s0 + %s5648_s28]]  }
  0x3c   :  { %7023 = sst [smem:[#allocation28_spill]] %s5828_s13 }
  0x3d   :  { %7024 = sst [smem:[#allocation29_spill]] %s5833_s12 }
  0x3e   :  { %7025 = sst [smem:[#allocation30_spill]] %s5838_s27 }
  0x3f   :  { %s5848_s13 = sld [smem:[%s6978_s0 + %s5649_s7]]  }
  0x40   :  { %s5853_s12 = sld [smem:[%s6978_s0 + %s5650_s15]]  }
  0x41   :  { %7026 = sst [smem:[#allocation31_spill]] %s5843_s4 }
  0x42   :  { %s4478_s27 = sld [smem:[%s6978_s0 + %s5651_s22]]  }
  0x43   :  { %s5861_s4 = sld [smem:[%s6978_s0 + %s5652_s1]]  }
  0x46   :  { %7027 = sst [smem:[#allocation32_spill]] %s5853_s12 }
  0x48   :  { %v80_v0 = vstv %s4478_s27 }
  0x49   :  { %81 = vst [vmem:[#allocation2] sm:$0x1] %v80_v0 }
  0x4a   :  { %82 = vsyncpa [#allocation4], 0 }
  0x4b   :  { %84 = vsyncpa [#allocation4 + $0x1], 0  ;;  %s5863_s7 = smov 0   ;;  %s5865_s10 = smov 0  }
  0x4c   :  { %s5867_s11 = smov 0   ;;  %s5869_s15 = smov 0  }
  0x4d LB: > { %s7028_s14 = sld [smem:[#allocation11_spill]]  ;;  %s7029_s8 = sld [smem:[#allocation10_spill]]  ;;  %s5610_s11 = sphi %s5867_s11, %s7069_s11   ;;  %s5606_s10 = sphi %s5865_s10, %s7068_s10   ;;  %s5602_s7 = sphi %s5863_s7, %s7067_s7   ;;  %s5614_s15 = sphi %s5869_s15, %s7070_s15  }
  0x4e   : > { %s7030_s3 = sld [smem:[#allocation9_spill]]  ;;  %s5884_s0 = sadd.s32 4294967295, %s5614_s15  }
  0x4f   : > { %s4481_s27 = sadd.s32 4294967294, %s5614_s15   ;;  %s5888_s16 = sadd.s32 1, %s5614_s15  }
  0x50   : > { %s889_s18 = sadd.s32 1, %s5610_s11  ;;  %s886_s22 = ssub.s32 %s5614_s15, %s5888_s16 }
  0x51   : > { %p899_p0 = scmp.ne.s32.totalorder %s5610_s11, %s5606_s10  ;;  %p887_p1 = scmp.eq.s32.totalorder %s886_s22, 0 }
  0x52   : > { %p900_p2 = scmp.eq.s32.totalorder %s5884_s0, 1  ;;  %p905_p3 = scmp.ne.s32.totalorder %s5606_s10, %s5602_s7 }
  0x53   : > { %p906_p4 = scmp.eq.s32.totalorder %s4481_s27, 1  ;;  %p4484_p7 = scmp.ge.s32.totalorder %s5614_s15, 1 }
  0x54   : > { %s5899_s23 = scalar_select %p887_p1, %s5610_s11, %s889_s18  }
  0x55   : > { %p5901_p5 = por %p900_p2, %p899_p0  ;;  %p5905_p6 = por %p906_p4, %p905_p3 }
  0x56   : > { %p1048_p8 = scmp.lt.s32.totalorder %s5614_s15, 3 }
  0x58   : > { %p1049_p9 = pnand %p4484_p7, %p1048_p8 }
  0x59   : > { %s7033_s5 = sld [smem:[#allocation6_spill]] (!%p1049_p9)  ;;  %s7034_s9 = sld [smem:[#allocation7_spill]] (!%p1049_p9)  ;;  %v5653_v1 = vmov (!%p1049_p9), 0.0|0.0   ;;  %v1435_v2 = vld [vmem:[%s5693_s17] sm:$0xff] (!%p1049_p9)  ;;  %v1436_v3 = vld [vmem:[%s5693_s17 + $0x8] sm:$0xff] (!%p1049_p9)  ;;  %v1437_v12 = vld [vmem:[%s5693_s17 + $0x10] sm:$0xff] (!%p1049_p9) }
  0x5a   : > { %1052 = sbr.rel (%p1049_p9) target bundleno = 4600 (0x11f8), region = 168  ;;  %p1147_p10 = scmp.lt.s32.totalorder (!%p1049_p9), %s5884_s0, 1  ;;  %5173 = vmatprep.subr.bf16.mxu0 (!%p1049_p9), %v5653_v1  ;;  %5186 = vmatprep.subr.bf16.mxu1 (!%p1049_p9), %v5653_v1  ;;  %v1869_v4 = vld [vmem:[%s5703_s25] sm:$0xff] (!%p1049_p9)  ;;  %v5174_v5 = vpack.c.bf16 (!%p1049_p9), %v1436_v3, %v1435_v2  ;;  %v1870_v6 = vld [vmem:[%s5703_s25 + $0x8] sm:$0xff] (!%p1049_p9)  ;;  %v1438_v13 = vld [vmem:[%s5693_s17 + $0x18] sm:$0xff] (!%p1049_p9)  ;;  %vm1255_vm0 = vcmask (!%p1049_p9), 1045504  }
  0x5b   : > { %v5187_v10 = vpack.c.bf16 (!%p1049_p9), %v1870_v6, %v1869_v4  ;;  %v1871_v14 = vld [vmem:[%s5703_s25 + $0x10] sm:$0xff] (!%p1049_p9)  ;;  %v5177_v15 = vpack.c.bf16 (!%p1049_p9), %v1438_v13, %v1437_v12  ;;  %v1872_v16 = vld [vmem:[%s5703_s25 + $0x18] sm:$0xff] (!%p1049_p9)  ;;  %v1439_v17 = vld [vmem:[%s5693_s17 + $0x20] sm:$0xff] (!%p1049_p9)  ;;  %vm1210_vm1 = vcmask (!%p1049_p9), 1046528   ;;  %vm1348_vm2 = vcmask (!%p1049_p9), 1043456   ;;  %s6986_s22 = smov (!%p1049_p9), 24  }
  0x5c   : > { %5175 = vmatpush3.bf16.msra.mxu0 (!%p1049_p9), %v5174_v5  ;;  %v1440_v18 = vld [vmem:[%s5693_s17 + $0x28] sm:$0xff] (!%p1049_p9)  ;;  %v5190_v20 = vpack.c.bf16 (!%p1049_p9), %v1872_v16, %v1871_v14  ;;  %v1873_v21 = vld [vmem:[%s5703_s25 + $0x20] sm:$0xff] (!%p1049_p9)  ;;  %v1441_v26 = vld [vmem:[%s5693_s17 + $0x30] sm:$0xff] (!%p1049_p9)  ;;  %vm5654_vm3 = vmmov (!%p1049_p9), 1   ;;  %vm1301_vm5 = vcmask (!%p1049_p9), 1044480   ;;  %vm5659_vm6 = vmmov (!%p1049_p9), 0  }
  0x5d   : > { %5188 = vmatpush3.bf16.msra.mxu1 (!%p1049_p9), %v5187_v10  ;;  %5176 = vmatprep.subr.bf16.mxu0 (!%p1049_p9), %v5653_v1  ;;  %v1874_v22 = vld [vmem:[%s5703_s25 + $0x28] sm:$0xff] (!%p1049_p9)  ;;  %v5180_v24 = vpack.c.bf16 (!%p1049_p9), %v1440_v18, %v1439_v17  ;;  %v1442_v27 = vld [vmem:[%s5693_s17 + $0x38] sm:$0xf] (!%p1049_p9)  ;;  %vm5965_vm4 = vmpackc.low (!%p1049_p9), %vm1348_vm2, %vm5654_vm3  ;;  %v5660_v12 = vmov (!%p1049_p9), 0.0   ;;  %vm1395_vm7 = vcmask (!%p1049_p9), 97280   ;;  %vm1405_vm8 = vcmask (!%p1049_p9), 195584  }
  0x5e   : > { %5189 = vmatprep.subr.bf16.mxu1 (!%p1049_p9), %v5653_v1  ;;  %v5193_v25 = vpack.c.bf16 (!%p1049_p9), %v1874_v22, %v1873_v21  ;;  %v5183_v35 = vpack.c.bf16 (!%p1049_p9), %v1442_v27, %v1441_v26  ;;  %v1875_v5 = vld [vmem:[%s5703_s25 + $0x30] sm:$0xff] (!%p1049_p9)  ;;  %v1876_v6 = vld [vmem:[%s5703_s25 + $0x38] sm:$0xf] (!%p1049_p9)  ;;  %4784 = vmatprep.mubr.msk.f32.mxu0 (!%p1049_p9), %vm5659_vm6, %v5660_v12  ;;  %vm1415_vm9 = vcmask (!%p1049_p9), 293888   ;;  %vm1425_vm10 = vcmask (!%p1049_p9), 392192   ;;  %s7043_s6 = sld [smem:[#allocation12_spill]] (!%p1049_p9) }
  0x5f   : > { %4827 = vmatprep.mubr.msk.f32.mxu1 (!%p1049_p9), %vm5659_vm6, %v5660_v12  ;;  %vm1450_vm11 = vcmask (!%p1049_p9), 490496   ;;  %vm2090_vm12 = vcmask (!%p1049_p9), 1041408   ;;  %vm2077_vm14 = vcmask (!%p1049_p9), 605184   ;;  %vm1639_vm15 = vcmask (!%p1049_p9), 95232   ;;  %s7066_s12 = sld [smem:[#allocation32_spill]] (!%p1049_p9) }
  0x60   : > { %5178 = vmatpush3.bf16.msra.mxu0 (!%p1049_p9), %v5177_v15  ;;  %vm6288_vm13 = vmpackc.low (!%p1049_p9), %vm2090_vm12, %vm5654_vm3 }
  0x61   : > { %s5913_s28 = scalar_select %p1147_p10, %s5884_s0, 1  ;;  %5191 = vmatpush3.bf16.msra.mxu1 %v5190_v20  ;;  %5179 = vmatprep.subr.bf16.mxu0 %v5653_v1 }
  0x62   : > { %5192 = vmatprep.subr.bf16.mxu1 %v5653_v1 }
  0x63   : > { %s5380_s2 = smul.u32 80, %s5913_s28 }
  0x64   : > { %5181 = vmatpush3.bf16.msra.mxu0 %v5180_v24 }
  0x65   : > { %s5922_s27 = scalar_lea.vmem %s7033_s5, %s5380_s2  ;;  %s5925_s18 = scalar_lea.vmem %s7034_s9, %s5380_s2  ;;  %5194 = vmatpush3.bf16.msra.mxu1 %v5193_v25  ;;  %5182 = vmatprep.subr.bf16.mxu0 %v5653_v1 }
  0x66   : > { %v1160_v7 = vld [vmem:[%s5922_s27] sm:$0xff]  ;;  %v1161_v8 = vld [vmem:[%s5922_s27 + $0x8] sm:$0xff]  ;;  %v1182_v19 = vld [vmem:[%s5925_s18 + $0x10] sm:$0xff]  ;;  %5195 = vmatprep.subr.bf16.mxu1 %v5653_v1  ;;  %s6988_s2 = smov 12   ;;  %s7039_s5 = smov 36  }
  0x67   : > { %v1180_v9 = vld [vmem:[%s5925_s18] sm:$0xff]  ;;  %5480 = vtanh.f32 %v1160_v7  ;;  %v1181_v11 = vld [vmem:[%s5925_s18 + $0x8] sm:$0xff]  ;;  %v1162_v23 = vld [vmem:[%s5922_s27 + $0x10] sm:$0xff]  ;;  %s7040_s9 = smov 48  }
  0x68   : > { %5482 = vtanh.f32 %v1161_v8  ;;  %5185 = vmatpush3.bf16.msk.msra.mxu0 %vm5965_vm4, %v5183_v35  ;;  %v1183_v58 = vld [vmem:[%s5925_s18 + $0x18] sm:$0xff]  ;;  %v5196_v8 = vpack.c.bf16 %v1876_v6, %v1875_v5  ;;  %v1184_v18 = vld [vmem:[%s5925_s18 + $0x20] sm:$0xff]  ;;  %v1169_v20 = vld [vmem:[%s5922_s27 + $0x48] sm:$0x3] }
  0x69   : > { %5484 = vtanh.f32 %v1180_v9  ;;  %v1163_v63 = vld [vmem:[%s5922_s27 + $0x18] sm:$0xff]  ;;  %v1164_v21 = vld [vmem:[%s5922_s27 + $0x20] sm:$0xff] }
  0x6a   : > { %5486 = vtanh.f32 %v1181_v11  ;;  %5198 = vmatpush3.bf16.msk.msra.mxu1 %vm5965_vm4, %v5196_v8  ;;  %v1168_v26 = vld [vmem:[%s5922_s27 + $0x40] sm:$0xff] }
  0x6b   : > { %5488 = vtanh.f32 %v1182_v19 }
  0x6c   : > { %5490 = vtanh.f32 %v1162_v23 }
  0x6d   : > { %5492 = vtanh.f32 %v1183_v58 }
  0x6e   : > { %5494 = vtanh.f32 %v1163_v63 }
  0x6f   : > { %5496 = vtanh.f32 %v1184_v18 }
  0x70   : > { %5498 = vtanh.f32 %v1169_v20 }
  0x71   : > { %v5947_v28 = vpop.eup %5480  ;;  %5500 = vtanh.f32 %v1164_v21 }
  0x72   : > { %v5950_v29 = vpop.eup %5482  ;;  %v1256_v30 = vrot.slane %v5947_v28, 2  ;;  %v1211_v31 = vrot.slane %v5947_v28, 1  ;;  %v1302_v44 = vrot.slane %v5947_v28, 3  ;;  %v1349_v50 = vrot.slane %v5947_v28, 4 }
  0x73   : > { %v5954_v32 = vpop.eup %5484  ;;  %v1257_v33 = vrot.slane %v5950_v29, 2  ;;  %v1212_v34 = vrot.slane %v5950_v29, 1  ;;  %v1303_v45 = vrot.slane %v5950_v29, 3  ;;  %v1350_v51 = vrot.slane %v5950_v29, 4 }
  0x74   : > { %v5958_v36 = vpop.eup %5486  ;;  %v1696_v37 = vrot.slane %v5954_v32, 2  ;;  %v1652_v38 = vrot.slane %v5954_v32, 1  ;;  %v1741_v48 = vrot.slane %v5954_v32, 3  ;;  %v1787_v55 = vrot.slane %v5954_v32, 4 }
  0x75   : > { %v1258_v40 = vsel %vm1255_vm0, %v1256_v30, %v1257_v33  ;;  %v1213_v41 = vsel %vm1210_vm1, %v1211_v31, %v1212_v34  ;;  %v1697_v42 = vrot.slane %v5958_v36, 2  ;;  %v1653_v43 = vrot.slane %v5958_v36, 1  ;;  %v5990_v52 = vpop.eup %5488 }
  0x76   : > { %1273 = vrot.lane.b32.xlu1 %v1258_v40, %s6986_s22  ;;  %1228 = vrot.lane.b32.xlu0 %v1213_v41, %s6988_s2  ;;  %v1742_v49 = vrot.slane %v5958_v36, 3  ;;  %v1304_v54 = vsel %vm1301_vm5, %v1302_v44, %v1303_v45  ;;  %v1788_v56 = vrot.slane %v5958_v36, 4  ;;  %v5996_v57 = vpop.eup %5490  ;;  %v1351_v60 = vsel %vm1348_vm2, %v1349_v50, %v1350_v51  ;;  %v1185_v50 = vld [vmem:[%s5925_s18 + $0x28] sm:$0xff] }
  0x77   : > { %v1698_v46 = vsel %vm1255_vm0, %v1696_v37, %v1697_v42  ;;  %v1654_v47 = vsel %vm1210_vm1, %v1652_v38, %v1653_v43  ;;  %v1655_v61 = vrot.slane %v5990_v52, 1  ;;  %v1214_v62 = vrot.slane %v5996_v57, 1  ;;  %v6030_v13 = vpop.eup %5492 }
  0x78   : > { %v1743_v53 = vsel %vm1301_vm5, %v1741_v48, %v1742_v49  ;;  %v1789_v59 = vsel %vm1348_vm2, %v1787_v55, %v1788_v56  ;;  %v1699_v3 = vrot.slane %v5990_v52, 2  ;;  %v1259_v4 = vrot.slane %v5996_v57, 2  ;;  %v6037_v19 = vpop.eup %5494  ;;  %v1165_v55 = vld [vmem:[%s5922_s27 + $0x28] sm:$0xff] }
  0x79   : > { %v1656_v0 = vsel %vm1210_vm1, %v1653_v43, %v1655_v61  ;;  %v1215_v2 = vsel %vm1210_vm1, %v1212_v34, %v1214_v62  ;;  %v1744_v7 = vrot.slane %v5990_v52, 3  ;;  %v1305_v11 = vrot.slane %v5996_v57, 3  ;;  %v6060_v39 = vpop.eup %5496 }
  0x7a   : > { %1713 = vrot.lane.b32.xlu1 %v1698_v46, %s6986_s22  ;;  %1669 = vrot.lane.b32.xlu0 %v1654_v47, %s6988_s2  ;;  %s6990_s22 = smov 36   ;;  %s6992_s2 = smov 48   ;;  %v1700_v9 = vsel %vm1255_vm0, %v1697_v42, %v1699_v3  ;;  %v1260_v10 = vsel %vm1255_vm0, %v1257_v33, %v1259_v4  ;;  %v1790_v16 = vrot.slane %v5990_v52, 4  ;;  %v1352_v17 = vrot.slane %v5996_v57, 4  ;;  %v6062_v40 = vpop.eup %5498 }
  0x7b   : > { %v1745_v14 = vsel %vm1301_vm5, %v1742_v49, %v1744_v7  ;;  %v1306_v15 = vsel %vm1301_vm5, %v1303_v45, %v1305_v11  ;;  %v1657_v24 = vrot.slane %v6030_v13, 1  ;;  %v1216_v25 = vrot.slane %v6037_v19, 1  ;;  %v6066_v41 = vpop.eup %5500 }
  0x7c   : > { %v1791_v22 = vsel %vm1348_vm2, %v1788_v56, %v1790_v16  ;;  %v1353_v23 = vsel %vm1348_vm2, %v1350_v51, %v1352_v17  ;;  %5502 = vtanh.f32 %v1168_v26  ;;  %v1701_v31 = vrot.slane %v6030_v13, 2 }
  0x7d   : > { %v1658_v27 = vsel %vm1210_vm1, %v1655_v61, %v1657_v24  ;;  %v1217_v30 = vsel %vm1210_vm1, %v1214_v62, %v1216_v25  ;;  %v1261_v33 = vrot.slane %v6037_v19, 2  ;;  %v1746_v37 = vrot.slane %v6030_v13, 3 }
  0x7e   : > { %1760 = vrot.lane.b32.xlu1 %v1743_v53, %s6990_s22  ;;  %1321 = vrot.lane.b32.xlu0 %v1304_v54, %s6990_s22  ;;  %s7037_s22 = smov 12   ;;  %v1702_v34 = vsel %vm1255_vm0, %v1699_v3, %v1701_v31  ;;  %v1307_v38 = vrot.slane %v6037_v19, 3  ;;  %v1792_v44 = vrot.slane %v6030_v13, 4  ;;  %v1354_v45 = vrot.slane %v6037_v19, 4 }
  0x7f   : > { %v1262_v35 = vsel %vm1255_vm0, %v1259_v4, %v1261_v33  ;;  %v1747_v42 = vsel %vm1301_vm5, %v1744_v7, %v1746_v37  ;;  %v1319_v48 = vrot.slane %v6062_v40, 3  ;;  %v1659_v49 = vrot.slane %v6060_v39, 1 }
  0x80   : > { %v1308_v43 = vsel %vm1301_vm5, %v1305_v11, %v1307_v38  ;;  %v1793_v51 = vsel %vm1348_vm2, %v1790_v16, %v1792_v44  ;;  %v1355_v53 = vsel %vm1348_vm2, %v1352_v17, %v1354_v45  ;;  %v1218_v54 = vrot.slane %v6066_v41, 1  ;;  %v1166_v16 = vld [vmem:[%s5922_s27 + $0x30] sm:$0xff] }
  0x81   : > { %5504 = vtanh.f32 %v1185_v50  ;;  %v1660_v58 = vsel %vm1210_vm1, %v1657_v24, %v1659_v49  ;;  %v1263_v61 = vrot.slane %v6066_v41, 2  ;;  %v1794_v6 = vrot.slane %v6060_v39, 4 }
  0x82   : > { %1806 = vrot.lane.b32.xlu1 %v1789_v59, %s6992_s2  ;;  %1368 = vrot.lane.b32.xlu0 %v1351_v60, %s6992_s2  ;;  %s7038_s2 = smov 24   ;;  %5506 = vtanh.f32 %v1165_v55  ;;  %v1219_v59 = vsel %vm1210_vm1, %v1216_v25, %v1218_v54  ;;  %v1703_v60 = vrot.slane %v6060_v39, 2  ;;  %v1356_v7 = vrot.slane %v6066_v41, 4 }
  0x83   : > { %v1264_v63 = vsel %vm1255_vm0, %v1261_v33, %v1263_v61 }
  0x84   : > { %v1704_v62 = vsel %vm1255_vm0, %v1701_v31, %v1703_v60  ;;  %v1357_v11 = vsel %vm1348_vm2, %v1354_v45, %v1356_v7 }
  0x86   : > { %1671 = vrot.lane.b32.xlu1 %v1656_v0, %s7037_s22  ;;  %1230 = vrot.lane.b32.xlu0 %v1215_v2, %s7037_s22  ;;  %v6072_v46 = vpop.eup %5502  ;;  %v1748_v0 = vrot.slane %v6060_v39, 3  ;;  %v1309_v2 = vrot.slane %v6066_v41, 3 }
  0x87   : > { %v1317_v47 = vrot.slane %v6072_v46, 3 }
  0x88   : > { %v1749_v4 = vsel %vm1301_vm5, %v1746_v37, %v1748_v0  ;;  %v1310_v5 = vsel %vm1301_vm5, %v1307_v38, %v1309_v2 }
  0x89   : > { %v6087_v56 = vsel %vm1301_vm5, %v1317_v47, %v1319_v48 }
  0x8a   : > { %1715 = vrot.lane.b32.xlu1 %v1700_v9, %s7038_s2  ;;  %1275 = vrot.lane.b32.xlu0 %v1260_v10, %s7038_s2  ;;  %v1186_v9 = vld [vmem:[%s5925_s18 + $0x30] sm:$0xff]  ;;  %v1795_v10 = vsel %vm1348_vm2, %v1792_v44, %v1794_v6  ;;  %v1167_v44 = vld [vmem:[%s5922_s27 + $0x38] sm:$0xff]  ;;  %s7048_s27 = sld [smem:[#allocation15_spill]] }
  0x8b   : > { %v6103_v3 = vpop.eup %5504  ;;  %5508 = vtanh.f32 %v1186_v9 }
  0x8c   : > { %v6109_v8 = vpop.eup %5506  ;;  %5510 = vtanh.f32 %v1166_v16  ;;  %v1705_v20 = vrot.slane %v6103_v3, 2  ;;  %v1750_v24 = vrot.slane %v6103_v3, 3  ;;  %v1796_v31 = vrot.slane %v6103_v3, 4 }
  0x8d   : > { %v1265_v21 = vrot.slane %v6109_v8, 2  ;;  %v1311_v25 = vrot.slane %v6109_v8, 3  ;;  %v1358_v33 = vrot.slane %v6109_v8, 4 }
  0x8e   : > { %1762 = vrot.lane.b32.xlu1 %v1745_v14, %s7039_s5  ;;  %1323 = vrot.lane.b32.xlu0 %v1306_v15, %s7039_s5  ;;  %v1661_v14 = vrot.slane %v6103_v3, 1  ;;  %v1220_v15 = vrot.slane %v6109_v8, 1  ;;  %v1797_v37 = vsel %vm1348_vm2, %v1794_v6, %v1796_v31  ;;  %v1188_v6 = vld [vmem:[%s5925_s18 + $0x40] sm:$0xff] }
  0x8f   : > { %v1359_v38 = vsel %vm1348_vm2, %v1356_v7, %v1358_v33 }
  0x90   : > { %v1662_v17 = vsel %vm1210_vm1, %v1659_v49, %v1661_v14  ;;  %v1221_v18 = vsel %vm1210_vm1, %v1218_v54, %v1220_v15 }
  0x92   : > { %1808 = vrot.lane.b32.xlu1 %v1791_v22, %s7040_s9  ;;  %1370 = vrot.lane.b32.xlu0 %v1353_v23, %s7040_s9  ;;  %v1706_v22 = vsel %vm1255_vm0, %v1703_v60, %v1705_v20  ;;  %v1266_v23 = vsel %vm1255_vm0, %v1263_v61, %v1265_v21 }
  0x95   : > { %v6133_v26 = vpop.eup %5508 }
  0x96   : > { %1673 = vrot.lane.b32.xlu1 %v1658_v27, %s7037_s22  ;;  %1232 = vrot.lane.b32.xlu0 %v1217_v30, %s7037_s22  ;;  %v1751_v27 = vsel %vm1301_vm5, %v1748_v0, %v1750_v24  ;;  %v1312_v30 = vsel %vm1301_vm5, %v1309_v2, %v1311_v25  ;;  %v1707_v49 = vrot.slane %v6133_v26, 2  ;;  %v1752_v54 = vrot.slane %v6133_v26, 3 }
  0x97   : > { %v1798_v61 = vrot.slane %v6133_v26, 4 }
  0x99   : > { %v1799_v0 = vsel %vm1348_vm2, %v1796_v31, %v1798_v61  ;;  %v1226_v31 = vrot.slane %v6072_v46, 1 }
  0x9a   : > { %1717 = vrot.lane.b32.xlu1 %v1702_v34, %s7038_s2  ;;  %1277 = vrot.lane.b32.xlu0 %v1262_v35, %s7038_s2  ;;  %v6139_v34 = vpop.eup %5510  ;;  %v1187_v35 = vld [vmem:[%s5925_s18 + $0x38] sm:$0xff] }
  0x9b   : > { %5512 = vtanh.f32 %v1187_v35  ;;  %v1267_v50 = vrot.slane %v6139_v34, 2  ;;  %v1313_v55 = vrot.slane %v6139_v34, 3 }
  0x9c   : > { %5514 = vtanh.f32 %v1167_v44 }
  0x9d   : > { %v1314_v60 = vsel %vm1301_vm5, %v1311_v25, %v1313_v55  ;;  %5516 = vtanh.f32 %v1188_v6 }
  0x9e   : > { %1764 = vrot.lane.b32.xlu1 %v1747_v42, %s7039_s5  ;;  %1325 = vrot.lane.b32.xlu0 %v1308_v43, %s7039_s5  ;;  %v1663_v42 = vrot.slane %v6133_v26, 1  ;;  %v1222_v43 = vrot.slane %v6139_v34, 1 }
  0xa0   : > { %v1664_v45 = vsel %vm1210_vm1, %v1661_v14, %v1663_v42  ;;  %v1223_v48 = vsel %vm1210_vm1, %v1220_v15, %v1222_v43 }
  0xa2   : > { %1810 = vrot.lane.b32.xlu1 %v1793_v51, %s7040_s9  ;;  %1372 = vrot.lane.b32.xlu0 %v1355_v53, %s7040_s9  ;;  %v1708_v51 = vsel %vm1255_vm0, %v1705_v20, %v1707_v49  ;;  %v1268_v53 = vsel %vm1255_vm0, %v1265_v21, %v1267_v50 }
  0xa6   : > { %1675 = vrot.lane.b32.xlu1 %v1660_v58, %s7037_s22  ;;  %1234 = vrot.lane.b32.xlu0 %v1219_v59, %s7037_s22  ;;  %v6163_v58 = vpop.eup %5512  ;;  %v1753_v59 = vsel %vm1301_vm5, %v1750_v24, %v1752_v54 }
  0xa7   : > { %v1754_v16 = vrot.slane %v6163_v58, 3 }
  0xa9   : > { %v1755_v20 = vsel %vm1301_vm5, %v1752_v54, %v1754_v16  ;;  %v1364_v54 = vrot.slane %v6072_v46, 4 }
  0xaa   : > { %1719 = vrot.lane.b32.xlu1 %v1704_v62, %s7038_s2  ;;  %1279 = vrot.lane.b32.xlu0 %v1264_v63, %s7038_s2  ;;  %v1360_v62 = vrot.slane %v6139_v34, 4  ;;  %v6169_v63 = vpop.eup %5514 }
  0xab   : > { %v6202_v24 = vpop.eup %5516 }
  0xac   : > { %v1361_v2 = vsel %vm1348_vm2, %v1358_v33, %v1360_v62  ;;  %v1756_v44 = vrot.slane %v6202_v24, 3 }
  0xae   : > { %1766 = vrot.lane.b32.xlu1 %v1749_v4, %s7039_s5  ;;  %1327 = vrot.lane.b32.xlu0 %v1310_v5, %s7039_s5  ;;  %v1665_v4 = vrot.slane %v6163_v58, 1  ;;  %v1224_v5 = vrot.slane %v6169_v63, 1 }
  0xb0   : > { %v1666_v7 = vsel %vm1210_vm1, %v1663_v42, %v1665_v4  ;;  %v1225_v9 = vsel %vm1210_vm1, %v1222_v43, %v1224_v5  ;;  %v1227_v35 = vsel %vm1210_vm1, %v1224_v5, %v1226_v31 }
  0xb2   : > { %1812 = vrot.lane.b32.xlu1 %v1795_v10, %s7040_s9  ;;  %1374 = vrot.lane.b32.xlu0 %v1357_v11, %s7040_s9  ;;  %v1709_v10 = vrot.slane %v6163_v58, 2  ;;  %v1269_v11 = vrot.slane %v6169_v63, 2 }
  0xb4   : > { %v1710_v14 = vsel %vm1255_vm0, %v1707_v49, %v1709_v10  ;;  %v1270_v15 = vsel %vm1255_vm0, %v1267_v50, %v1269_v11  ;;  %v1757_v50 = vsel %vm1301_vm5, %v1754_v16, %v1756_v44  ;;  %v5203_v16 = vpack.c.bf16 %v6037_v19, %v5996_v57 }
  0xb6   : > { %1677 = vrot.lane.b32.xlu1 %v1662_v17, %s7037_s22  ;;  %1236 = vrot.lane.b32.xlu0 %v1221_v18, %s7037_s22  ;;  %v1315_v17 = vrot.slane %v6169_v63, 3  ;;  %v6192_v18 = vpack.c.bf16 %v5950_v29, %v5947_v28 }
  0xb8   : > { %v1316_v21 = vsel %vm1301_vm5, %v1313_v55, %v1315_v17  ;;  %5200 = vmatprep.subr.bf16.mxu0 %v6192_v18  ;;  %5222 = vmatprep.subr.bf16.mxu1 %v6192_v18 }
  0xba   : > { %1721 = vrot.lane.b32.xlu1 %v1706_v22, %s7038_s2  ;;  %1281 = vrot.lane.b32.xlu0 %v1266_v23, %s7038_s2  ;;  %v1800_v22 = vrot.slane %v6163_v58, 4  ;;  %v1362_v23 = vrot.slane %v6169_v63, 4 }
  0xbc   : > { %v1801_v25 = vsel %vm1348_vm2, %v1798_v61, %v1800_v22  ;;  %v1365_v61 = vsel %vm1348_vm2, %v1362_v23, %v1364_v54 }
  0xbe   : > { %1768 = vrot.lane.b32.xlu1 %v1751_v27, %s7039_s5  ;;  %1329 = vrot.lane.b32.xlu0 %v1312_v30, %s7039_s5  ;;  %v1363_v27 = vsel %vm1348_vm2, %v1360_v62, %v1362_v23  ;;  %v1667_v30 = vrot.slane %v6202_v24, 1  ;;  %v1366_v23 = vrot.slane %v6062_v40, 4 }
  0xc0   : > { %v1668_v33 = vsel %vm1210_vm1, %v1665_v4, %v1667_v30 }
  0xc2   : > { %1814 = vrot.lane.b32.xlu1 %v1797_v37, %s7040_s9  ;;  %1376 = vrot.lane.b32.xlu0 %v1359_v38, %s7040_s9  ;;  %v1711_v37 = vrot.slane %v6202_v24, 2  ;;  %v1271_v38 = vrot.slane %v6072_v46, 2 }
  0xc4   : > { %v1712_v42 = vsel %vm1255_vm0, %v1709_v10, %v1711_v37  ;;  %v1272_v43 = vsel %vm1255_vm0, %v1269_v11, %v1271_v38 }
  0xc6   : > { %1679 = vrot.lane.b32.xlu1 %v1664_v45, %s7037_s22  ;;  %1238 = vrot.lane.b32.xlu0 %v1223_v48, %s7037_s22  ;;  %v1189_v45 = vld [vmem:[%s5925_s18 + $0x48] sm:$0x3]  ;;  %s7049_s18 = sld [smem:[#allocation17_spill]] }
  0xc7   : > { %5518 = vtanh.f32 %v1189_v45 }
  0xca   : > { %1723 = vrot.lane.b32.xlu1 %v1708_v51, %s7038_s2  ;;  %1283 = vrot.lane.b32.xlu0 %v1268_v53, %s7038_s2  ;;  %v1318_v51 = vsel %vm1301_vm5, %v1315_v17, %v1317_v47  ;;  %v1802_v53 = vrot.slane %v6202_v24, 4 }
  0xce   : > { %1770 = vrot.lane.b32.xlu1 %v1753_v59, %s7039_s5  ;;  %1331 = vrot.lane.b32.xlu0 %v1314_v60, %s7039_s5  ;;  %v1803_v60 = vsel %vm1348_vm2, %v1800_v22, %v1802_v53 }
  0xd1   : > { %v6242_v6 = vpop.eup %5518 }
  0xd2   : > { %1816 = vrot.lane.b32.xlu1 %v1799_v0, %s7040_s9  ;;  %1378 = vrot.lane.b32.xlu0 %v1361_v2, %s7040_s9  ;;  %v1804_v22 = vrot.slane %v6242_v6, 4 }
  0xd6   : > { %1681 = vrot.lane.b32.xlu1 %v1666_v7, %s7037_s22  ;;  %1240 = vrot.lane.b32.xlu0 %v1225_v9, %s7037_s22 }
  0xda   : > { %1725 = vrot.lane.b32.xlu1 %v1710_v14, %s7038_s2  ;;  %1285 = vrot.lane.b32.xlu0 %v1270_v15, %s7038_s2  ;;  %v1758_v15 = vrot.slane %v6242_v6, 3 }
  0xde   : > { %1772 = vrot.lane.b32.xlu1 %v1755_v20, %s7039_s5  ;;  %1333 = vrot.lane.b32.xlu0 %v1316_v21, %s7039_s5  ;;  %v1759_v21 = vsel %vm1301_vm5, %v1756_v44, %v1758_v15 }
  0xe2   : > { %1818 = vrot.lane.b32.xlu1 %v1801_v25, %s7040_s9  ;;  %1380 = vrot.lane.b32.xlu0 %v1363_v27, %s7040_s9  ;;  %v5207_v25 = vpack.c.bf16 %v6109_v8, %v6066_v41 }
  0xe6   : > { %1683 = vrot.lane.b32.xlu1 %v1668_v33, %s7037_s22  ;;  %1242 = vrot.lane.b32.xlu0 %v1227_v35, %s7037_s22  ;;  %v5211_v33 = vpack.c.bf16 %v6169_v63, %v6139_v34 }
  0xe8   : > { %v1274_v48 = vpop.permute.xlu1 %1273  ;;  %v1229_v49 = vpop.permute.xlu0 %1228 }
  0xe9   : > { %v1396_v62 = vsel %vm1395_vm7, %v5947_v28, %v1229_v49 }
  0xea   : > { %1727 = vrot.lane.b32.xlu1 %v1712_v42, %s7038_s2  ;;  %1287 = vrot.lane.b32.xlu0 %v1272_v43, %s7038_s2  ;;  %v1406_v5 = vsel %vm1405_vm8, %v1396_v62, %v1274_v48 }
  0xec   : > { %v1714_v55 = vpop.permute.xlu1 %1713  ;;  %v1670_v59 = vpop.permute.xlu0 %1669 }
  0xed   : > { %v1833_v47 = vsel %vm1395_vm7, %v5954_v32, %v1670_v59 }
  0xee   : > { %1774 = vrot.lane.b32.xlu1 %v1757_v50, %s7039_s5  ;;  %1335 = vrot.lane.b32.xlu0 %v1318_v51, %s7039_s5  ;;  %v1842_v4 = vsel %vm1405_vm8, %v1833_v47, %v1714_v55  ;;  %v5215_v50 = vpack.c.bf16 %v6062_v40, %v6072_v46 }
  0xf0   : > { %v1761_v0 = vpop.permute.xlu1 %1760  ;;  %v1322_v2 = vpop.permute.xlu0 %1321 }
  0xf1   : > { %v1851_v28 = vsel %vm1415_vm9, %v1842_v4, %v1761_v0  ;;  %v1416_v7 = vsel %vm1415_vm9, %v1406_v5, %v1322_v2 }
  0xf2   : > { %1820 = vrot.lane.b32.xlu1 %v1803_v60, %s7040_s9  ;;  %1382 = vrot.lane.b32.xlu0 %v1365_v61, %s7040_s9 }
  0xf4   : > { %v1807_v9 = vpop.permute.xlu1 %1806  ;;  %v1369_v10 = vpop.permute.xlu0 %1368 }
  0xf5   : > { %v1860_v11 = vsel %vm1425_vm10, %v1851_v28, %v1807_v9  ;;  %v1426_v14 = vsel %vm1425_vm10, %v1416_v7, %v1369_v10 }
  0xf6   : > { %1685 = vrot.lane.b32.xlu1 %v1667_v30, %s7037_s22  ;;  %1244 = vrot.lane.b32.xlu0 %v1226_v31, %s7037_s22  ;;  %v1367_v31 = vsel %vm1348_vm2, %v1364_v54, %v1366_v23  ;;  %v6298_v54 = vpack.c.bf16 %v5958_v36, %v5954_v32  ;;  %s7050_s22 = sld [smem:[#allocation16_spill]] }
  0xf7   : > { %4785 = vmatmul.mubr.msk.f32.vlgmr.msra.gmra.mrb[0].mxu0 %vm1450_vm11, %v1426_v14  ;;  %4828 = vmatmul.mubr.msk.f32.vlgmr.msra.gmra.mrb[0].mxu1 %vm1450_vm11, %v1860_v11 }
  0xf8   : > { %v1672_v17 = vpop.permute.xlu1 %1671  ;;  %v1231_v20 = vpop.permute.xlu0 %1230  ;;  %4787 = vmatprep.mubr.msk.f32.mxu0 %vm5659_vm6, %v5660_v12  ;;  %4830 = vmatprep.mubr.msk.f32.mxu1 %vm5659_vm6, %v5660_v12 }
  0xf9   : > { %5202 = vmatpush3.bf16.msra.mxu0 %v6192_v18  ;;  %5224 = vmatpush3.bf16.msra.mxu1 %v6192_v18  ;;  %v1805_v18 = vsel %vm1348_vm2, %v1802_v53, %v1804_v22 }
  0xfa   : > { %1729 = vrot.lane.b32.xlu1 %v1711_v37, %s7038_s2  ;;  %1289 = vrot.lane.b32.xlu0 %v1271_v38, %s7038_s2  ;;  %v1834_v38 = vsel %vm1395_vm7, %v5958_v36, %v1672_v17 }
  0xfb   : > { %5204 = vmatprep.subr.bf16.mxu0 %v5203_v16  ;;  %5226 = vmatprep.subr.bf16.mxu1 %v5203_v16 }
  0xfc   : > { %v1716_v27 = vpop.permute.xlu1 %1715  ;;  %v1276_v30 = vpop.permute.xlu0 %1275 }
  0xfd   : > { %5206 = vmatpush3.bf16.msra.mxu0 %v5203_v16  ;;  %5228 = vmatpush3.bf16.msra.mxu1 %v5203_v16  ;;  %v1843_v42 = vsel %vm1405_vm8, %v1834_v38, %v1716_v27 }
  0xfe   : > { %1776 = vrot.lane.b32.xlu1 %v1759_v21, %s7039_s5  ;;  %1337 = vrot.lane.b32.xlu0 %v6087_v56, %s7039_s5  ;;  %v1397_v56 = vsel %vm1395_vm7, %v5950_v29, %v1231_v20  ;;  %s7046_s5 = sld [smem:[#allocation13_spill]] }
  0xff   : > { %5208 = vmatprep.subr.bf16.mxu0 %v5207_v25  ;;  %5230 = vmatprep.subr.bf16.mxu1 %v5207_v25  ;;  %v1407_v43 = vsel %vm1405_vm8, %v1397_v56, %v1276_v30 }
 0x100   : > { %v1763_v35 = vpop.permute.xlu1 %1762  ;;  %v1324_v37 = vpop.permute.xlu0 %1323 }
 0x101   : > { %5210 = vmatpush3.bf16.msra.mxu0 %v5207_v25  ;;  %5232 = vmatpush3.bf16.msra.mxu1 %v5207_v25  ;;  %v1852_v44 = vsel %vm1415_vm9, %v1843_v42, %v1763_v35  ;;  %v1417_v45 = vsel %vm1415_vm9, %v1407_v43, %v1324_v37 }
 0x102   : > { %1822 = vrot.lane.b32.xlu1 %v1805_v18, %s7040_s9  ;;  %1384 = vrot.lane.b32.xlu0 %v1367_v31, %s7040_s9  ;;  %s7047_s9 = sld [smem:[#allocation14_spill]] }
 0x103   : > { %5212 = vmatprep.subr.bf16.mxu0 %v5211_v33  ;;  %5234 = vmatprep.subr.bf16.mxu1 %v5211_v33 }
 0x104   : > { %v1809_v48 = vpop.permute.xlu1 %1808  ;;  %v1371_v49 = vpop.permute.xlu0 %1370 }
 0x105   : > { %v1861_v51 = vsel %vm1425_vm10, %v1852_v44, %v1809_v48  ;;  %v1427_v53 = vsel %vm1425_vm10, %v1417_v45, %v1371_v49  ;;  %5214 = vmatpush3.bf16.msra.mxu0 %v5211_v33  ;;  %5236 = vmatpush3.bf16.msra.mxu1 %v5211_v33 }
 0x106   : > { %4788 = vmatmul.mubr.msk.f32.gmra.mrb[2].mxu0 %vm1450_vm11, %v1427_v53  ;;  %4831 = vmatmul.mubr.msk.f32.gmra.mrb[2].mxu1 %vm1450_vm11, %v1861_v51 }
 0x107   : > { %4790 = vmatprep.mubr.msk.f32.mxu0 %vm5659_vm6, %v5660_v12  ;;  %4833 = vmatprep.mubr.msk.f32.mxu1 %vm5659_vm6, %v5660_v12 }
 0x108   : > { %v1674_v40 = vpop.permute.xlu1 %1673  ;;  %v1233_v55 = vpop.permute.xlu0 %1232  ;;  %5217 = vmatprep.subr.msk.bf16.mxu0 %vm6288_vm13, %v5215_v50  ;;  %5239 = vmatprep.subr.msk.bf16.mxu1 %vm6288_vm13, %v5215_v50 }
 0x109   : > { %5220 = vmatpush3.bf16.msk.msra.mxu0 %vm6288_vm13, %v5215_v50  ;;  %5242 = vmatpush3.bf16.msk.msra.mxu1 %vm6288_vm13, %v5215_v50  ;;  %v1835_v61 = vsel %vm1395_vm7, %v5990_v52, %v1674_v40  ;;  %v1398_v62 = vsel %vm1395_vm7, %v5996_v57, %v1233_v55 }
 0x10a   : > { %5244 = vmatprep.subr.bf16.mxu0 %v6298_v54  ;;  %5266 = vmatprep.subr.bf16.mxu1 %v6298_v54 }
 0x10c   : > { %v1718_v32 = vpop.permute.xlu1 %1717  ;;  %v1278_v36 = vpop.permute.xlu0 %1277 }
 0x10d   : > { %v1844_v47 = vsel %vm1405_vm8, %v1835_v61, %v1718_v32  ;;  %v1408_v0 = vsel %vm1405_vm8, %v1398_v62, %v1278_v36 }
 0x110   : > { %v1765_v59 = vpop.permute.xlu1 %1764  ;;  %v1326_v60 = vpop.permute.xlu0 %1325 }
 0x111   : > { %v1853_v2 = vsel %vm1415_vm9, %v1844_v47, %v1765_v59  ;;  %v1418_v4 = vsel %vm1415_vm9, %v1408_v0, %v1326_v60 }
 0x114   : > { %v1811_v5 = vpop.permute.xlu1 %1810  ;;  %v1373_v28 = vpop.permute.xlu0 %1372 }
 0x115   : > { %v1862_v7 = vsel %vm1425_vm10, %v1853_v2, %v1811_v5  ;;  %v1428_v9 = vsel %vm1425_vm10, %v1418_v4, %v1373_v28 }
 0x116   : > { %4791 = vmatmul.mubr.msk.f32.gmra.mrb[4].mxu0 %vm1450_vm11, %v1428_v9  ;;  %4834 = vmatmul.mubr.msk.f32.gmra.mrb[4].mxu1 %vm1450_vm11, %v1862_v7 }
 0x117   : > { %4793 = vmatprep.mubr.msk.f32.mxu0 %vm5659_vm6, %v5660_v12  ;;  %4836 = vmatprep.mubr.msk.f32.mxu1 %vm5659_vm6, %v5660_v12 }
 0x118   : > { %v1676_v57 = vpop.permute.xlu1 %1675  ;;  %v1235_v10 = vpop.permute.xlu0 %1234 }
 0x119   : > { %v1836_v17 = vsel %vm1395_vm7, %v6030_v13, %v1676_v57  ;;  %v1399_v20 = vsel %vm1395_vm7, %v6037_v19, %v1235_v10 }
 0x11c   : > { %v1720_v11 = vpop.permute.xlu1 %1719  ;;  %v1280_v14 = vpop.permute.xlu0 %1279 }
 0x11d   : > { %v1845_v21 = vsel %vm1405_vm8, %v1836_v17, %v1720_v11  ;;  %v1409_v22 = vsel %vm1405_vm8, %v1399_v20, %v1280_v14 }
 0x120   : > { %v1767_v15 = vpop.permute.xlu1 %1766  ;;  %v1328_v16 = vpop.permute.xlu0 %1327 }
 0x121   : > { %v1854_v23 = vsel %vm1415_vm9, %v1845_v21, %v1767_v15  ;;  %v1419_v25 = vsel %vm1415_vm9, %v1409_v22, %v1328_v16 }
 0x124   : > { %v1813_v27 = vpop.permute.xlu1 %1812  ;;  %v1375_v30 = vpop.permute.xlu0 %1374 }
 0x125   : > { %v1863_v18 = vsel %vm1425_vm10, %v1854_v23, %v1813_v27  ;;  %v1429_v31 = vsel %vm1425_vm10, %v1419_v25, %v1375_v30 }
 0x126   : > { %4794 = vmatmul.mubr.msk.f32.gmra.mrb[6].mxu0 %vm1450_vm11, %v1429_v31  ;;  %4837 = vmatmul.mubr.msk.f32.gmra.mrb[6].mxu1 %vm1450_vm11, %v1863_v18 }
 0x127   : > { %4796 = vmatprep.mubr.msk.f32.mxu0 %vm5659_vm6, %v5660_v12  ;;  %4839 = vmatprep.mubr.msk.f32.mxu1 %vm5659_vm6, %v5660_v12 }
 0x128   : > { %v1678_v19 = vpop.permute.xlu1 %1677  ;;  %v1237_v33 = vpop.permute.xlu0 %1236 }
 0x129   : > { %v1837_v42 = vsel %vm1395_vm7, %v6060_v39, %v1678_v19  ;;  %v1400_v43 = vsel %vm1395_vm7, %v6066_v41, %v1237_v33 }
 0x12c   : > { %v1722_v35 = vpop.permute.xlu1 %1721  ;;  %v1282_v37 = vpop.permute.xlu0 %1281 }
 0x12d   : > { %v1846_v44 = vsel %vm1405_vm8, %v1837_v42, %v1722_v35  ;;  %v1410_v45 = vsel %vm1405_vm8, %v1400_v43, %v1282_v37 }
 0x130   : > { %v1769_v38 = vpop.permute.xlu1 %1768  ;;  %v1330_v56 = vpop.permute.xlu0 %1329 }
 0x131   : > { %v1855_v48 = vsel %vm1415_vm9, %v1846_v44, %v1769_v38  ;;  %v1420_v49 = vsel %vm1415_vm9, %v1410_v45, %v1330_v56 }
 0x134   : > { %v1815_v50 = vpop.permute.xlu1 %1814  ;;  %v1377_v51 = vpop.permute.xlu0 %1376 }
 0x135   : > { %v1864_v53 = vsel %vm1425_vm10, %v1855_v48, %v1815_v50  ;;  %v1430_v40 = vsel %vm1425_vm10, %v1420_v49, %v1377_v51 }
 0x136   : > { %4797 = vmatmul.mubr.msk.f32.gmra.mrb[8].mxu0 %vm1450_vm11, %v1430_v40  ;;  %4840 = vmatmul.mubr.msk.f32.gmra.mrb[8].mxu1 %vm1450_vm11, %v1864_v53 }
 0x137   : > { %4799 = vmatprep.mubr.msk.f32.mxu0 %vm5659_vm6, %v5660_v12  ;;  %4842 = vmatprep.mubr.msk.f32.mxu1 %vm5659_vm6, %v5660_v12 }
 0x138   : > { %v1680_v41 = vpop.permute.xlu1 %1679  ;;  %v1239_v55 = vpop.permute.xlu0 %1238 }
 0x139   : > { %v1838_v61 = vsel %vm1395_vm7, %v6103_v3, %v1680_v41  ;;  %v1401_v62 = vsel %vm1395_vm7, %v6109_v8, %v1239_v55 }
 0x13c   : > { %v1724_v32 = vpop.permute.xlu1 %1723  ;;  %v1284_v36 = vpop.permute.xlu0 %1283 }
 0x13d   : > { %v1847_v47 = vsel %vm1405_vm8, %v1838_v61, %v1724_v32  ;;  %v1411_v0 = vsel %vm1405_vm8, %v1401_v62, %v1284_v36 }
 0x140   : > { %v1771_v59 = vpop.permute.xlu1 %1770  ;;  %v1332_v60 = vpop.permute.xlu0 %1331 }
 0x141   : > { %v1856_v2 = vsel %vm1415_vm9, %v1847_v47, %v1771_v59  ;;  %v1421_v4 = vsel %vm1415_vm9, %v1411_v0, %v1332_v60 }
 0x144   : > { %v1817_v5 = vpop.permute.xlu1 %1816  ;;  %v1379_v28 = vpop.permute.xlu0 %1378 }
 0x145   : > { %v1865_v7 = vsel %vm1425_vm10, %v1856_v2, %v1817_v5  ;;  %v1431_v9 = vsel %vm1425_vm10, %v1421_v4, %v1379_v28  ;;  %v2069_v4 = vld [vmem:[%s7030_s3] sm:$0xff] }
 0x146   : > { %4800 = vmatmul.mubr.msk.f32.gmra.mrb[10].mxu0 %vm1450_vm11, %v1431_v9  ;;  %4843 = vmatmul.mubr.msk.f32.gmra.mrb[10].mxu1 %vm1450_vm11, %v1865_v7  ;;  %v2073_v5 = vld [vmem:[%s7029_s8] sm:$0xff]  ;;  %v2070_v7 = vld [vmem:[%s7030_s3 + $0x8] sm:$0xff] }
 0x147   : > { %4802 = vmatprep.mubr.msk.f32.mxu0 %vm5659_vm6, %v5660_v12  ;;  %4845 = vmatprep.mubr.msk.f32.mxu1 %vm5659_vm6, %v5660_v12  ;;  %v2074_v9 = vld [vmem:[%s7029_s8 + $0x8] sm:$0xff] }
 0x148   : > { %v1682_v8 = vpop.permute.xlu1 %1681  ;;  %v1241_v57 = vpop.permute.xlu0 %1240 }
 0x149   : > { %v1839_v16 = vsel %vm1395_vm7, %v6133_v26, %v1682_v8  ;;  %v1402_v17 = vsel %vm1395_vm7, %v6139_v34, %v1241_v57  ;;  %v2071_v8 = vld [vmem:[%s7030_s3 + $0x10] sm:$0xff] }
 0x14a   : > { %v2075_v57 = vld [vmem:[%s7029_s8 + $0x10] sm:$0xff] }
 0x14c   : > { %v1726_v10 = vpop.permute.xlu1 %1725  ;;  %v1286_v11 = vpop.permute.xlu0 %1285 }
 0x14d   : > { %v1848_v20 = vsel %vm1405_vm8, %v1839_v16, %v1726_v10  ;;  %v1412_v21 = vsel %vm1405_vm8, %v1402_v17, %v1286_v11  ;;  %v5247_v10 = vpack.c.bf16 %v6030_v13, %v5990_v52  ;;  %v2072_v11 = vld [vmem:[%s7030_s3 + $0x18] sm:$0x3f]  ;;  %v5255_v52 = vpack.c.bf16 %v6163_v58, %v6133_v26  ;;  %v6479_v16 = vld [vmem:[%s7043_s6] ss:$0 sm:$0xff]  ;;  %s7051_s3 = sld [smem:[#allocation18_spill]] }
 0x14e   : > { %v5259_v13 = vpack.c.bf16 %v6242_v6, %v6202_v24 }
 0x150   : > { %v1773_v14 = vpop.permute.xlu1 %1772  ;;  %v1334_v15 = vpop.permute.xlu0 %1333 }
 0x151   : > { %v1857_v22 = vsel %vm1415_vm9, %v1848_v20, %v1773_v14  ;;  %v1422_v23 = vsel %vm1415_vm9, %v1412_v21, %v1334_v15  ;;  %v2076_v14 = vld [vmem:[%s7029_s8 + $0x18] sm:$0x3f]  ;;  %v5251_v15 = vpack.c.bf16 %v6103_v3, %v6060_v39  ;;  %v6471_v39 = vld [vmem:[%s5698_s21] ss:$0 sm:$0xff] }
 0x152   : > { %v6474_v3 = vld [vmem:[%s5708_s29] ss:$0 sm:$0xff] }
 0x154   : > { %v1819_v25 = vpop.permute.xlu1 %1818  ;;  %v1381_v27 = vpop.permute.xlu0 %1380 }
 0x155   : > { %v1866_v30 = vsel %vm1425_vm10, %v1857_v22, %v1819_v25  ;;  %v1432_v18 = vsel %vm1425_vm10, %v1422_v23, %v1381_v27 }
 0x156   : > { %4803 = vmatmul.mubr.msk.f32.gmra.mrb[12].mxu0 %vm1450_vm11, %v1432_v18  ;;  %4846 = vmatmul.mubr.msk.f32.gmra.mrb[12].mxu1 %vm1450_vm11, %v1866_v30 }
 0x157   : > { %4805 = vmatprep.mubr.msk.f32.mxu0 %vm5659_vm6, %v5660_v12  ;;  %4848 = vmatprep.mubr.msk.f32.mxu1 %vm5659_vm6, %v5660_v12 }
 0x158   : > { %v1684_v34 = vpop.permute.xlu1 %1683  ;;  %v1243_v31 = vpop.permute.xlu0 %1242 }
 0x159   : > { %v1840_v38 = vsel %vm1395_vm7, %v6163_v58, %v1684_v34  ;;  %v1403_v56 = vsel %vm1395_vm7, %v6169_v63, %v1243_v31 }
 0x15c   : > { %v1728_v19 = vpop.permute.xlu1 %1727  ;;  %v1288_v33 = vpop.permute.xlu0 %1287 }
 0x15d   : > { %v1849_v42 = vsel %vm1405_vm8, %v1840_v38, %v1728_v19  ;;  %v1413_v43 = vsel %vm1405_vm8, %v1403_v56, %v1288_v33 }
 0x160   : > { %v1775_v35 = vpop.permute.xlu1 %1774  ;;  %v1336_v37 = vpop.permute.xlu0 %1335 }
 0x161   : > { %v1858_v44 = vsel %vm1415_vm9, %v1849_v42, %v1775_v35  ;;  %v1423_v45 = vsel %vm1415_vm9, %v1413_v43, %v1336_v37 }
 0x164   : > { %v1821_v48 = vpop.permute.xlu1 %1820  ;;  %v1383_v49 = vpop.permute.xlu0 %1382 }
 0x165   : > { %v1867_v50 = vsel %vm1425_vm10, %v1858_v44, %v1821_v48  ;;  %v1433_v51 = vsel %vm1425_vm10, %v1423_v45, %v1383_v49 }
 0x166   : > { %4806 = vmatmul.mubr.msk.f32.gmra.mrb[14].mxu0 %vm1450_vm11, %v1433_v51  ;;  %4849 = vmatmul.mubr.msk.f32.gmra.mrb[14].mxu1 %vm1450_vm11, %v1867_v50 }
 0x167   : > { %4808 = vmatprep.mubr.msk.f32.mxu0 %vm5659_vm6, %v5660_v12  ;;  %4851 = vmatprep.mubr.msk.f32.mxu1 %vm5659_vm6, %v5660_v12 }
 0x168   : > { %v1686_v63 = vpop.permute.xlu1 %1685  ;;  %v1245_v53 = vpop.permute.xlu0 %1244 }
 0x169   : > { %v1841_v36 = vsel %vm1395_vm7, %v6202_v24, %v1686_v63  ;;  %v1404_v59 = vsel %vm1395_vm7, %v6072_v46, %v1245_v53 }
 0x16c   : > { %v1730_v40 = vpop.permute.xlu1 %1729  ;;  %v1290_v41 = vpop.permute.xlu0 %1289 }
 0x16d   : > { %v1850_v60 = vsel %vm1405_vm8, %v1841_v36, %v1730_v40  ;;  %v1414_v61 = vsel %vm1405_vm8, %v1404_v59, %v1290_v41 }
 0x170   : > { %v1777_v55 = vpop.permute.xlu1 %1776  ;;  %v1338_v32 = vpop.permute.xlu0 %1337 }
 0x171   : > { %v1859_v62 = vsel %vm1415_vm9, %v1850_v60, %v1777_v55  ;;  %v1424_v47 = vsel %vm1415_vm9, %v1414_v61, %v1338_v32 }
 0x174   : > { %v1823_v0 = vpop.permute.xlu1 %1822  ;;  %v1385_v2 = vpop.permute.xlu0 %1384 }
 0x175   : > { %v1868_v46 = vsel %vm1425_vm10, %v1859_v62, %v1823_v0  ;;  %v1434_v28 = vsel %vm1425_vm10, %v1424_v47, %v1385_v2  ;;  %vm6551_vm10 = vmpackc.low %vm1255_vm0, %vm5654_vm3 }
 0x176   : > { %4809 = vmatmul.mubr.msk.f32.gmra.mrb[16].mxu0 %vm1450_vm11, %v1434_v28  ;;  %4852 = vmatmul.mubr.msk.f32.gmra.mrb[16].mxu1 %vm1450_vm11, %v1868_v46  ;;  %vm2553_vm11 = vcmask 244736  }
 0x177   : > { %4874 = vmatprep.mubr.msk.f32.mxu0 %vm2077_vm14, %v2069_v4  ;;  %4900 = vmatprep.mubr.msk.f32.mxu1 %vm2077_vm14, %v2073_v5 }
 0x17a   : > { %4875 = vmatmul.mubr.msk.f32.vlgmr.msra.gmra.mrb[18].mxu0 %vm2077_vm14, %v2070_v7  ;;  %4901 = vmatmul.mubr.msk.f32.vlgmr.msra.gmra.mrb[18].mxu1 %vm2077_vm14, %v2074_v9 }
 0x17b   : > { %5246 = vmatpush3.bf16.msra.mxu0 %v6298_v54  ;;  %5268 = vmatpush3.bf16.msra.mxu1 %v6298_v54 }
 0x17c   : > { %4877 = vmatprep.mubr.msk.f32.mxu0 %vm2077_vm14, %v2071_v8  ;;  %4903 = vmatprep.mubr.msk.f32.mxu1 %vm2077_vm14, %v2075_v57 }
 0x17d   : > { %5248 = vmatprep.subr.bf16.mxu0 %v5247_v10  ;;  %5270 = vmatprep.subr.bf16.mxu1 %v5247_v10 }
 0x17e   : > { %4878 = vmatmul.mubr.msk.f32.gmra.mrb[20].mxu0 %vm2077_vm14, %v2072_v11  ;;  %4904 = vmatmul.mubr.msk.f32.gmra.mrb[20].mxu1 %vm2077_vm14, %v2076_v14 }
 0x17f   : > { %5250 = vmatpush3.bf16.msra.mxu0 %v5247_v10  ;;  %5272 = vmatpush3.bf16.msra.mxu1 %v5247_v10 }
 0x180   : > { %5252 = vmatprep.subr.bf16.mxu0 %v5251_v15  ;;  %5274 = vmatprep.subr.bf16.mxu1 %v5251_v15 }
 0x181   : > { %4926 = vmatprep.mubr.msk.f32.mxu0 %vm2077_vm14, %v2069_v4  ;;  %4952 = vmatprep.mubr.msk.f32.mxu1 %vm2077_vm14, %v2073_v5 }
 0x183   : > { %5254 = vmatpush3.bf16.msra.mxu0 %v5251_v15  ;;  %5276 = vmatpush3.bf16.msra.mxu1 %v5251_v15 }
 0x184   : > { %5256 = vmatprep.subr.bf16.mxu0 %v5255_v52  ;;  %5278 = vmatprep.subr.bf16.mxu1 %v5255_v52 }
 0x187   : > { %5258 = vmatpush3.bf16.msra.mxu0 %v5255_v52  ;;  %5280 = vmatpush3.bf16.msra.mxu1 %v5255_v52 }
 0x188   : > { %5261 = vmatprep.subr.msk.bf16.mxu0 %vm6288_vm13, %v5259_v13  ;;  %5283 = vmatprep.subr.msk.bf16.mxu1 %vm6288_vm13, %v5259_v13 }
 0x18b   : > { %5264 = vmatpush3.bf16.msk.msra.mxu0 %vm6288_vm13, %v5259_v13  ;;  %5286 = vmatpush3.bf16.msk.msra.mxu1 %vm6288_vm13, %v5259_v13 }
 0x18c   : > { %5287 = vmatprep.subr.bf16.mxu0 %v5653_v1  ;;  %5301 = vmatprep.subr.bf16.mxu1 %v5653_v1 }
 0x18e   : > { %4927 = vmatmul.mubr.msk.f32.vlgmr.msra.gmra.mrb[22].mxu0 %vm2077_vm14, %v2070_v7  ;;  %4953 = vmatmul.mubr.msk.f32.vlgmr.msra.gmra.mrb[22].mxu1 %vm2077_vm14, %v2074_v9 }
 0x18f   : > { %4929 = vmatprep.mubr.msk.f32.mxu0 %vm2077_vm14, %v2071_v8  ;;  %4955 = vmatprep.mubr.msk.f32.mxu1 %vm2077_vm14, %v2075_v57 }
 0x192   : > { %4930 = vmatmul.mubr.msk.f32.gmra.mrb[24].mxu0 %vm2077_vm14, %v2072_v11  ;;  %4956 = vmatmul.mubr.msk.f32.gmra.mrb[24].mxu1 %vm2077_vm14, %v2076_v14 }
 0x193   : > { %4966 = vmatprep.mubr.msk.f32.mxu0 %vm5659_vm6, %v5660_v12  ;;  %5036 = vmatprep.mubr.msk.f32.mxu1 %vm5659_vm6, %v5660_v12 }
 0x1ca   : > { %v1547_v26 = vpop.f32.mrb[0].mxu0  ;;  %v1980_v58 = vpop.f32.mrb[0].mxu1 }
 0x1cb   : > { %v1548_v24 = vadd.f32 %v6471_v39, %v1547_v26  ;;  %v1981_v6 = vadd.f32 %v6474_v3, %v1980_v58  ;;  %v4786_v29 = vpop.f32.mrb[1].mxu0  ;;  %v4829_v54 = vpop.f32.mrb[1].mxu1 }
 0x1cd   : > { %v1591_v17 = vmax.f32 %v1548_v24, 0.0  ;;  %v2024_v20 = vmax.f32 %v1981_v6, 0.0 }
 0x1cf   : > { %v2033_v21 = vmul.f32 %v6479_v16, %v2024_v20  ;;  %v1606_v22 = vmul.f32 %v6479_v16, %v1591_v17 }
 0x1d1   : > { %v2042_v23 = vsel %vm1395_vm7, %v2033_v21, 0.0  ;;  %v1615_v25 = vsel %vm1395_vm7, %v1606_v22, 0.0 }
 0x1d2   : > { %2043 = vadd.xlane.f32.xlu1 %v2042_v23  ;;  %1616 = vadd.xlane.f32.xlu0 %v1615_v25 }
 0x1d9   : > { %v1552_v27 = vpop.f32.mrb[2].mxu0  ;;  %v1985_v30 = vpop.f32.mrb[2].mxu1 }
 0x1da   : > { %v1553_v18 = vadd.f32 %v6471_v39, %v1552_v27  ;;  %v1986_v34 = vadd.f32 %v6474_v3, %v1985_v30  ;;  %v4789_v31 = vpop.f32.mrb[3].mxu0  ;;  %v4832_v19 = vpop.f32.mrb[3].mxu1 }
 0x1dc   : > { %v1592_v33 = vmax.f32 %v1553_v18, 0.0  ;;  %v2025_v35 = vmax.f32 %v1986_v34, 0.0 }
 0x1de   : > { %v2034_v37 = vmul.f32 %v6479_v16, %v2025_v35  ;;  %v1607_v38 = vmul.f32 %v6479_v16, %v1592_v33 }
 0x1e0   : > { %v2045_v56 = vsel %vm1395_vm7, %v2034_v37, 0.0  ;;  %v1618_v42 = vsel %vm1395_vm7, %v1607_v38, 0.0 }
 0x1e1   : > { %2046 = vadd.xlane.f32.xlu0 %v2045_v56  ;;  %1619 = vadd.xlane.f32.xlu1 %v1618_v42 }
 0x1e9   : > { %v1557_v43 = vpop.f32.mrb[4].mxu0  ;;  %v1990_v44 = vpop.f32.mrb[4].mxu1 }
 0x1ea   : > { %v1558_v45 = vadd.f32 %v6471_v39, %v1557_v43  ;;  %v1991_v48 = vadd.f32 %v6474_v3, %v1990_v44  ;;  %v4792_v49 = vpop.f32.mrb[5].mxu0  ;;  %v4835_v50 = vpop.f32.mrb[5].mxu1 }
 0x1ec   : > { %v1593_v51 = vmax.f32 %v1558_v45, 0.0  ;;  %v2026_v63 = vmax.f32 %v1991_v48, 0.0 }
 0x1ee   : > { %v1608_v53 = vmul.f32 %v6479_v16, %v1593_v51  ;;  %v2035_v41 = vmul.f32 %v6479_v16, %v2026_v63 }
 0x1f0   : > { %v1621_v40 = vsel %vm1395_vm7, %v1608_v53, 0.0  ;;  %v2048_v55 = vsel %vm1395_vm7, %v2035_v41, 0.0 }
 0x1f1   : > { %1622 = vadd.xlane.f32.xlu1 %v1621_v40 }
 0x1f5   : > { %2049 = vadd.xlane.f32.xlu1 %v2048_v55 }
 0x1f9   : > { %v1562_v32 = vpop.f32.mrb[6].mxu0  ;;  %v1995_v36 = vpop.f32.mrb[6].mxu1 }
 0x1fa   : > { %v1563_v59 = vadd.f32 %v6471_v39, %v1562_v32  ;;  %v1996_v60 = vadd.f32 %v6474_v3, %v1995_v36  ;;  %v4795_v61 = vpop.f32.mrb[7].mxu0  ;;  %v4838_v62 = vpop.f32.mrb[7].mxu1 }
 0x1fc   : > { %v1594_v47 = vmax.f32 %v1563_v59, 0.0  ;;  %v2027_v0 = vmax.f32 %v1996_v60, 0.0 }
 0x1fe   : > { %v1609_v2 = vmul.f32 %v6479_v16, %v1594_v47  ;;  %v2036_v5 = vmul.f32 %v6479_v16, %v2027_v0 }
 0x200   : > { %v1624_v4 = vsel %vm1395_vm7, %v1609_v2, 0.0  ;;  %v2051_v46 = vsel %vm1395_vm7, %v2036_v5, 0.0 }
 0x201   : > { %1625 = vadd.xlane.f32.xlu0 %v1624_v4 }
 0x205   : > { %2052 = vadd.xlane.f32.xlu0 %v2051_v46 }
 0x209   : > { %v1567_v28 = vpop.f32.mrb[8].mxu0  ;;  %v2000_v7 = vpop.f32.mrb[8].mxu1 }
 0x20a   : > { %v1568_v9 = vadd.f32 %v6471_v39, %v1567_v28  ;;  %v2001_v8 = vadd.f32 %v6474_v3, %v2000_v7  ;;  %v4798_v57 = vpop.f32.mrb[9].mxu0  ;;  %v4841_v10 = vpop.f32.mrb[9].mxu1 }
 0x20c   : > { %v1595_v11 = vmax.f32 %v1568_v9, 0.0  ;;  %v2028_v14 = vmax.f32 %v2001_v8, 0.0 }
 0x20e   : > { %v1610_v15 = vmul.f32 %v6479_v16, %v1595_v11  ;;  %v2037_v13 = vmul.f32 %v6479_v16, %v2028_v14 }
 0x210   : > { %v1627_v52 = vsel %vm1395_vm7, %v1610_v15, 0.0  ;;  %v2054_v26 = vsel %vm1395_vm7, %v2037_v13, 0.0 }
 0x211   : > { %1628 = vadd.xlane.f32.xlu1 %v1627_v52 }
 0x215   : > { %2055 = vadd.xlane.f32.xlu1 %v2054_v26 }
 0x219   : > { %v1572_v58 = vpop.f32.mrb[10].mxu0  ;;  %v2005_v24 = vpop.f32.mrb[10].mxu1 }
 0x21a   : > { %v1573_v6 = vadd.f32 %v6471_v39, %v1572_v58  ;;  %v2006_v29 = vadd.f32 %v6474_v3, %v2005_v24  ;;  %v4801_v54 = vpop.f32.mrb[11].mxu0  ;;  %v4844_v17 = vpop.f32.mrb[11].mxu1 }
 0x21c   : > { %v1596_v20 = vmax.f32 %v1573_v6, 0.0  ;;  %v2029_v21 = vmax.f32 %v2006_v29, 0.0 }
 0x21e   : > { %v1611_v22 = vmul.f32 %v6479_v16, %v1596_v20  ;;  %v2038_v25 = vmul.f32 %v6479_v16, %v2029_v21 }
 0x220   : > { %v1630_v23 = vsel %vm1395_vm7, %v1611_v22, 0.0  ;;  %v2057_v27 = vsel %vm1395_vm7, %v2038_v25, 0.0  ;;  %v2512_v25 = vld [vmem:[%s5738_s30 + $0x8] sm:$0xff] }
 0x221   : > { %1631 = vadd.xlane.f32.xlu0 %v1630_v23  ;;  %v2504_v23 = vld [vmem:[%s5733_s24 + $0x8] sm:$0xff] }
 0x225   : > { %2058 = vadd.xlane.f32.xlu0 %v2057_v27 }
 0x229   : > { %v1577_v30 = vpop.f32.mrb[12].mxu0  ;;  %v2010_v18 = vpop.f32.mrb[12].mxu1 }
 0x22a   : > { %v1578_v34 = vadd.f32 %v6471_v39, %v1577_v30  ;;  %v2011_v31 = vadd.f32 %v6474_v3, %v2010_v18  ;;  %v4804_v19 = vpop.f32.mrb[13].mxu0  ;;  %v4847_v33 = vpop.f32.mrb[13].mxu1  ;;  %v2503_v18 = vld [vmem:[%s5733_s24] sm:$0xff] }
 0x22c   : > { %v1597_v35 = vmax.f32 %v1578_v34, 0.0  ;;  %v2030_v37 = vmax.f32 %v2011_v31, 0.0  ;;  %v2511_v34 = vld [vmem:[%s5738_s30] sm:$0xff] }
 0x22e   : > { %v1612_v38 = vmul.f32 %v6479_v16, %v1597_v35  ;;  %v2039_v42 = vmul.f32 %v6479_v16, %v2030_v37 }
 0x230   : > { %v1633_v56 = vsel %vm1395_vm7, %v1612_v38, 0.0  ;;  %v2060_v43 = vsel %vm1395_vm7, %v2039_v42, 0.0 }
 0x231   : > { %1634 = vadd.xlane.f32.xlu1 %v1633_v56 }
 0x235   : > { %2061 = vadd.xlane.f32.xlu1 %v2060_v43 }
 0x239   : > { %v1582_v44 = vpop.f32.mrb[14].mxu0  ;;  %v2015_v45 = vpop.f32.mrb[14].mxu1 }
 0x23a   : > { %v1583_v48 = vadd.f32 %v6471_v39, %v1582_v44  ;;  %v2016_v49 = vadd.f32 %v6474_v3, %v2015_v45  ;;  %v4807_v50 = vpop.f32.mrb[15].mxu0  ;;  %v4850_v51 = vpop.f32.mrb[15].mxu1 }
 0x23c   : > { %v1598_v63 = vmax.f32 %v1583_v48, 0.0  ;;  %v2031_v53 = vmax.f32 %v2016_v49, 0.0 }
 0x23e   : > { %v1613_v40 = vmul.f32 %v6479_v16, %v1598_v63  ;;  %v2040_v55 = vmul.f32 %v6479_v16, %v2031_v53  ;;  %v2506_v53 = vld [vmem:[%s5733_s24 + $0x18] sm:$0x3f] }
 0x240   : > { %v1636_v41 = vsel %vm1395_vm7, %v1613_v40, 0.0  ;;  %v2063_v32 = vsel %vm1395_vm7, %v2040_v55, 0.0  ;;  %v2514_v40 = vld [vmem:[%s5738_s30 + $0x18] sm:$0x3f] }
 0x241   : > { %1637 = vadd.xlane.f32.xlu0 %v1636_v41 }
 0x245   : > { %2064 = vadd.xlane.f32.xlu0 %v2063_v32 }
 0x249   : > { %v1587_v36 = vpop.f32.mrb[16].mxu0  ;;  %v6527_v59 = vpop.f32.mrb[16].mxu1 }
 0x24a   : > { %v1588_v60 = vadd.f32 %v6471_v39, %v1587_v36  ;;  %v4810_v61 = vpop.f32.mrb[17].mxu0  ;;  %v4853_v62 = vpop.f32.mrb[17].mxu1  ;;  %v2505_v36 = vld [vmem:[%s5733_s24 + $0x10] sm:$0xff] }
 0x24c   : > { %v1599_v47 = vmax.f32 %v1588_v60, 0.0  ;;  %v2513_v60 = vld [vmem:[%s5738_s30 + $0x10] sm:$0xff] }
 0x24d   : > { %v4876_v0 = vpop.f32.mrb[18].mxu0  ;;  %v4902_v2 = vpop.f32.mrb[18].mxu1 }
 0x24e   : > { %v2276_v4 = vmul.f32 %v4876_v0, %v4876_v0  ;;  %v2280_v5 = vmul.f32 %v4902_v2, %v4902_v2  ;;  %v2159_v46 = vpop.f32.mrb[19].mxu0  ;;  %v2256_v28 = vpop.f32.mrb[19].mxu1  ;;  %v1614_v7 = vmul.f32 %v6479_v16, %v1599_v47 }
 0x24f   : > { %v2275_v9 = vmul.f32 %v2159_v46, %v2159_v46  ;;  %v2279_v8 = vmul.f32 %v2256_v28, %v2256_v28 }
 0x250   : > { %v2284_v57 = vadd.f32 %v2280_v5, %v2276_v4  ;;  %v1640_v10 = vsel %vm1639_vm15, %v1614_v7, 0.0 }
 0x251   : > { %v2283_v11 = vadd.f32 %v2279_v8, %v2275_v9  ;;  %v4905_v14 = vpop.f32.mrb[20].mxu1  ;;  %1641 = vadd.xlane.f32.xlu1 %v1640_v10  ;;  %v4879_v39 = vpop.f32.mrb[20].mxu0 }
 0x252   : > { %5520 = vrsqrt.f32 %v2284_v57  ;;  %v2282_v15 = vmul.f32 %v4905_v14, %v4905_v14  ;;  %v2278_v52 = vmul.f32 %v4879_v39, %v4879_v39  ;;  %v2169_v13 = vpop.f32.mrb[21].mxu0  ;;  %v2266_v26 = vpop.f32.mrb[21].mxu1  ;;  %vm2296_vm1 = vcmp.eq.f32.partialorder %v2284_v57, inf }
 0x253   : > { %5522 = vrsqrt.f32 %v2283_v11  ;;  %v2277_v58 = vmul.f32 %v2169_v13, %v2169_v13  ;;  %v2281_v24 = vmul.f32 %v2266_v26, %v2266_v26  ;;  %v2299_v21 = vand.u32 2147483648, %v2284_v57 }
 0x254   : > { %v6532_v6 = vadd.f32 %v2282_v15, %v2278_v52  ;;  %vm2298_vm4 = vcmp.eq.f32.partialorder %v2284_v57, 0.0  ;;  %vm2289_vm5 = vcmp.eq.f32.partialorder %v2283_v11, inf  ;;  %v2292_v30 = vand.u32 2147483648, %v2283_v11 }
 0x255   : > { %v6534_v29 = vadd.f32 %v2281_v24, %v2277_v58  ;;  %vm2291_vm9 = vcmp.eq.f32.partialorder %v2283_v11, 0.0 }
 0x256   : > { %5524 = vrsqrt.f32 %v6532_v6  ;;  %vm2310_vm3 = vcmp.eq.f32.partialorder %v6532_v6, inf  ;;  %vm2312_vm12 = vcmp.eq.f32.partialorder %v6532_v6, 0.0 }
 0x257   : > { %5526 = vrsqrt.f32 %v6534_v29  ;;  %vm2303_vm13 = vcmp.eq.f32.partialorder %v6534_v29, inf  ;;  %vm2305_vm14 = vcmp.eq.f32.partialorder %v6534_v29, 0.0 }
 0x25c   : > { %v5521_v54 = vpop.eup %5520 }
 0x25d   : > { %v5523_v17 = vpop.eup %5522  ;;  %v2295_v20 = vmul.f32 %v5521_v54, %v2284_v57 }
 0x25e   : > { %v2288_v22 = vmul.f32 %v5523_v17, %v2283_v11 }
 0x25f   : > { %v2297_v27 = vsel %vm2296_vm1, %v2284_v57, %v2295_v20  ;;  %v2544_v20 = vld [vmem:[%s5728_s19] sm:$0xff]  ;;  %vm3252_vm1 = vcmask 64512  }
 0x260   : > { %v2300_v31 = vsel %vm2298_vm4, %v2299_v21, %v2297_v27  ;;  %v2290_v19 = vsel %vm2289_vm5, %v2283_v11, %v2288_v22  ;;  %v2545_v21 = vld [vmem:[%s5728_s19 + $0x8] sm:$0xff]  ;;  %v2546_v22 = vld [vmem:[%s5728_s19 + $0x10] sm:$0xff] }
 0x261   : > { %v4928_v33 = vpop.f32.mrb[22].mxu0  ;;  %v4954_v35 = vpop.f32.mrb[22].mxu1  ;;  %v2316_v37 = vmul.f32 %v6479_v16, %v2300_v31  ;;  %v2293_v38 = vsel %vm2291_vm9, %v2292_v30, %v2290_v19  ;;  %v2549_v27 = vld [vmem:[%s5728_s19 + $0x28] sm:$0xff]  ;;  %v2550_v30 = vld [vmem:[%s5728_s19 + $0x30] sm:$0xff]  ;;  %v2535_v31 = vld [vmem:[%s7028_s14] sm:$0xff]  ;;  %vm3571_vm9 = vcmask 27648  }
 0x262   : > { %v2508_v56 = vmul.f32 %v4928_v33, %v2504_v23  ;;  %v2524_v42 = vmul.f32 %v4928_v33, %v2512_v25  ;;  %v2516_v43 = vmul.f32 %v4954_v35, %v2512_v25  ;;  %v2528_v44 = vmul.f32 %v4954_v35, %v2504_v23  ;;  %v2399_v45 = vpop.f32.mrb[23].mxu0  ;;  %v2484_v48 = vpop.f32.mrb[23].mxu1  ;;  %v2547_v23 = vld [vmem:[%s5728_s19 + $0x18] sm:$0xff]  ;;  %v2548_v25 = vld [vmem:[%s5728_s19 + $0x20] sm:$0xff]  ;;  %v2536_v19 = vld [vmem:[%s7028_s14 + $0x8] sm:$0xff] }
 0x263   : > { %v2507_v49 = vmul.f32 %v2503_v18, %v2399_v45  ;;  %v2523_v50 = vmul.f32 %v2511_v34, %v2399_v45  ;;  %v2515_v51 = vmul.f32 %v2511_v34, %v2484_v48  ;;  %v2527_v63 = vmul.f32 %v2503_v18, %v2484_v48  ;;  %v2551_v18 = vld [vmem:[%s5728_s19 + $0x38] sm:$0xff]  ;;  %v2552_v34 = vld [vmem:[%s5728_s19 + $0x40] sm:$0x3f]  ;;  %v2537_v33 = vld [vmem:[%s7028_s14 + $0x10] sm:$0xff]  ;;  %v6636_v45 = vpop.xlane.xlu0 %1616 }
 0x264   : > { %v2520_v41 = vsub.f32 %v2508_v56, %v2516_v43  ;;  %v2532_v55 = vadd.f32 %v2528_v44, %v2524_v42  ;;  %v2322_v32 = vsel %vm1395_vm7, %v2316_v37, 0.0  ;;  %v2315_v61 = vmul.f32 %v6479_v16, %v2293_v38  ;;  %v2538_v35 = vld [vmem:[%s7028_s14 + $0x18] sm:$0xff]  ;;  %v2539_v37 = vld [vmem:[%s7028_s14 + $0x20] sm:$0xff]  ;;  %v2540_v38 = vld [vmem:[%s7028_s14 + $0x28] sm:$0xff]  ;;  %v6634_v44 = vpop.xlane.xlu1 %2043 }
 0x265   : > { %v2519_v62 = vsub.f32 %v2507_v49, %v2515_v51  ;;  %v2531_v47 = vadd.f32 %v2527_v63, %v2523_v50  ;;  %v4957_v0 = vpop.f32.mrb[24].mxu1  ;;  %2323 = vadd.xlane.f32.xlu0 %v2322_v32  ;;  %v4931_v2 = vpop.f32.mrb[24].mxu0  ;;  %v2541_v56 = vld [vmem:[%s7028_s14 + $0x30] sm:$0xff]  ;;  %v2542_v42 = vld [vmem:[%s7028_s14 + $0x38] sm:$0xff]  ;;  %v2543_v43 = vld [vmem:[%s7028_s14 + $0x40] sm:$0x3f] }
 0x266   : > { %v2518_v4 = vmul.f32 %v4957_v0, %v2514_v40  ;;  %v2530_v5 = vmul.f32 %v4957_v0, %v2506_v53  ;;  %v2510_v46 = vmul.f32 %v4931_v2, %v2506_v53  ;;  %v2526_v28 = vmul.f32 %v4931_v2, %v2514_v40  ;;  %v2494_v7 = vpop.f32.mrb[25].mxu1  ;;  %v2409_v9 = vpop.f32.mrb[25].mxu0  ;;  %v2945_v0 = vld [vmem:[%s5753_s20 + $0x8] sm:$0xff] }
 0x267   : > { %v5288_v8 = vpack.c.bf16 %v2532_v55, %v2531_v47  ;;  %v5295_v57 = vpack.c.bf16 %v2520_v41, %v2519_v62  ;;  %v2517_v10 = vmul.f32 %v2513_v60, %v2494_v7  ;;  %v2529_v11 = vmul.f32 %v2505_v36, %v2494_v7 }
 0x268   : > { %v2522_v14 = vsub.f32 %v2510_v46, %v2518_v4  ;;  %v2534_v39 = vadd.f32 %v2530_v5, %v2526_v28  ;;  %v2319_v15 = vsel %vm1395_vm7, %v2315_v61, 0.0  ;;  %v2509_v52 = vmul.f32 %v2505_v36, %v2409_v9  ;;  %v2944_v4 = vld [vmem:[%s5753_s20] sm:$0xff] }
 0x269   : > { %2320 = vadd.xlane.f32.xlu1 %v2319_v15  ;;  %v2525_v13 = vmul.f32 %v2513_v60, %v2409_v9  ;;  %5289 = vmatpush3.bf16.msra.mxu0 %v5288_v8 }
 0x26a   : > { %v2521_v26 = vsub.f32 %v2509_v52, %v2517_v10  ;;  %5290 = vmatprep.subr.bf16.mxu0 %v5653_v1 }
 0x26b   : > { %v2533_v58 = vadd.f32 %v2529_v11, %v2525_v13 }
 0x26c   : > { %v5298_v24 = vpack.c.bf16 %v2522_v14, %v2521_v26 }
 0x26d   : > { %v5291_v17 = vpack.c.bf16 %v2534_v39, %v2533_v58 }
 0x26e   : > { %v6638_v48 = vpop.xlane.xlu1 %1619  ;;  %v6640_v49 = vpop.xlane.xlu0 %2046 }
 0x26f   : > { %5293 = vmatpush3.bf16.msk.msra.mxu0 %vm6551_vm10, %v5291_v17 }
 0x270   : > { %5294 = vmatprep.subr.bf16.mxu0 %v5653_v1 }
 0x272   : > { %4967 = vmatmul.mubr.msk.f32.vlgmr.msra.gmra.mrb[26].mxu0 %vm2553_vm11, %v2544_v20 }
 0x273   : > { %5296 = vmatpush3.bf16.msra.mxu0 %v5295_v57  ;;  %4969 = vmatprep.mubr.msk.f32.mxu0 %vm5659_vm6, %v5660_v12 }
 0x274   : > { %5297 = vmatprep.subr.bf16.mxu0 %v5653_v1 }
 0x276   : > { %4970 = vmatmul.mubr.msk.f32.gmra.mrb[28].mxu0 %vm2553_vm11, %v2545_v21  ;;  %v5525_v21 = vpop.eup %5524 }
 0x277   : > { %5300 = vmatpush3.bf16.msk.msra.mxu0 %vm6551_vm10, %v5298_v24  ;;  %4972 = vmatprep.mubr.msk.f32.mxu0 %vm5659_vm6, %v5660_v12 }
 0x278   : > { %5308 = vmatprep.subr.bf16.mxu0 %v5653_v1 }
 0x27a   : > { %4973 = vmatmul.mubr.msk.f32.gmra.mrb[30].mxu0 %vm2553_vm11, %v2546_v22 }
 0x27b   : > { %4975 = vmatprep.mubr.msk.f32.mxu0 %vm5659_vm6, %v5660_v12 }
 0x27e   : > { %4976 = vmatmul.mubr.msk.f32.gmra.mrb[32].mxu0 %vm2553_vm11, %v2547_v23  ;;  %v6642_v50 = vpop.xlane.xlu1 %1622 }
 0x27f   : > { %4978 = vmatprep.mubr.msk.f32.mxu0 %vm5659_vm6, %v5660_v12 }
 0x282   : > { %4979 = vmatmul.mubr.msk.f32.gmra.mrb[34].mxu0 %vm2553_vm11, %v2548_v25  ;;  %v6646_v63 = vpop.xlane.xlu1 %2049 }
 0x283   : > { %4981 = vmatprep.mubr.msk.f32.mxu0 %vm5659_vm6, %v5660_v12 }
 0x286   : > { %4982 = vmatmul.mubr.msk.f32.gmra.mrb[36].mxu0 %vm2553_vm11, %v2549_v27 }
 0x287   : > { %4984 = vmatprep.mubr.msk.f32.mxu0 %vm5659_vm6, %v5660_v12 }
 0x28a   : > { %4985 = vmatmul.mubr.msk.f32.gmra.mrb[38].mxu0 %vm2553_vm11, %v2550_v30  ;;  %v2309_v30 = vmul.f32 %v5525_v21, %v6532_v6 }
 0x28b   : > { %4987 = vmatprep.mubr.msk.f32.mxu0 %vm5659_vm6, %v5660_v12 }
 0x28e   : > { %4988 = vmatmul.mubr.msk.f32.gmra.mrb[40].mxu0 %vm2553_vm11, %v2551_v18  ;;  %v6644_v51 = vpop.xlane.xlu0 %1625  ;;  %v5527_v18 = vpop.eup %5526 }
 0x28f   : > { %4990 = vmatprep.mubr.msk.f32.mxu0 %vm5659_vm6, %v5660_v12 }
 0x292   : > { %4991 = vmatmul.mubr.msk.f32.gmra.mrb[42].mxu0 %vm2553_vm11, %v2552_v34  ;;  %v6648_v53 = vpop.xlane.xlu0 %2052 }
 0x293   : > { %5001 = vmatprep.mubr.msk.f32.mxu0 %vm5659_vm6, %v5660_v12 }
 0x296   : > { %5002 = vmatmul.mubr.msk.f32.vlgmr.msra.gmra.mrb[26].mxu0 %vm2553_vm11, %v2535_v31 }
 0x297   : > { %5004 = vmatprep.mubr.msk.f32.mxu0 %vm5659_vm6, %v5660_v12 }
 0x29a   : > { %5005 = vmatmul.mubr.msk.f32.gmra.mrb[28].mxu0 %vm2553_vm11, %v2536_v19  ;;  %v2313_v19 = vand.u32 2147483648, %v6532_v6 }
 0x29b   : > { %5007 = vmatprep.mubr.msk.f32.mxu0 %vm5659_vm6, %v5660_v12 }
 0x29e   : > { %5008 = vmatmul.mubr.msk.f32.gmra.mrb[30].mxu0 %vm2553_vm11, %v2537_v33  ;;  %v6650_v40 = vpop.xlane.xlu1 %1628 }
 0x29f   : > { %5010 = vmatprep.mubr.msk.f32.mxu0 %vm5659_vm6, %v5660_v12 }
 0x2a2   : > { %5011 = vmatmul.mubr.msk.f32.gmra.mrb[32].mxu0 %vm2553_vm11, %v2538_v35  ;;  %v6654_v55 = vpop.xlane.xlu1 %2055 }
 0x2a3   : > { %5013 = vmatprep.mubr.msk.f32.mxu0 %vm5659_vm6, %v5660_v12 }
 0x2a6   : > { %5014 = vmatmul.mubr.msk.f32.gmra.mrb[34].mxu0 %vm2553_vm11, %v2539_v37  ;;  %v2311_v37 = vsel %vm2310_vm3, %v6532_v6, %v2309_v30  ;;  %v2917_v30 = vld [vmem:[%s7048_s27 + $0x8] sm:$0xff] }
 0x2a7   : > { %5016 = vmatprep.mubr.msk.f32.mxu0 %vm5659_vm6, %v5660_v12 }
 0x2aa   : > { %5017 = vmatmul.mubr.msk.f32.gmra.mrb[36].mxu0 %vm2553_vm11, %v2540_v38  ;;  %v2302_v38 = vmul.f32 %v5527_v18, %v6534_v29 }
 0x2ab   : > { %5019 = vmatprep.mubr.msk.f32.mxu0 %vm5659_vm6, %v5660_v12 }
 0x2ae   : > { %5020 = vmatmul.mubr.msk.f32.gmra.mrb[38].mxu0 %vm2553_vm11, %v2541_v56  ;;  %v6652_v41 = vpop.xlane.xlu0 %1631  ;;  %v2021_v56 = vadd.f32 %v6474_v3, %v6527_v59 }
 0x2af   : > { %5022 = vmatprep.mubr.msk.f32.mxu0 %vm5659_vm6, %v5660_v12 }
 0x2b2   : > { %5023 = vmatmul.mubr.msk.f32.gmra.mrb[40].mxu0 %vm2553_vm11, %v2542_v42  ;;  %v6656_v32 = vpop.xlane.xlu0 %2058 }
 0x2b3   : > { %5025 = vmatprep.mubr.msk.f32.mxu0 %vm5659_vm6, %v5660_v12 }
 0x2b6   : > { %5026 = vmatmul.mubr.msk.f32.gmra.mrb[42].mxu0 %vm2553_vm11, %v2543_v43 }
 0x2b7   : > { %5057 = vmatprep.mubr.msk.f32.mxu0 %vm5659_vm6, %v5660_v12 }
 0x2be   : > { %v6658_v36 = vpop.xlane.xlu1 %1634 }
 0x2c2   : > { %v6662_v61 = vpop.xlane.xlu1 %2061 }
 0x2ce   : > { %v6660_v60 = vpop.xlane.xlu0 %1637 }
 0x2d2   : > { %v6664_v62 = vpop.xlane.xlu0 %2064 }
 0x2de   : > { %v6666_v47 = vpop.xlane.xlu1 %1641 }
 0x2f2   : > { %v2324_v2 = vpop.xlane.xlu0 %2323 }
 0x2f3   : > { %v2949_v5 = vmul.f32 %v2945_v0, %v2324_v2  ;;  %v2314_v0 = vsel %vm2312_vm12, %v2313_v19, %v2311_v37  ;;  %v2926_v37 = vmul.f32 %v2917_v30, %v6640_v49 }
 0x2f4   : > { %v2318_v3 = vmul.f32 %v6479_v16, %v2314_v0  ;;  %v2874_v0 = vld [vmem:[%s7046_s5 + $0x18] sm:$0xff] }
 0x2f5   : > { %v2883_v49 = vmul.f32 %v2874_v0, %v6644_v51  ;;  %v2876_v51 = vld [vmem:[%s7046_s5 + $0x28] sm:$0xff]  ;;  %v2897_v0 = vld [vmem:[%s7047_s9 + $0x40] sm:$0x3f] }
 0x2f6   : > { %v2321_v46 = vpop.xlane.xlu1 %2320 }
 0x2f7   : > { %v2948_v28 = vmul.f32 %v2944_v4, %v2321_v46  ;;  %v2306_v46 = vand.u32 2147483648, %v6534_v29 }
 0x2f9   : > { %v5302_v7 = vpack.c.bf16 %v2949_v5, %v2948_v28  ;;  %v2304_v5 = vsel %vm2303_vm13, %v6534_v29, %v2302_v38  ;;  %v2032_v28 = vmax.f32 %v2021_v56, 0.0  ;;  %v2918_v38 = vld [vmem:[%s7048_s27 + $0x10] sm:$0xff] }
 0x2fa   : > { %v2307_v6 = vsel %vm2305_vm14, %v2306_v46, %v2304_v5  ;;  %v2919_v46 = vld [vmem:[%s7048_s27 + $0x18] sm:$0xff] }
 0x2fb   : > { %5303 = vmatpush3.bf16.msra.mxu1 %v5302_v7 }
 0x2fc   : > { %5304 = vmatprep.subr.bf16.mxu1 %v5653_v1 }
 0x369   : > { %v2790_v9 = vpop.f32.mrb[26].mxu0 }
 0x36a   : > { %v2834_v8 = vmul.f32 %v6479_v16, %v2790_v9  ;;  %v5003_v57 = vpop.f32.mrb[27].mxu0 }
 0x36b   : > { %v2041_v57 = vmul.f32 %v6479_v16, %v2032_v28 }
 0x36c   : > { %v2843_v10 = vsel %vm1395_vm7, %v2834_v8, 0.0 }
 0x36d   : > { %2844 = vadd.xlane.f32.xlu0 %v2843_v10  ;;  %v2795_v11 = vpop.f32.mrb[28].mxu0  ;;  %v2328_v10 = vsel %vm1639_vm15, %v2318_v3, 0.0 }
 0x36e   : > { %v2835_v14 = vmul.f32 %v6479_v16, %v2795_v11  ;;  %v5006_v39 = vpop.f32.mrb[29].mxu0 }
 0x370   : > { %v2846_v15 = vsel %vm1395_vm7, %v2835_v14, 0.0  ;;  %v2317_v14 = vmul.f32 %v6479_v16, %v2307_v6  ;;  %v2928_v6 = vmul.f32 %v2919_v46, %v6648_v53  ;;  %v2885_v53 = vmul.f32 %v2876_v51, %v6652_v41  ;;  %v2878_v41 = vld [vmem:[%s7046_s5 + $0x38] sm:$0xff] }
 0x371   : > { %2847 = vadd.xlane.f32.xlu0 %v2846_v15  ;;  %v2800_v52 = vpop.f32.mrb[30].mxu0 }
 0x372   : > { %v2836_v13 = vmul.f32 %v6479_v16, %v2800_v52  ;;  %v5009_v26 = vpop.f32.mrb[31].mxu0  ;;  %v2066_v52 = vsel %vm1639_vm15, %v2041_v57, 0.0 }
 0x374   : > { %v2849_v58 = vsel %vm1395_vm7, %v2836_v13, 0.0  ;;  %v2325_v13 = vsel %vm1395_vm7, %v2317_v14, 0.0  ;;  %v2894_v14 = vld [vmem:[%s7047_s9 + $0x28] sm:$0xff] }
 0x375   : > { %2850 = vadd.xlane.f32.xlu1 %v2849_v58  ;;  %v2805_v24 = vpop.f32.mrb[32].mxu0  ;;  %v2871_v58 = vld [vmem:[%s7046_s5] sm:$0xff] }
 0x376   : > { %v2837_v17 = vmul.f32 %v6479_v16, %v2805_v24  ;;  %v5012_v20 = vpop.f32.mrb[33].mxu0  ;;  %v2889_v24 = vld [vmem:[%s7047_s9] sm:$0xff]  ;;  %v2880_v21 = vmul.f32 %v2871_v58, %v6636_v45 }
 0x378   : > { %v2852_v22 = vsel %vm1395_vm7, %v2837_v17, 0.0  ;;  %v2916_v17 = vld [vmem:[%s7048_s27] sm:$0xff] }
 0x379   : > { %2853 = vadd.xlane.f32.xlu0 %v2852_v22  ;;  %v2810_v23 = vpop.f32.mrb[34].mxu0  ;;  %v2872_v22 = vld [vmem:[%s7046_s5 + $0x8] sm:$0xff] }
 0x37a   : > { %v2838_v25 = vmul.f32 %v6479_v16, %v2810_v23  ;;  %v5015_v27 = vpop.f32.mrb[35].mxu0  ;;  %v2890_v23 = vld [vmem:[%s7047_s9 + $0x8] sm:$0xff] }
 0x37c   : > { %v2855_v34 = vsel %vm1395_vm7, %v2838_v25, 0.0  ;;  %v2925_v25 = vmul.f32 %v2916_v17, %v6634_v44 }
 0x37d   : > { %2856 = vadd.xlane.f32.xlu1 %v2855_v34  ;;  %v2815_v31 = vpop.f32.mrb[36].mxu0  ;;  %v2881_v34 = vmul.f32 %v2872_v22, %v6638_v48  ;;  %v2927_v48 = vmul.f32 %v2918_v38, %v6646_v63  ;;  %v2920_v63 = vld [vmem:[%s7048_s27 + $0x20] sm:$0xff] }
 0x37e   : > { %v2839_v33 = vmul.f32 %v6479_v16, %v2815_v31  ;;  %v5018_v35 = vpop.f32.mrb[37].mxu0 }
 0x37f   : > { %v2891_v35 = vld [vmem:[%s7047_s9 + $0x10] sm:$0xff] }
 0x380   : > { %v2858_v42 = vsel %vm1395_vm7, %v2839_v33, 0.0  ;;  %v2873_v33 = vld [vmem:[%s7046_s5 + $0x10] sm:$0xff] }
 0x381   : > { %2859 = vadd.xlane.f32.xlu0 %v2858_v42  ;;  %v2820_v43 = vpop.f32.mrb[38].mxu0  ;;  %v2882_v44 = vmul.f32 %v2873_v33, %v6642_v50  ;;  %v2875_v50 = vld [vmem:[%s7046_s5 + $0x20] sm:$0xff] }
 0x382   : > { %v2840_v2 = vmul.f32 %v6479_v16, %v2820_v43  ;;  %v5021_v4 = vpop.f32.mrb[39].mxu0  ;;  %v2884_v57 = vmul.f32 %v2875_v50, %v6650_v40  ;;  %v2877_v40 = vld [vmem:[%s7046_s5 + $0x30] sm:$0xff]  ;;  %v2870_v50 = vld [vmem:[%s7050_s22] sm:$0x1f] }
 0x384   : > { %v2861_v7 = vsel %vm1395_vm7, %v2840_v2, 0.0  ;;  %v2892_v2 = vld [vmem:[%s7047_s9 + $0x18] sm:$0xff] }
 0x385   : > { %2862 = vadd.xlane.f32.xlu1 %v2861_v7  ;;  %v2825_v59 = vpop.f32.mrb[40].mxu0 }
 0x386   : > { %v2841_v9 = vmul.f32 %v6479_v16, %v2825_v59  ;;  %v5024_v8 = vpop.f32.mrb[41].mxu0  ;;  %v2893_v59 = vld [vmem:[%s7047_s9 + $0x20] sm:$0xff] }
 0x388   : > { %v2864_v11 = vsel %vm1395_vm7, %v2841_v9, 0.0  ;;  %vm3028_vm7 = vcmask 572416  }
 0x389   : > { %2329 = vadd.xlane.f32.xlu1 %v2328_v10  ;;  %2865 = vadd.xlane.f32.xlu0 %v2864_v11  ;;  %v2830_v29 = vpop.f32.mrb[42].mxu0 }
 0x38a   : > { %v5027_v39 = vpop.f32.mrb[43].mxu0  ;;  %v2842_v15 = vmul.f32 %v6479_v16, %v2830_v29  ;;  %v2929_v29 = vmul.f32 %v2920_v63, %v6654_v55  ;;  %v2922_v55 = vld [vmem:[%s7048_s27 + $0x30] sm:$0xff] }
 0x38c   : > { %v2867_v26 = vsel %vm1639_vm15, %v2842_v15, 0.0  ;;  %vm3113_vm15 = vcmask 258048  }
 0x38d   : > { %2067 = vadd.xlane.f32.xlu1 %v2066_v52  ;;  %2326 = vadd.xlane.f32.xlu0 %v2325_v13  ;;  %v2921_v52 = vld [vmem:[%s7048_s27 + $0x28] sm:$0xff] }
 0x38e   : > { %v2930_v17 = vmul.f32 %v2921_v52, %v6656_v32  ;;  %v2887_v32 = vmul.f32 %v2878_v41, %v6660_v60 }
 0x391   : > { %2868 = vadd.xlane.f32.xlu0 %v2867_v26 }
 0x3fa   : > { %v2845_v20 = vpop.xlane.xlu0 %2844 }
 0x3fb   : > { %v2898_v16 = vmul.f32 %v2889_v24, %v2845_v20  ;;  %v2895_v24 = vld [vmem:[%s7047_s9 + $0x30] sm:$0xff] }
 0x3fd   : > { %v2907_v27 = vadd.f32 %v2898_v16, %v2880_v21  ;;  %v2886_v16 = vmul.f32 %v2877_v40, %v6658_v36  ;;  %v2947_v36 = vld [vmem:[%s5753_s20 + $0x18] sm:$0x3f] }
 0x3fe   : > { %v2848_v18 = vpop.xlane.xlu0 %2847 }
 0x3ff   : > { %v2934_v31 = vadd.f32 %v2925_v25, %v2907_v27  ;;  %v2899_v19 = vmul.f32 %v2890_v23, %v2848_v18  ;;  %v2896_v25 = vld [vmem:[%s7047_s9 + $0x38] sm:$0xff]  ;;  %v2931_v27 = vmul.f32 %v2922_v55, %v6662_v61  ;;  %s7055_s9 = sld [smem:[#allocation22_spill]] }
 0x401   : > { %v2908_v45 = vadd.f32 %v2899_v19, %v2881_v34  ;;  %v2923_v34 = vld [vmem:[%s7048_s27 + $0x38] sm:$0xff] }
 0x402   : > { %v2851_v56 = vpop.xlane.xlu1 %2850 }
 0x403   : > { %v2935_v42 = vadd.f32 %v2926_v37, %v2908_v45  ;;  %v2900_v43 = vmul.f32 %v2891_v35, %v2851_v56  ;;  %v2946_v37 = vld [vmem:[%s5753_s20 + $0x10] sm:$0xff]  ;;  %v2932_v45 = vmul.f32 %v2923_v34, %v6664_v62  ;;  %v2943_v62 = vld [vmem:[%s7049_s18] sm:$0x1f]  ;;  %s7052_s18 = sld [smem:[#allocation21_spill]]  ;;  %v3153_v34 = vlaneseq }
 0x405   : > { %v5309_v4 = vpack.c.bf16 %v2935_v42, %v2934_v31  ;;  %v2909_v5 = vadd.f32 %v2900_v43, %v2882_v44  ;;  %v2879_v43 = vld [vmem:[%s7046_s5 + $0x40] sm:$0x3f] }
 0x406   : > { %v2854_v28 = vpop.xlane.xlu0 %2853  ;;  %v2888_v46 = vmul.f32 %v2879_v43, %v6666_v47 }
 0x407   : > { %v2936_v7 = vadd.f32 %v2927_v48, %v2909_v5  ;;  %v2901_v3 = vmul.f32 %v2892_v2, %v2854_v28  ;;  %5310 = vmatpush3.bf16.msra.mxu0 %v5309_v4  ;;  %v2924_v48 = vld [vmem:[%s7048_s27 + $0x40] sm:$0x3f] }
 0x408   : > { %5311 = vmatprep.subr.bf16.mxu0 %v5653_v1 }
 0x409   : > { %v2910_v9 = vadd.f32 %v2901_v3, %v2883_v49 }
 0x40a   : > { %v2857_v8 = vpop.xlane.xlu1 %2856 }
 0x40b   : > { %v2937_v10 = vadd.f32 %v2928_v6, %v2910_v9  ;;  %v2902_v11 = vmul.f32 %v2893_v59, %v2857_v8  ;;  %v4554_v6 = vld [vmem:[%s7051_s3] ss:$0 sm:$0xff]  ;;  %s7053_s3 = sld [smem:[#allocation19_spill]] }
 0x40d   : > { %v5312_v39 = vpack.c.bf16 %v2937_v10, %v2936_v7  ;;  %v2911_v15 = vadd.f32 %v2902_v11, %v2884_v57 }
 0x40e   : > { %v2860_v13 = vpop.xlane.xlu0 %2859 }
 0x40f   : > { %v2938_v26 = vadd.f32 %v2929_v29, %v2911_v15  ;;  %v2903_v58 = vmul.f32 %v2894_v14, %v2860_v13  ;;  %5313 = vmatpush3.bf16.msra.mxu0 %v5312_v39 }
 0x410   : > { %5314 = vmatprep.subr.bf16.mxu0 %v5653_v1 }
 0x411   : > { %v2912_v20 = vadd.f32 %v2903_v58, %v2885_v53 }
 0x412   : > { %v2863_v21 = vpop.xlane.xlu1 %2862 }
 0x413   : > { %v2939_v22 = vadd.f32 %v2930_v17, %v2912_v20  ;;  %v2904_v23 = vmul.f32 %v2895_v24, %v2863_v21  ;;  %v3158_v17 = vld [vmem:[%s7052_s18] sm:$0xff]  ;;  %v3159_v20 = vld [vmem:[%s7052_s18 + $0x8] sm:$0xff] }
 0x414   : > { %v5321_v21 = vpack.c.bf16 %v3159_v20, %v3158_v17 }
 0x415   : > { %v5315_v30 = vpack.c.bf16 %v2939_v22, %v2938_v26  ;;  %v2913_v18 = vadd.f32 %v2904_v23, %v2886_v16  ;;  %v3160_v22 = vld [vmem:[%s7052_s18 + $0x10] sm:$0xff]  ;;  %v3161_v23 = vld [vmem:[%s7052_s18 + $0x18] sm:$0xff] }
 0x416   : > { %v2866_v31 = vpop.xlane.xlu0 %2865  ;;  %v2330_v35 = vpop.xlane.xlu1 %2329 }
 0x417   : > { %v2940_v19 = vadd.f32 %v2931_v27, %v2913_v18  ;;  %v2905_v33 = vmul.f32 %v2896_v25, %v2866_v31  ;;  %5316 = vmatpush3.bf16.msra.mxu0 %v5315_v30  ;;  %v2951_v56 = vmul.f32 %v2947_v36, %v2330_v35  ;;  %v5324_v25 = vpack.c.bf16 %v3161_v23, %v3160_v22 }
 0x418   : > { %5317 = vmatprep.subr.bf16.mxu0 %v5653_v1  ;;  %v6780_v31 = vshrl.u32 %v3153_v34, 7 }
 0x419   : > { %v2914_v61 = vadd.f32 %v2905_v33, %v2887_v32 }
 0x41a   : > { %v2327_v38 = vpop.xlane.xlu0 %2326  ;;  %v2068_v4 = vpop.xlane.xlu1 %2067 }
 0x41b   : > { %v2941_v44 = vadd.f32 %v2932_v45, %v2914_v61  ;;  %v2950_v42 = vmul.f32 %v2946_v37, %v2327_v38  ;;  %v2933_v49 = vmul.f32 %v2924_v48, %v2068_v4  ;;  %v3155_v37 = vsub.s32 4, %v6780_v31 }
 0x41c   : > { %v5665_v4 = vmov 0  }
 0x41d   : > { %v5318_v60 = vpack.c.bf16 %v2941_v44, %v2940_v19  ;;  %v5305_v2 = vpack.c.bf16 %v2951_v56, %v2950_v42  ;;  %v3149_v19 = vld [vmem:[%s7053_s3] sm:$0x1f]  ;;  %s5664_s3 = smov 96   ;;  %5479 = vset.pattern.permute.xlu0 %v5665_v4 }
 0x41e   : > { %v2869_v5 = vpop.xlane.xlu0 %2868  ;;  %v4555_v56 = vld [vmem:[%s7055_s9] ss:$0 sm:$0xff]  ;;  %s7056_s9 = sld [smem:[#allocation8_spill]] }
 0x41f   : > { %v2906_v28 = vmul.f32 %v2897_v0, %v2869_v5  ;;  %5307 = vmatpush3.bf16.msk.msra.mxu1 %vm6551_vm10, %v5305_v2  ;;  %5319 = vmatpush3.bf16.msra.mxu0 %v5318_v60  ;;  %vm3618_vm10 = vcmask 31744  }
 0x420   : > { %5055 = vmatprep.subr.mxu0 %v5660_v12  ;;  %5320 = vmatprep.subr.bf16.mxu1 %v5653_v1 }
 0x421   : > { %v2915_v7 = vadd.f32 %v2906_v28, %v2888_v46 }
 0x422   : > { %5037 = vmatmul.mubr.msk.f32.vlgmr.msra.gmra.mrb[26].mxu1 %vm2553_vm11, %v2943_v62  ;;  %vm4028_vm11 = vcmask 257024  }
 0x423   : > { %v2942_v3 = vadd.f32 %v2933_v49, %v2915_v7  ;;  %5068 = vmatprep.mubr.msk.f32.mxu1 %vm5659_vm6, %v5660_v12  ;;  %5322 = vmatpush3.bf16.msra.mxu1 %v5321_v21  ;;  %v3564_v49 = vsub.s32 0, %v6780_v31 }
 0x424   : > { %5323 = vmatprep.subr.bf16.mxu1 %v5653_v1 }
 0x425   : > { %5056 = vmatpush3.msk.msra.mxu0 %vm1255_vm0, %v2942_v3  ;;  %vm3169_vm0 = vcmask 261120  }
 0x426   : > { %5058 = vmatmul.mubr.msk.f32.vlgmr.msra.gmra.mrb[44].mxu0 %vm3028_vm7, %v2870_v50  ;;  %5332 = vmatprep.subr.bf16.mxu0 %v5653_v1 }
 0x427   : > { %5130 = vmatprep.mubr.msk.f32.mxu0 %vm5659_vm6, %v5660_v12  ;;  %5325 = vmatpush3.bf16.msra.mxu1 %v5324_v25 }
 0x428   : > { %5071 = vmatprep.subr.mxu1 %v5660_v12 }
 0x4f5   : > { %v3024_v54 = vpop.f32.mrb[26].mxu1 }
 0x4f6   : > { %v5038_v47 = vpop.f32.mrb[27].mxu1 }
 0x4f9   : > { %v3101_v59 = vpop.f32.mrb[44].mxu0 }
 0x4fa   : > { %v3102_v9 = vadd.f32 %v3101_v59, %v3024_v54  ;;  %v5059_v63 = vpop.f32.mrb[45].mxu0 }
 0x4fc   : > { %v3112_v8 = vadd.f32 %v4554_v6, %v3102_v9 }
 0x4fe   : > { %v3114_v57 = vsel %vm3113_vm15, %v3112_v8, 0.0 }
 0x4ff   : > { %3115 = vadd.xlane.f32.xlu0 %v3114_v57 }
 0x58c   : > { %v3116_v10 = vpop.xlane.xlu0 %3115 }
 0x58d   : > { %v3117_v11 = vrot.slane %v3116_v10, 4 }
 0x58f   : > { %v3118_v51 = vadd.f32 %v3117_v11, %v3116_v10 }
 0x591   : > { %v3119_v14 = vrot.slane %v3118_v51, 2 }
 0x593   : > { %v3120_v29 = vadd.f32 %v3119_v14, %v3118_v51 }
 0x595   : > { %v3121_v39 = vrot.slane %v3120_v29, 1 }
 0x597   : > { %v3122_v15 = vadd.f32 %v3121_v39, %v3120_v29 }
 0x599   : > { %5381 = vpush %v3122_v15 }
 0x5ca   : > { %s5382_s22 = spop %5381 }
 0x5cb   : > { %s3126_s5 = smul.f32 0.00625, %s5382_s22 }
 0x5cd   : > { %v3127_v52 = vstv %s3126_s5  ;;  %s7054_s5 = sld [smem:[#allocation20_spill]] }
 0x5ce   : > { %v3128_v13 = vsub.f32 %v3112_v8, %v3127_v52 }
 0x5d0   : > { %v3129_v53 = vmul.f32 %v3128_v13, %v3128_v13 }
 0x5d2   : > { %v3130_v26 = vsel %vm3113_vm15, %v3129_v53, 0.0 }
 0x5d3   : > { %3131 = vadd.xlane.f32.xlu1 %v3130_v26  ;;  %v3151_v36 = vld [vmem:[%s7054_s5] sm:$0x1f]  ;;  %s1159_s5 = scalar_lea.vmem %s7056_s9, %s5913_s28  ;;  %s5666_s28 = smov 64  }
 0x5d4   : > { %v3559_v62 = vld [vmem:[%s1159_s5] sm:$0x1]  ;;  %s7061_s9 = sld [smem:[#allocation25_spill]]  ;;  %s7062_s5 = sld [smem:[#allocation26_spill]] }
 0x5d5   : > { %vm3560_vm4 = vcmp.gt.f32.partialorder %v3559_v62, 0.5 }
 0x5d6   : > { %v3561_v7 = vsel %vm3560_vm4, 1, %v5665_v4 }
 0x5d7   : > { %v3565_v3 = vrot.slane %v3561_v7, %v3564_v49 }
 0x5d9   : > { %vm3566_vm5 = vcmp.eq.s32.totalorder %v3565_v3, 1 }
 0x660   : > { %v3132_v58 = vpop.xlane.xlu1 %3131 }
 0x661   : > { %v3133_v40 = vrot.slane %v3132_v58, 4 }
 0x663   : > { %v3134_v24 = vadd.f32 %v3133_v40, %v3132_v58 }
 0x665   : > { %v3135_v55 = vrot.slane %v3134_v24, 2 }
 0x667   : > { %v3136_v16 = vadd.f32 %v3135_v55, %v3134_v24 }
 0x669   : > { %v3137_v41 = vrot.slane %v3136_v16, 1 }
 0x66b   : > { %v3138_v27 = vadd.f32 %v3137_v41, %v3136_v16 }
 0x66d   : > { %5383 = vpush %v3138_v27 }
 0x69e   : > { %s5384_s22 = spop %5383 }
 0x69f   : > { %s3142_s6 = smul.f32 0.00625, %s5384_s22  ;;  %s7057_s22 = sld [smem:[#allocation23_spill]] }
 0x6a1   : > { %s3143_s8 = sadd.f32 1e-05, %s3142_s6  ;;  %s5663_s6 = smov 104  }
 0x6a3   : > { %v3144_v30 = vstv %s3143_s8  ;;  %s5661_s8 = smov 112  }
 0x6a4   : > { %5528 = vrsqrt.f32 %v3144_v30 }
 0x6a5   : > { %v3941_v3 = vld [vmem:[%s7057_s22] sm:$0xff] }
 0x6ae   : > { %v5529_v18 = vpop.eup %5528 }
 0x6af   : > { %5385 = vpush %v5529_v18 }
 0x6e0   : > { %s5386_s14 = spop %5385 }
 0x6e1   : > { %v3147_v32 = vstv %s5386_s14  ;;  %s5662_s14 = smov 120  }
 0x6e2   : > { %v3148_v33 = vmul.f32 %v3147_v32, %v3128_v13 }
 0x6e4   : > { %v3150_v35 = vmul.f32 %v3149_v19, %v3148_v33 }
 0x6e6   : > { %v3152_v45 = vadd.f32 %v3151_v36, %v3150_v35 }
 0x6e8   : > { %v3156_v61 = vrot.slane %v3152_v45, %v3155_v37 }
 0x6ea   : > { %v6785_v38 = vadd.f32 %v3156_v61, %v3152_v45 }
 0x6ec   : > { %5069 = vmatmul.mubr.msk.f32.vlgmr.msra.gmra.mrb[28].mxu1 %vm3169_vm0, %v6785_v38 }
 0x6ed   : > { %5073 = vmatprep.mubr.msk.f32.mxu1 %vm5659_vm6, %v5660_v12 }
 0x7bf   : > { %v3239_v44 = vpop.f32.mrb[28].mxu1 }
 0x7c0   : > { %v6792_v42 = vadd.f32 %v4555_v56, %v3239_v44  ;;  %v5070_v43 = vpop.f32.mrb[29].mxu1 }
 0x7c2   : > { %3246 = vrot.lane.b32.xlu1 %v6792_v42, %s5661_s8  ;;  %3244 = vrot.lane.b32.xlu0 %v6792_v42, %s5662_s14  ;;  %s5667_s8 = smov 8   ;;  %s7058_s14 = sld [smem:[#allocation24_spill]] }
 0x7c6   : > { %3248 = vrot.lane.b32.xlu1 %v6792_v42, %s5663_s6  ;;  %3250 = vrot.lane.b32.xlu0 %v6792_v42, %s5664_s3  ;;  %s5668_s6 = smov 16  }
 0x834   : > { %v6798_v0 = vpop.permute.xlu1 %3246  ;;  %v6800_v60 = vpop.permute.xlu0 %3244 }
 0x835   : > { %3403 = vrot.lane.b32.xlu0 %v6798_v0, %s5664_s3  ;;  %3327 = vrot.lane.b32.xlu1 %v6800_v60, %s5664_s3 }
 0x838   : > { %v6804_v2 = vpop.permute.xlu1 %3248  ;;  %v3251_v48 = vpop.permute.xlu0 %3250 }
 0x839   : > { %3479 = vrot.lane.b32.xlu1 %v6804_v2, %s5664_s3  ;;  %5072 = vmatpush3.xpose.msk.msra.mxu1 %vm3252_vm1, %v3251_v48  ;;  %s7059_s3 = sld [smem:[#allocation27_spill]] }
 0x83a   : > { %5076 = vmatprep.subr.mxu1 %v5660_v12 }
 0x83c   : > { %5074 = vmatmul.mubr.msk.f32.vlgmr.msra.gmra.mrb[30].mxu1 %vm3252_vm1, %v6792_v42 }
 0x83d   : > { %5078 = vmatprep.mubr.msk.f32.mxu1 %vm5659_vm6, %v5660_v12 }
 0x8a7   : > { %v3328_v5 = vpop.permute.xlu1 %3327  ;;  %v3404_v46 = vpop.permute.xlu0 %3403 }
 0x8a8   : > { %5077 = vmatpush3.xpose.msk.msra.mxu1 %vm3252_vm1, %v3328_v5 }
 0x8a9   : > { %5081 = vmatprep.subr.mxu1 %v5660_v12 }
 0x8ab   : > { %5079 = vmatmul.mubr.msk.f32.vlgmr.msra.gmra.mrb[32].mxu1 %vm3252_vm1, %v6800_v60  ;;  %v3480_v28 = vpop.permute.xlu1 %3479 }
 0x8ac   : > { %5082 = vmatpush3.xpose.msk.msra.mxu1 %vm3252_vm1, %v3404_v46  ;;  %5083 = vmatprep.mubr.msk.f32.mxu1 %vm5659_vm6, %v5660_v12 }
 0x8ad   : > { %5086 = vmatprep.subr.mxu1 %v5660_v12 }
 0x8af   : > { %5084 = vmatmul.mubr.msk.f32.vlgmr.msra.gmra.mrb[34].mxu1 %vm3252_vm1, %v6798_v0 }
 0x8b0   : > { %5087 = vmatpush3.xpose.msk.msra.mxu1 %vm3252_vm1, %v3480_v28  ;;  %5088 = vmatprep.mubr.msk.f32.mxu1 %vm5659_vm6, %v5660_v12 }
 0x8b1   : > { %5091 = vmatprep.subr.mxu1 %v5660_v12 }
 0x8b3   : > { %5089 = vmatmul.mubr.msk.f32.vlgmr.msra.gmra.mrb[36].mxu1 %vm3252_vm1, %v6804_v2 }
 0x8b4   : > { %5093 = vmatprep.mubr.msk.f32.mxu1 %vm5659_vm6, %v5660_v12 }
 0x90f   : > { %v3323_v50 = vpop.f32.mrb[30].mxu1 }
 0x910   : > { %v3555_v54 = vmul.f32 0.35355338, %v3323_v50  ;;  %v5075_v47 = vpop.f32.mrb[31].mxu1  ;;  %v3942_v50 = vld [vmem:[%s7057_s22 + $0x8] sm:$0xff] }
 0x911   : > { %v3943_v47 = vld [vmem:[%s7057_s22 + $0x10] sm:$0xff] }
 0x912   : > { %v3567_v59 = vsel %vm3566_vm5, -1e+09, %v3555_v54  ;;  %v5327_v54 = vpack.c.bf16 %v3942_v50, %v3941_v3  ;;  %v4575_v3 = vld [vmem:[%s7061_s9] ss:$0 sm:$0xff]  ;;  %s4584_s9 = sshll.u32 %s5884_s0, 4  ;;  %s5669_s0 = smov [#allocation3]  }
 0x913   : > { %v3572_v6 = vsel %vm3571_vm9, %v3567_v59, -inf }
 0x914   : > { %3573 = vmax.xlane.f32.xlu0 %v3572_v6 }
 0x97e   : > { %v3399_v9 = vpop.f32.mrb[32].mxu1 }
 0x97f   : > { %v3556_v63 = vmul.f32 0.35355338, %v3399_v9  ;;  %v5080_v8 = vpop.f32.mrb[33].mxu1 }
 0x981   : > { %v3568_v57 = vsel %vm3566_vm5, -1e+09, %v3556_v63 }
 0x982   : > { %v3475_v10 = vpop.f32.mrb[34].mxu1  ;;  %v3575_v11 = vsel %vm3571_vm9, %v3568_v57, -inf }
 0x983   : > { %v3557_v51 = vmul.f32 0.35355338, %v3475_v10  ;;  %3576 = vmax.xlane.f32.xlu1 %v3575_v11  ;;  %v5085_v14 = vpop.f32.mrb[35].mxu1 }
 0x985   : > { %v3569_v29 = vsel %vm3566_vm5, -1e+09, %v3557_v51 }
 0x986   : > { %v3551_v39 = vpop.f32.mrb[36].mxu1  ;;  %v3578_v15 = vsel %vm3571_vm9, %v3569_v29, -inf }
 0x987   : > { %v3558_v52 = vmul.f32 0.35355338, %v3551_v39  ;;  %3579 = vmax.xlane.f32.xlu0 %v3578_v15  ;;  %v5090_v13 = vpop.f32.mrb[37].mxu1 }
 0x988   : > { %v4573_v13 = vld [vmem:[%s7058_s14] ss:$0 sm:$0xff]  ;;  %s7065_s14 = sld [smem:[#allocation31_spill]] }
 0x989   : > { %v3570_v53 = vsel %vm3566_vm5, -1e+09, %v3558_v52 }
 0x98a   : > { %v3581_v26 = vsel %vm3571_vm9, %v3570_v53, -inf }
 0x98b   : > { %3582 = vmax.xlane.f32.xlu0 %v3581_v26 }
 0x994   : > { %3616 = vrot.lane.b32.xlu1 %v6792_v42, %s5666_s28 }
 0x9a1   : > { %v3574_v58 = vpop.xlane.xlu0 %3573 }
 0x9a2   : > { %v3584_v40 = vsub.f32 %v3567_v59, %v3574_v58  ;;  %v3944_v59 = vld [vmem:[%s7057_s22 + $0x18] sm:$0xff] }
 0x9a3   : > { %v5330_v6 = vpack.c.bf16 %v3944_v59, %v3943_v47 }
 0x9a4   : > { %v3588_v24 = vmul.f32 1.442695, %v3584_v40 }
 0x9a6   : > { %5530 = vpow2.f32 %v3588_v24 }
 0x9b0   : > { %v5531_v17 = vpop.eup %5530 }
 0x9b1   : > { %v3596_v20 = vsel %vm3571_vm9, %v5531_v17, 0.0 }
 0x9b8   : > { %3597 = vadd.xlane.f32.xlu1 %v3596_v20 }
 0xa10   : > { %v3577_v55 = vpop.xlane.xlu1 %3576 }
 0xa11   : > { %v3585_v21 = vsub.f32 %v3568_v57, %v3577_v55 }
 0xa13   : > { %v3590_v16 = vmul.f32 1.442695, %v3585_v21 }
 0xa14   : > { %v3617_v22 = vpop.permute.xlu1 %3616  ;;  %v3580_v23 = vpop.xlane.xlu0 %3579 }
 0xa15   : > { %5532 = vpow2.f32 %v3590_v16  ;;  %v3586_v41 = vsub.f32 %v3569_v29, %v3580_v23  ;;  %5092 = vmatpush3.msk.msra.mxu1 %vm1348_vm2, %v3617_v22  ;;  %v4057_v22 = vld [vmem:[%s7059_s3] sm:$0xff]  ;;  %v4058_v23 = vld [vmem:[%s7059_s3 + $0x8] sm:$0xff] }
 0xa16   : > { %5096 = vmatprep.subr.mxu1 %v5660_v12 }
 0xa17   : > { %v3592_v25 = vmul.f32 1.442695, %v3586_v41  ;;  %v5333_v41 = vpack.c.bf16 %v4058_v23, %v4057_v22  ;;  %v4581_v22 = vld [vmem:[%s5848_s13] ss:$0 sm:$0xff] }
 0xa18   : > { %v3583_v27 = vpop.xlane.xlu0 %3582 }
 0xa19   : > { %5534 = vpow2.f32 %v3592_v25  ;;  %v3587_v30 = vsub.f32 %v3570_v53, %v3583_v27  ;;  %v4059_v25 = vld [vmem:[%s7059_s3 + $0x10] sm:$0xff]  ;;  %5334 = vmatpush3.bf16.msra.mxu0 %v5333_v41 }
 0xa1a   : > { %5335 = vmatprep.subr.bf16.mxu0 %v5653_v1 }
 0xa1b   : > { %v3594_v18 = vmul.f32 1.442695, %v3587_v30 }
 0xa1d   : > { %5536 = vpow2.f32 %v3594_v18 }
 0xa1f   : > { %v5533_v34 = vpop.eup %5532 }
 0xa20   : > { %v3599_v32 = vsel %vm3571_vm9, %v5533_v34, 0.0 }
 0xa21   : > { %3600 = vadd.xlane.f32.xlu0 %v3599_v32 }
 0xa23   : > { %v5535_v19 = vpop.eup %5534 }
 0xa24   : > { %v3602_v33 = vsel %vm3571_vm9, %v5535_v19, 0.0 }
 0xa25   : > { %3603 = vadd.xlane.f32.xlu1 %v3602_v33 }
 0xa27   : > { %v5537_v36 = vpop.eup %5536 }
 0xa28   : > { %v3605_v35 = vsel %vm3571_vm9, %v5537_v36, 0.0 }
 0xa29   : > { %3606 = vadd.xlane.f32.xlu0 %v3605_v35 }
 0xa36   : > { %3771 = vrot.lane.b32.xlu1 %v6798_v0, %s5666_s28 }
 0xa3a   : > { %3848 = vrot.lane.b32.xlu1 %v6804_v2, %s5666_s28 }
 0xa3f   : > { %3694 = vrot.lane.b32.xlu0 %v6800_v60, %s5666_s28  ;;  %s7063_s28 = sld [smem:[#allocation28_spill]] }
 0xa45   : > { %v3598_v37 = vpop.xlane.xlu1 %3597 }
 0xa46   : > { %5538 = vrcp.f32 %v3598_v37 }
 0xa50   : > { %v5539_v45 = vpop.eup %5538 }
 0xa51   : > { %v3612_v61 = vmul.f32 %v5539_v45, %v5531_v17 }
 0xa53   : > { %5094 = vmatmul.mubr.msk.f32.vlgmr.msra.gmra.mrb[38].mxu1 %vm3618_vm10, %v3612_v61 }
 0xa54   : > { %5098 = vmatprep.mubr.msk.f32.mxu1 %vm5659_vm6, %v5660_v12 }
 0xaae   : > { %v3601_v56 = vpop.xlane.xlu0 %3600 }
 0xaaf   : > { %5540 = vrcp.f32 %v3601_v56 }
 0xab2   : > { %v3604_v44 = vpop.xlane.xlu1 %3603 }
 0xab3   : > { %5542 = vrcp.f32 %v3604_v44 }
 0xab6   : > { %v3607_v42 = vpop.xlane.xlu0 %3606  ;;  %v3772_v2 = vpop.permute.xlu1 %3771 }
 0xab7   : > { %5544 = vrcp.f32 %v3607_v42 }
 0xab9   : > { %v5541_v43 = vpop.eup %5540 }
 0xaba   : > { %v3613_v0 = vmul.f32 %v5541_v43, %v5533_v34  ;;  %v3695_v60 = vpop.permute.xlu0 %3694  ;;  %v3849_v5 = vpop.permute.xlu1 %3848 }
 0xabb   : > { %5097 = vmatpush3.msk.msra.mxu1 %vm1348_vm2, %v3695_v60 }
 0xabc   : > { %5099 = vmatmul.mubr.msk.f32.vlgmr.msra.gmra.mrb[40].mxu1 %vm3618_vm10, %v3613_v0  ;;  %5101 = vmatprep.subr.mxu1 %v5660_v12 }
 0xabd   : > { %v5543_v48 = vpop.eup %5542  ;;  %5102 = vmatpush3.msk.msra.mxu1 %vm1348_vm2, %v3772_v2  ;;  %5103 = vmatprep.mubr.msk.f32.mxu1 %vm5659_vm6, %v5660_v12 }
 0xabe   : > { %v3614_v4 = vmul.f32 %v5543_v48, %v5535_v19  ;;  %5106 = vmatprep.subr.mxu1 %v5660_v12 }
 0xac0   : > { %5104 = vmatmul.mubr.msk.f32.vlgmr.msra.gmra.mrb[42].mxu1 %vm3618_vm10, %v3614_v4 }
 0xac1   : > { %v5545_v46 = vpop.eup %5544  ;;  %5107 = vmatpush3.msk.msra.mxu1 %vm1348_vm2, %v3849_v5  ;;  %5108 = vmatprep.mubr.msk.f32.mxu1 %vm5659_vm6, %v5660_v12  ;;  %vm3938_vm2 = vcmask 130048  }
 0xac2   : > { %v3615_v28 = vmul.f32 %v5545_v46, %v5537_v36  ;;  %5326 = vmatprep.subr.bf16.mxu1 %v5653_v1 }
 0xac4   : > { %5109 = vmatmul.mubr.msk.f32.vlgmr.msra.gmra.mrb[44].mxu1 %vm3618_vm10, %v3615_v28 }
 0xac5   : > { %5119 = vmatprep.mubr.msk.f32.mxu1 %vm5659_vm6, %v5660_v12  ;;  %5328 = vmatpush3.bf16.msra.mxu1 %v5327_v54  ;;  %v4576_v54 = vld [vmem:[%s7062_s5] ss:$0 sm:$0xff] }
 0xac6   : > { %5329 = vmatprep.subr.bf16.mxu1 %v5653_v1 }
 0xac9   : > { %5331 = vmatpush3.bf16.msra.mxu1 %v5330_v6 }
 0xaca   : > { %5338 = vmatprep.subr.bf16.mxu1 %v5653_v1 }
 0xb26   : > { %v3690_v62 = vpop.f32.mrb[38].mxu1 }
 0xb27   : > { %v5095_v7 = vpop.f32.mrb[39].mxu1 }
 0xb8f   : > { %v3767_v9 = vpop.f32.mrb[40].mxu1 }
 0xb90   : > { %3926 = vrot.lane.b32.xlu0 %v3767_v9, %s5667_s8  ;;  %v5100_v63 = vpop.f32.mrb[41].mxu1  ;;  %s7064_s8 = sld [smem:[#allocation30_spill]] }
 0xb91   : > { %v4577_v63 = vld [vmem:[%s7063_s28] ss:$0 sm:$0xff] }
 0xb93   : > { %v3844_v8 = vpop.f32.mrb[42].mxu1 }
 0xb94   : > { %3930 = vrot.lane.b32.xlu1 %v3844_v8, %s5668_s6  ;;  %v5105_v57 = vpop.f32.mrb[43].mxu1  ;;  %s1145_s6 = sand.u32 1, %s5606_s10  }
 0xb95   : > { %s1146_s5 = scalar_lea.vmem [#allocation3], %s1145_s6 }
 0xb96   : > { %s4368_s28 = sshll.u32 %s1146_s5, 4  ;;  %s6942_s28 = int_to_ptr.vmem [resolvable:$true] %s4368_s28 }
 0xb97   : > { %v3921_v10 = vpop.f32.mrb[44].mxu1 }
 0xb98   : > { %3934 = vrot.lane.b32.xlu0 %v3921_v10, %s7038_s2  ;;  %v5110_v11 = vpop.f32.mrb[45].mxu1  ;;  %s7060_s2 = sld [smem:[#allocation29_spill]] }
 0xb9e   : > { %v4142_v30 = vld [vmem:[%s7060_s2] sm:$0xff]  ;;  %v4143_v18 = vld [vmem:[%s7060_s2 + $0x8] sm:$0xff]  ;;  %v4144_v34 = vld [vmem:[%s7060_s2 + $0x10] sm:$0xff] }
 0xb9f   : > { %v5339_v32 = vpack.c.bf16 %v4143_v18, %v4142_v30  ;;  %v4145_v19 = vld [vmem:[%s7060_s2 + $0x18] sm:$0xff]  ;;  %v4146_v36 = vld [vmem:[%s7060_s2 + $0x20] sm:$0xff]  ;;  %v4147_v35 = vld [vmem:[%s7060_s2 + $0x28] sm:$0xff] }
 0xba0   : > { %v5342_v33 = vpack.c.bf16 %v4145_v19, %v4144_v34  ;;  %v5345_v37 = vpack.c.bf16 %v4147_v35, %v4146_v36  ;;  %v4148_v45 = vld [vmem:[%s7060_s2 + $0x30] sm:$0xff]  ;;  %v4149_v61 = vld [vmem:[%s7060_s2 + $0x38] sm:$0xff]  ;;  %v4150_v44 = vld [vmem:[%s7060_s2 + $0x40] sm:$0xff] }
 0xba1   : > { %v5348_v56 = vpack.c.bf16 %v4149_v61, %v4148_v45  ;;  %v4151_v42 = vld [vmem:[%s7060_s2 + $0x48] sm:$0xff]  ;;  %v4152_v0 = vld [vmem:[%s7060_s2 + $0x50] sm:$0xff]  ;;  %v4153_v2 = vld [vmem:[%s7060_s2 + $0x58] sm:$0xff] }
 0xba2   : > { %v5351_v43 = vpack.c.bf16 %v4151_v42, %v4150_v44  ;;  %v5354_v60 = vpack.c.bf16 %v4153_v2, %v4152_v0  ;;  %v4154_v48 = vld [vmem:[%s7060_s2 + $0x60] sm:$0xff]  ;;  %v4155_v4 = vld [vmem:[%s7060_s2 + $0x68] sm:$0xff]  ;;  %v4156_v6 = vld [vmem:[%s7060_s2 + $0x70] sm:$0xff] }
 0xba3   : > { %v5357_v5 = vpack.c.bf16 %v4155_v4, %v4154_v48  ;;  %v4157_v9 = vld [vmem:[%s7060_s2 + $0x78] sm:$0xff]  ;;  %s5552_s2 = scalar_lea.vmem %s6942_s28, 16 }
 0xba4   : > { %p5553_p11 = scmp.ne.s32.totalorder %s6942_s28, %s5552_s2 }
 0xba6   : > { %p5554_p12 = pnand %p5553_p11, %p5901_p5 }
 0xba8   : > { %p5555_p13 = pneg %p5554_p12 }
 0xc02   : > { %v3927_v51 = vpop.permute.xlu0 %3926 }
 0xc03   : > { %v3937_v29 = vsel %vm3252_vm1, %v3690_v62, %v3927_v51  ;;  %v4579_v51 = vld [vmem:[%s7064_s8] ss:$0 sm:$0xff]  ;;  %s6940_s8 = scalar_lea.hbm %s5861_s4, %s4584_s9 }
 0xc06   : > { %v3931_v14 = vpop.permute.xlu1 %3930 }
 0xc07   : > { %v3939_v39 = vsel %vm3938_vm2, %v3937_v29, %v3931_v14 }
 0xc0a   : > { %v3935_v15 = vpop.permute.xlu0 %3934 }
 0xc0b   : > { %v3940_v52 = vsel %vm1405_vm8, %v3939_v39, %v3935_v15 }
 0xc0c   : > { %5120 = vmatmul.mubr.msk.f32.vlgmr.msra.gmra.mrb[46].mxu1 %vm3169_vm0, %v3940_v52 }
 0xc0d   : > { %5165 = vmatprep.mubr.msk.f32.mxu1 %vm5659_vm6, %v5660_v12  ;;  %5340 = vmatpush3.bf16.msra.mxu1 %v5339_v32 }
 0xc0e   : > { %5341 = vmatprep.subr.bf16.mxu1 %v5653_v1 }
 0xc11   : > { %5343 = vmatpush3.bf16.msra.mxu1 %v5342_v33 }
 0xc12   : > { %5344 = vmatprep.subr.bf16.mxu1 %v5653_v1 }
 0xc15   : > { %5346 = vmatpush3.bf16.msra.mxu1 %v5345_v37 }
 0xc16   : > { %5347 = vmatprep.subr.bf16.mxu1 %v5653_v1 }
 0xc19   : > { %5349 = vmatpush3.bf16.msra.mxu1 %v5348_v56 }
 0xc1a   : > { %5350 = vmatprep.subr.bf16.mxu1 %v5653_v1 }
 0xc1d   : > { %5352 = vmatpush3.bf16.msra.mxu1 %v5351_v43 }
 0xc1e   : > { %5353 = vmatprep.subr.bf16.mxu1 %v5653_v1 }
 0xc21   : > { %5355 = vmatpush3.bf16.msra.mxu1 %v5354_v60 }
 0xc22   : > { %5356 = vmatprep.subr.bf16.mxu1 %v5653_v1 }
 0xc25   : > { %5358 = vmatpush3.bf16.msra.mxu1 %v5357_v5 }
 0xc26   : > { %5359 = vmatprep.subr.bf16.mxu1 %v5653_v1  ;;  %v5360_v1 = vpack.c.bf16 %v4157_v9, %v4156_v6 }
 0xc29   : > { %5361 = vmatpush3.bf16.msra.mxu1 %v5360_v1 }
 0xcdf   : > { %v4021_v53 = vpop.f32.mrb[46].mxu1 }
 0xce0   : > { %v4022_v26 = vadd.f32 %v4573_v13, %v4021_v53  ;;  %v5121_v58 = vpop.f32.mrb[47].mxu1 }
 0xce2   : > { %v4025_v40 = vadd.f32 %v4022_v26, %v6785_v38  ;;  %v4060_v38 = vld [vmem:[%s7059_s3 + $0x18] sm:$0xff]  ;;  %s5556_s3 = sshll.u32 %s5669_s0, 4  ;;  %s5557_s3 = int_to_ptr.vmem [resolvable:$false] %s5556_s3 }
 0xce3   : > { %v5336_v27 = vpack.c.bf16 %v4060_v38, %v4059_v25  ;;  %v4266_v38 = vld [vmem:[%s7066_s12] sm:$0x1]  ;;  %s5558_s12 = scalar_lea.vmem %s5557_s3, 32  ;;  %p5559_p0 = scmp.lt.s32.totalorder %s6942_s28, %s5557_s3 }
 0xce4   : > { %v4029_v24 = vsel %vm4028_vm11, %v4025_v40, 0.0  ;;  %p5560_p1 = scmp.lt.s32.totalorder %s5558_s12, %s5552_s2 }
 0xce5   : > { %4030 = vadd.xlane.f32.xlu1 %v4029_v24  ;;  %5337 = vmatpush3.bf16.msra.mxu0 %v5336_v27 }
 0xce6   : > { %5168 = vmatprep.subr.mxu0 %v5660_v12  ;;  %p5561_p2 = por %p5560_p1, %p5559_p0 }
 0xce8   : > { %p5562_p3 = pnand %p5561_p2, %p5555_p13 }
 0xd72   : > { %v4031_v17 = vpop.xlane.xlu1 %4030 }
 0xd73   : > { %v4033_v20 = vmul.f32 0.03125, %v4031_v17 }
 0xd75   : > { %v4034_v55 = vsub.f32 %v4025_v40, %v4033_v20  ;;  %v4267_v40 = vld [vmem:[#allocation2] sm:$0x1] }
 0xd77   : > { %v4035_v21 = vmul.f32 %v4034_v55, %v4034_v55 }
 0xd79   : > { %v4036_v16 = vsel %vm4028_vm11, %v4035_v21, 0.0  ;;  %v4580_v21 = vld [vmem:[%s7065_s14] ss:$0 sm:$0xff]  ;;  %s4356_s14 = scalar_lea.sflag [#allocation4], %s1145_s6 }
 0xd7a   : > { %4037 = vadd.xlane.f32.xlu0 %v4036_v16 }
 0xe07   : > { %v4038_v46 = vpop.xlane.xlu0 %4037 }
 0xe08   : > { %v4039_v28 = vmul.f32 0.03125, %v4038_v46 }
 0xe0a   : > { %v4040_v62 = vadd.f32 1e-05, %v4039_v28 }
 0xe0c   : > { %5546 = vrsqrt.f32 %v4040_v62 }
 0xe16   : > { %v5547_v7 = vpop.eup %5546 }
 0xe17   : > { %v4042_v50 = vmul.f32 %v5547_v7, %v4034_v55 }
 0xe19   : > { %v4049_v47 = vmul.f32 %v4575_v3, %v4042_v50 }
 0xe1b   : > { %v4056_v59 = vadd.f32 %v4576_v54, %v4049_v47 }
 0xe1d   : > { %5131 = vmatmul.mubr.msk.f32.vlgmr.msra.gmra.mrb[46].mxu0 %vm3169_vm0, %v4056_v59 }
 0xe1e   : > { %5170 = vmatprep.mubr.msk.f32.mxu0 %vm5659_vm6, %v5660_v12  ;;  %vm4353_vm6 = vcmask 24576  }
 0xef0   : > { %v4137_v8 = vpop.f32.mrb[46].mxu0 }
 0xef1   : > { %v4138_v57 = vadd.f32 %v4577_v63, %v4137_v8  ;;  %v5132_v10 = vpop.f32.mrb[47].mxu0 }
 0xef3   : > { %v4141_v11 = vmax.f32 %v4138_v57, 0.0 }
 0xef5   : > { %5166 = vmatmul.mubr.f32.vlgmr.msra.gmra.mrb[48].mxu1 %v4141_v11 }
 0xfc8   : > { %v4231_v14 = vpop.f32.mrb[48].mxu1 }
 0xfc9   : > { %v4232_v29 = vadd.f32 %v4579_v51, %v4231_v14  ;;  %v5167_v39 = vpop.f32.mrb[49].mxu1 }
 0xfcb   : > { %v4235_v15 = vadd.f32 %v4232_v29, %v4056_v59 }
 0xfcd   : > { %v4238_v52 = vsel %vm4028_vm11, %v4235_v15, 0.0 }
 0xfce   : > { %4239 = vadd.xlane.f32.xlu0 %v4238_v52 }
 0xfe4   : > { %4270 = vperm.xlu0 %5479, %v4267_v40  }
0x105b   : > { %v4240_v12 = vpop.xlane.xlu0 %4239 }
0x105c   : > { %v4241_v13 = vmul.f32 0.03125, %v4240_v12 }
0x105e   : > { %v4242_v53 = vsub.f32 %v4235_v15, %v4241_v13 }
0x1060   : > { %v4243_v26 = vmul.f32 %v4242_v53, %v4242_v53 }
0x1062   : > { %v4244_v58 = vsel %vm4028_vm11, %v4243_v26, 0.0 }
0x1063   : > { %4245 = vadd.xlane.f32.xlu1 %v4244_v58  ;;  %v4271_v27 = vpop.permute.xlu0 %4270 }
0x1064   : > { %v4276_v30 = vrot.slane %v4271_v27, %v3564_v49 }
0x10f0   : > { %v4246_v24 = vpop.xlane.xlu1 %4245 }
0x10f1   : > { %v4247_v17 = vmul.f32 0.03125, %v4246_v24 }
0x10f3   : > { %v4248_v20 = vadd.f32 1e-05, %v4247_v17 }
0x10f5   : > { %5548 = vrsqrt.f32 %v4248_v20 }
0x10ff   : > { %v5549_v55 = vpop.eup %5548 }
0x1100   : > { %v4250_v16 = vmul.f32 %v5549_v55, %v4242_v53 }
0x1102   : > { %v4257_v23 = vmul.f32 %v4580_v21, %v4250_v16 }
0x1104   : > { %v4264_v41 = vadd.f32 %v4581_v22, %v4257_v23 }
0x1106   : > { %5550 = vtanh.f32 %v4264_v41 }
0x1110   : > { %v5551_v25 = vpop.eup %5550 }
0x1111   : > { %5169 = vmatpush3.xpose.msk.msra.mxu0 %vm3169_vm0, %v5551_v25 }
0x1114   : > { %5171 = vmatmul.mubr.msk.f32.vlgmr.msra.gmra.mrb[48].mxu0 %vm3169_vm0, %v4266_v38 }
0x11e7   : > { %v4349_v18 = vpop.f32.mrb[48].mxu0 }
0x11e8   : > { %v4350_v34 = vadd.f32 %v4349_v18, %v4276_v30  ;;  %v5172_v32 = vpop.f32.mrb[49].mxu0 }
0x11ea   : > { %4354 = vst.msk [vmem:[%s1146_s5] sm:$0x1] %vm4353_vm6, %v4350_v34 }
0x11eb   : > { %5565 = shalt.err (!%p5562_p3)
}
0x11ec   : > { %s5566_s6 = scalar_lea.hbm %s6940_s8, 16  ;;  %s5570_s9 = scalar_lea.hbm %s5861_s4, 32 }
0x11ed   : > { %p5567_p4 = scmp.ne.s32.totalorder %s6940_s8, %s5566_s6  ;;  %p5571_p9 = scmp.lt.u32.totalorder %s6940_s8, %s5861_s4 }
0x11ee   : > { %p5572_p10 = scmp.lt.u32.totalorder %s5570_s9, %s5566_s6  ;;  %p5574_p12 = scmp.lt.u32.totalorder %s5566_s6, %s6940_s8 }
0x11ef   : > { %p5568_p7 = pnand %p5567_p4, %p5901_p5 }
0x11f0   : > { %p5573_p11 = por %p5572_p10, %p5571_p9 }
0x11f1   : > { %p5569_p8 = pneg %p5568_p7 }
0x11f2   : > { %p5575_p0 = por %p5574_p12, %p5573_p11 }
0x11f4   : > { %p5576_p13 = pnand %p5575_p0, %p5569_p8 }
0x11f6   : > { %5579 = shalt.err (!%p5576_p13)
}
0x11f7   : > { %5387 = dma.vmem_to_hbm [thread:$0]  (%p5901_p5), %s6942_s28, 16, %s6940_s8, %s4356_s14  }
0x11f8 PF: > { %p5393_p1 = scmp.ge.s32.totalorder %s5614_s15, 2  ;;  %s4380_s12 = sand.u32 1, %s5602_s7  }
0x11f9   : > { %s4381_s3 = scalar_lea.sflag [#allocation4], %s4380_s12 }
0x11fa   : > { %p5390_p2 = pnand %p5393_p1, %p5905_p6 }
0x11fc   : > { %5597 = dma.done.wait (!%p5390_p2), %s4381_s3, 16  }
0x11fd   : > { %5599 = vsyncadd (!%p5390_p2), %s4381_s3, 4294967280  ;;  %p87_p3 = scmp.ge.s32.totalorder %s5888_s16, 4   ;;  %s7067_s7 = smov %s5606_s10 }
0x11fe   : > { %s7068_s10 = smov %s5610_s11  ;;  %s7069_s11 = smov %s5899_s23 }
0x11ff   : > { %s7070_s15 = smov %s5888_s16  ;;  %89 = sbr.rel (!%p87_p3) target bundleno = 77 (0x4d), region = 246 }
0x1206   :  { %4385 = vsyncpa [#allocation4], 1 }
0x1207   :  { %4387 = vsyncpa [#allocation4 + $0x1], 1 }

</bundles_post_ra>
